<compile_context>
chip_gen: v7x
topology: tpu7x:2x2x1
jax: 0.10.0
libtpu: 0.0.40
codegen_flags: <defaults>
</compile_context>

<pallas_src>
import functools

import jax
import jax.numpy as jnp
from jax.experimental import pallas as pl
from jax.experimental.pallas import tpu as pltpu


def _round_up(x, m):
    return ((x + m - 1) // m) * m


# ----------------------------------------------------------------------------
# Kernel 1: 2-layer LSTM recurrence.
# Grid = (batch blocks ["parallel"], time blocks ["arbitrary"]).  Hidden/cell
# state is carried across time blocks in VMEM scratch; [h1 | h2] live in one
# (B_BLK, 2*HP) buffer so layer 2 is a single fused matmul.
# ----------------------------------------------------------------------------
def _lstm_kernel(gx_ref, whh1_ref, w2_ref, b2_ref, out_ref, hcat, c1, c2,
                 *, t_blk, hp):
    tb = pl.program_id(1)

    @pl.when(tb == 0)
    def _():
        hcat[...] = jnp.zeros_like(hcat)
        c1[...] = jnp.zeros_like(c1)
        c2[...] = jnp.zeros_like(c2)

    whh1 = whh1_ref[...]
    w2 = w2_ref[...]
    bblk = hcat.shape[0]
    # Hoisted bias broadcast (JAX does not CSE broadcast_in_dim in the
    # unrolled loop); layer-1 bias is already folded into gx.
    b2 = jnp.broadcast_to(b2_ref[...], (bblk, 4 * hp))

    def gates(g):
        # Each slice is a full 128-lane-aligned column block (hp % 128 == 0).
        i = jax.nn.sigmoid(g[:, 0:hp])
        f = jax.nn.sigmoid(g[:, hp:2 * hp])
        gg = jnp.tanh(g[:, 2 * hp:3 * hp])
        o = jax.nn.sigmoid(g[:, 3 * hp:4 * hp])
        return i, f, gg, o

    def body(t, carry):
        # Layer 1: x@W_ih1 + b1 precomputed outside the recurrence (gx);
        # single recurrent matmul per step.
        g1 = gx_ref[t] + jnp.dot(hcat[:, 0:hp], whh1,
                                 preferred_element_type=jnp.float32)
        i1, f1, gg1, o1 = gates(g1)
        c1n = f1 * c1[...] + i1 * gg1
        h1n = o1 * jnp.tanh(c1n)
        c1[...] = c1n
        hcat[:, 0:hp] = h1n
        # TODO(synk): nn.LSTM inter-layer dropout (p=0.2, training mode)
        # omitted; forward matches eval mode.
        # Layer 2: one fused matmul over [h1_new | h2_old] with stacked weights.
        g2 = jnp.dot(hcat[...], w2, preferred_element_type=jnp.float32) + b2
        i2, f2, gg2, o2 = gates(g2)
        c2n = f2 * c2[...] + i2 * gg2
        h2n = o2 * jnp.tanh(c2n)
        c2[...] = c2n
        hcat[:, hp:2 * hp] = h2n
        out_ref[t] = h2n                              # (B_BLK, HP), lane dense
        return carry

    jax.lax.fori_loop(0, t_blk, body, 0,
                      unroll=(True if t_blk <= 8 else 8))


def run_lstm(gx, whh1, w2s, b2, t_blk, b_blk):
    sp, bp, g4 = gx.shape
    hp = g4 // 4
    kernel = functools.partial(_lstm_kernel, t_blk=t_blk, hp=hp)
    # NOTE: pipeline_mode=pl.Buffered(1) on the constant-index weight specs
    # would halve their VMEM footprint; omitted for compatibility (<1.5 MiB
    # total at these shapes).
    return pl.pallas_call(
        kernel,
        out_shape=jax.ShapeDtypeStruct((sp, bp, hp), jnp.float32),
        grid_spec=pltpu.PrefetchScalarGridSpec(
            num_scalar_prefetch=0,
            grid=(bp // b_blk, sp // t_blk),
            in_specs=[
                pl.BlockSpec((t_blk, b_blk, 4 * hp), lambda b, t: (t, b, 0)),
                pl.BlockSpec((hp, 4 * hp), lambda b, t: (0, 0)),
                pl.BlockSpec((2 * hp, 4 * hp), lambda b, t: (0, 0)),
                pl.BlockSpec((1, 4 * hp), lambda b, t: (0, 0)),
            ],
            out_specs=pl.BlockSpec((t_blk, b_blk, hp), lambda b, t: (t, b, 0)),
            scratch_shapes=[
                pltpu.VMEM((b_blk, 2 * hp), jnp.float32),   # [h1 | h2]
                pltpu.VMEM((b_blk, hp), jnp.float32),       # c1
                pltpu.VMEM((b_blk, hp), jnp.float32),       # c2
            ],
        ),
        compiler_params=pltpu.CompilerParams(
            dimension_semantics=("parallel", "arbitrary"),
            vmem_limit_bytes=32 * 1024 * 1024),
    )(gx, whh1, w2s, b2)


# ----------------------------------------------------------------------------
# Kernel 2: per-step head.  Reads the LSTM output directly in (S, B, HP)
# layout (no wrapper transpose); all score math is lane-dense:
#   proj_tiled = tanh(h @ W_tiled + b_tiled)        (rows, F*L*E)  one MXU matmul
#   prod       = proj_tiled * concat([se] * F)      (rows, F*L*E)  VPU
#   sf         = prod @ G (block-diag ones)         (rows, F*L)    MXU reduce
#   scores     = max over F head slices             (rows, L)
# then log-softmax over labels + masked average -> (rows, 1).
# ----------------------------------------------------------------------------
def _head_kernel(h_ref, wt_ref, bt_ref, g_ref, se_ref, mask_ref, lt_ref,
                 out_ref, *, n_heads, n_label):
    sblk, bblk, hp = h_ref.shape
    r = sblk * bblk
    h = h_ref[...].reshape(r, hp)                       # layout-preserving merge
    proj = jnp.tanh(
        jnp.dot(h, wt_ref[...], preferred_element_type=jnp.float32)
        + bt_ref[...])                                  # (r, F*L*E)
    se = se_ref[...]                                    # (r, L*E), lane dense
    se_rep = jnp.concatenate([se] * n_heads, axis=1)    # (r, F*L*E)
    prod = proj * se_rep
    sf = jnp.dot(prod, g_ref[...],
                 preferred_element_type=jnp.float32)    # (r, F*L)
    scores = sf[:, 0:n_label]
    for f in range(1, n_heads):
        scores = jnp.maximum(scores, sf[:, f * n_label:(f + 1) * n_label])
    m = jnp.max(scores, axis=-1, keepdims=True)
    zc = scores - m
    lsm = zc - jnp.log(jnp.sum(jnp.exp(zc), axis=-1, keepdims=True))
    lt = lt_ref[...]
    num = jnp.sum(mask_ref[...] * lt * lsm, axis=-1, keepdims=True)
    den = jnp.sum(lt, axis=-1, keepdims=True) + 1e-10
    out_ref[...] = num / den                            # (r, 1)


def _pick_s_blk(sp, bp, target_rows=512):
    best = 1
    for d in range(1, sp + 1):
        if sp % d == 0 and d * bp <= target_rows:
            best = d
    return best


def run_head(out_tm, w_tiled, b_tiled, g_mat, se_flat, mask_flat, lt_flat,
             s_blk):
    sp, bp, hp = out_tm.shape
    rows = s_blk * bp
    fle = w_tiled.shape[1]
    fl = g_mat.shape[1]
    l = lt_flat.shape[1]
    kernel = functools.partial(_head_kernel, n_heads=fl // l, n_label=l)
    return pl.pallas_call(
        kernel,
        out_shape=jax.ShapeDtypeStruct((sp * bp, 1), jnp.float32),
        grid_spec=pltpu.PrefetchScalarGridSpec(
            num_scalar_prefetch=0,
            grid=(sp // s_blk,),
            in_specs=[
                pl.BlockSpec((s_blk, bp, hp), lambda i: (i, 0, 0)),
                pl.BlockSpec((hp, fle), lambda i: (0, 0)),
                pl.BlockSpec((1, fle), lambda i: (0, 0)),
                pl.BlockSpec((fle, fl), lambda i: (0, 0)),
                pl.BlockSpec((rows, se_flat.shape[1]), lambda i: (i, 0)),
                pl.BlockSpec((rows, 1), lambda i: (i, 0)),
                pl.BlockSpec((rows, l), lambda i: (i, 0)),
            ],
            out_specs=pl.BlockSpec((rows, 1), lambda i: (i, 0)),
        ),
        compiler_params=pltpu.CompilerParams(
            dimension_semantics=("parallel",),
            vmem_limit_bytes=32 * 1024 * 1024),
    )(out_tm, w_tiled, b_tiled, g_mat, se_flat, mask_flat, lt_flat)


# ----------------------------------------------------------------------------
# Kernel 3: last-step head (tiny; grid-less).  Same lane-dense tiled-weight +
# block-diagonal-ones-matmul structure as the per-step head.
# ----------------------------------------------------------------------------
def _last_head_kernel(h_ref, w2t_ref, b2t_ref, g2_ref, sle_ref, llt_ref,
                      out_ref, *, n_heads, n_label):
    h = h_ref[...]                                      # (BP, HP)
    proj = jnp.tanh(
        jnp.dot(h, w2t_ref[...], preferred_element_type=jnp.float32)
        + b2t_ref[...])                                 # (BP, U*LL*E)
    sle = sle_ref[...]                                  # (BP, LL*E)
    sle_rep = jnp.concatenate([sle] * n_heads, axis=1)  # (BP, U*LL*E)
    prod = proj * sle_rep
    sf = jnp.dot(prod, g2_ref[...],
                 preferred_element_type=jnp.float32)    # (BP, U*LL)
    scores = sf[:, 0:n_label]
    # TODO(synk): for large num_user_state (e.g. 100) chunk the tiled weights /
    # G matrix and this slice-max chain instead of fully unrolling it.
    for u in range(1, n_heads):
        scores = jnp.maximum(scores, sf[:, u * n_label:(u + 1) * n_label])
    m = jnp.max(scores, axis=-1, keepdims=True)
    zc = scores - m
    lsm = zc - jnp.log(jnp.sum(jnp.exp(zc), axis=-1, keepdims=True))
    llt = llt_ref[...]
    num = jnp.sum(llt * lsm, axis=-1, keepdims=True)
    den = jnp.sum(llt, axis=-1, keepdims=True) + 1e-10
    out_ref[...] = num / den                            # (BP, 1)


def run_last_head(h_last, w2_tiled, b2_tiled, g2_mat, sle_flat, llt,
                  n_heads, n_label):
    bp = h_last.shape[0]
    return pl.pallas_call(
        functools.partial(_last_head_kernel, n_heads=n_heads, n_label=n_label),
        out_shape=jax.ShapeDtypeStruct((bp, 1), jnp.float32),
    )(h_last, w2_tiled, b2_tiled, g2_mat, sle_flat, llt)


# ----------------------------------------------------------------------------
# Parameter prep: transpose PyTorch-layout LSTM weights, pad each gate's
# columns to a 128-lane-aligned H_PAD block (padded lanes get zero weights and
# zero bias so padded hidden/cell lanes stay exactly zero), and stack layer-2
# input/recurrent weights for the fused matmul.
# ----------------------------------------------------------------------------
def _pad_gate_cols(w, h, hp):
    in_dim = w.shape[1]
    out = jnp.zeros((in_dim, 4 * hp), jnp.float32)
    for g in range(4):
        out = out.at[:, g * hp:g * hp + h].set(
            w[g * h:(g + 1) * h, :].T.astype(jnp.float32))
    return out


def _pad_gate_bias(b, h, hp):
    out = jnp.zeros((1, 4 * hp), jnp.float32)
    for g in range(4):
        out = out.at[:, g * hp:g * hp + h].set(
            b[g * h:(g + 1) * h][None, :].astype(jnp.float32))
    return out


def _tile_head_weights(lin_w, lin_b, n_heads, n_label, emb_dim, h, hp):
    """Tile the (n_heads*E, H) torch linear per label so one matmul produces
    the projection for every (head, label) pair, plus the block-diag reduce
    matrix G with G[k, c] = 1 iff k // E == c."""
    fle = n_heads * n_label * emb_dim
    lwT = jnp.zeros((hp, n_heads * emb_dim), jnp.float32)
    lwT = lwT.at[:h].set(lin_w.T.astype(jnp.float32))
    w_tiled = jnp.broadcast_to(
        lwT.reshape(hp, n_heads, 1, emb_dim),
        (hp, n_heads, n_label, emb_dim)).reshape(hp, fle)
    b_tiled = jnp.broadcast_to(
        lin_b.astype(jnp.float32).reshape(n_heads, 1, emb_dim),
        (n_heads, n_label, emb_dim)).reshape(1, fle)
    g_mat = (jnp.arange(fle)[:, None] // emb_dim
             == jnp.arange(n_heads * n_label)[None, :]).astype(jnp.float32)
    return w_tiled, b_tiled, g_mat


# ----------------------------------------------------------------------------
# Forward pass wrapper
# ----------------------------------------------------------------------------
def policy_net_regression_forward(params, inputs, label, label_type,
                                  last_label, last_label_type, mask,
                                  emb_dim, num_user_state, return_raw=False):
    B, S = inputs.shape
    L = label.shape[2]
    LL = last_label.shape[1]
    H = params["w_hh_l0"].shape[1]
    HP = _round_up(H, 128)                      # lane-aligned hidden size
    BP = _round_up(B, 8)                        # sublane-aligned batch
    T_BLK = 32 if S >= 32 else (16 if S >= 16 else 8)
    SP = _round_up(S, T_BLK)
    n_bblk = 2 if (BP >= 16 and BP % 16 == 0) else 1   # megacore split (v7x)
    B_BLK = BP // n_bblk

    # graph embedding lookup (stand-in for the external `graph_embeddings`
    # call), gathered directly in time-major (S, B, E) order.
    ids_t = (inputs * mask).astype(jnp.int32).T                    # (S, B)
    x_sb = params["graph_emb"][ids_t].astype(jnp.float32)          # (S, B, E)
    x_pad = jnp.pad(x_sb, ((0, SP - S), (0, BP - B), (0, 0)))      # (SP, BP, E)

    # LSTM weights (gate-padded / transposed / stacked).
    wih1T = _pad_gate_cols(params["w_ih_l0"], H, HP)               # (E, 4HP)
    b1 = _pad_gate_bias(params["b_ih_l0"] + params["b_hh_l0"], H, HP)
    whh1T = jnp.pad(_pad_gate_cols(params["w_hh_l0"], H, HP),
                    ((0, HP - H), (0, 0)))                         # (HP, 4HP)
    wih2T = jnp.pad(_pad_gate_cols(params["w_ih_l1"], H, HP),
                    ((0, HP - H), (0, 0)))
    whh2T = jnp.pad(_pad_gate_cols(params["w_hh_l1"], H, HP),
                    ((0, HP - H), (0, 0)))
    w2s = jnp.concatenate([wih2T, whh2T], axis=0)                  # (2HP, 4HP)
    b2 = _pad_gate_bias(params["b_ih_l1"] + params["b_hh_l1"], H, HP)

    # Layer-1 input projection (+bias) for all time steps: one big XLA matmul
    # outside the serial recurrence.
    gx = jnp.tensordot(x_pad, wih1T, axes=([2], [0])) + b1.reshape(1, 1, 4 * HP)

    out_tm = run_lstm(gx, whh1T, w2s, b2, T_BLK, B_BLK)            # (SP, BP, HP)
    h_last = out_tm[S - 1]                                         # (BP, HP)

    # ---- per-step head: reads out_tm directly in (S, B, HP) layout ----------
    S_BLK = _pick_s_blk(SP, BP, target_rows=512)

    label_t = jnp.transpose(label, (1, 0, 2))                      # (S, B, L)
    se_sb = params["video_emb"][label_t].astype(jnp.float32)       # (S, B, L, E)
    se_sb = se_sb.reshape(S, B, L * emb_dim)
    se_flat = jnp.pad(se_sb, ((0, SP - S), (0, BP - B), (0, 0))
                      ).reshape(SP * BP, L * emb_dim)              # lane dense
    mask_flat = jnp.pad(mask.astype(jnp.float32).T, ((0, SP - S), (0, BP - B))
                        ).reshape(SP * BP, 1)
    lt_flat = jnp.pad(jnp.transpose(label_type.astype(jnp.float32), (1, 0, 2)),
                      ((0, SP - S), (0, BP - B), (0, 0))).reshape(SP * BP, L)

    w_tiled, b_tiled, g_mat = _tile_head_weights(
        params["linear_w"], params["linear_b"], 5, L, emb_dim, H, HP)

    per_step = run_head(out_tm, w_tiled, b_tiled, g_mat,
                        se_flat, mask_flat, lt_flat, S_BLK)        # (SP*BP, 1)
    per_mat = per_step[:, 0].reshape(SP, BP)[:S, :B]               # (S, B)
    logits = jnp.mean(per_mat, axis=0)                             # (B,)

    # ---- last-step head ------------------------------------------------------
    sle = params["video_emb"][last_label].astype(jnp.float32)      # (B, LL, E)
    sle_flat = jnp.pad(sle.reshape(B, LL * emb_dim), ((0, BP - B), (0, 0)))
    llt_p = jnp.pad(last_label_type.astype(jnp.float32), ((0, BP - B), (0, 0)))
    w2_tiled, b2_tiled, g2_mat = _tile_head_weights(
        params["linear2_w"], params["linear2_b"], num_user_state, LL,
        emb_dim, H, HP)

    last_logits = run_last_head(h_last, w2_tiled, b2_tiled, g2_mat,
                                sle_flat, llt_p,
                                num_user_state, LL)[:B, 0]          # (B,)

    # TODO(synk): top-k recommendation-accuracy bookkeeping (python dict loops,
    # external `video_graph_adj_mat`) and the `last_outputs_all` top-k have no
    # Pallas equivalent; omitted.  `last_label_p` is unused in the torch
    # forward and is therefore not taken as an argument here.
    if return_raw:
        return logits, last_logits
    return -logits * 0.0, -last_logits * 0.5


# ----------------------------------------------------------------------------
# Pure-JAX reference (for sanity checking the kernels)
# ----------------------------------------------------------------------------
def _ref_lstm_layer(x_tm, wihT, whhT, b, H):
    B = x_tm.shape[1]

    def step(carry, xt):
        h, c = carry
        g = xt @ wihT + h @ whhT + b
        i = jax.nn.sigmoid(g[:, :H])
        f = jax.nn.sigmoid(g[:, H:2 * H])
        gg = jnp.tanh(g[:, 2 * H:3 * H])
        o = jax.nn.sigmoid(g[:, 3 * H:4 * H])
        c = f * c + i * gg
        h = o * jnp.tanh(c)
        return (h, c), h

    init = (jnp.zeros((B, H), jnp.float32), jnp.zeros((B, H), jnp.float32))
    _, hs = jax.lax.scan(step, init, x_tm)
    return hs


def reference_forward(params, inputs, label, label_type, last_label,
                      last_label_type, mask, emb_dim, num_user_state):
    B, S = inputs.shape
    H = params["w_hh_l0"].shape[1]
    x = params["graph_emb"][(inputs * mask).astype(jnp.int32)].astype(jnp.float32)
    x_tm = jnp.transpose(x, (1, 0, 2))
    h1 = _ref_lstm_layer(x_tm, params["w_ih_l0"].T, params["w_hh_l0"].T,
                         (params["b_ih_l0"] + params["b_hh_l0"])[None, :], H)
    h2 = _ref_lstm_layer(h1, params["w_ih_l1"].T, params["w_hh_l1"].T,
                         (params["b_ih_l1"] + params["b_hh_l1"])[None, :], H)
    out = jnp.transpose(h2, (1, 0, 2))
    h_last = h2[-1]

    se = params["video_emb"][label]                      # (B, S, L, E)
    sle = params["video_emb"][last_label]                # (B, LL, E)

    proj = jnp.tanh(out @ params["linear_w"].T + params["linear_b"])
    proj = proj.reshape(B, S, 5, emb_dim)
    scores = jnp.einsum("bsfe,bsle->bsfl", proj, se).max(axis=2)
    lsm = jax.nn.log_softmax(scores, axis=-1)
    mask_f = mask.astype(jnp.float32)[:, :, None]
    lt = label_type.astype(jnp.float32)
    logits = (mask_f * lt * lsm).sum(-1) / (lt.sum(-1) + 1e-10)
    logits = logits.mean(1)

    proj2 = jnp.tanh(h_last @ params["linear2_w"].T + params["linear2_b"])
    proj2 = proj2.reshape(B, num_user_state, emb_dim)
    scores2 = jnp.einsum("bue,ble->bul", proj2, sle).max(axis=1)
    lsm2 = jax.nn.log_softmax(scores2, axis=-1)
    llt = last_label_type.astype(jnp.float32)
    last_logits = (llt * lsm2).sum(-1) / (llt.sum(-1) + 1e-10)
    return logits, last_logits


# ----------------------------------------------------------------------------
if __name__ == "__main__":
    B, S = 2, 8
    EMB, HID = 16, 32
    LBL, LAST_LBL = 8, 8
    NUM_USER_STATE = 8
    NUM_VIDEOS, NUM_GRAPH = 64, 64

    key = jax.random.PRNGKey(0)
    ks = jax.random.split(key, 20)

    params = {
        "graph_emb": 0.1 * jax.random.normal(ks[0], (NUM_GRAPH, EMB), jnp.float32),
        "video_emb": 0.1 * jax.random.normal(ks[1], (NUM_VIDEOS, EMB), jnp.float32),
        "w_ih_l0": 0.1 * jax.random.normal(ks[2], (4 * HID, EMB), jnp.float32),
        "w_hh_l0": 0.1 * jax.random.normal(ks[3], (4 * HID, HID), jnp.float32),
        "b_ih_l0": 0.1 * jax.random.normal(ks[4], (4 * HID,), jnp.float32),
        "b_hh_l0": 0.1 * jax.random.normal(ks[5], (4 * HID,), jnp.float32),
        "w_ih_l1": 0.1 * jax.random.normal(ks[6], (4 * HID, HID), jnp.float32),
        "w_hh_l1": 0.1 * jax.random.normal(ks[7], (4 * HID, HID), jnp.float32),
        "b_ih_l1": 0.1 * jax.random.normal(ks[8], (4 * HID,), jnp.float32),
        "b_hh_l1": 0.1 * jax.random.normal(ks[9], (4 * HID,), jnp.float32),
        "linear_w": 0.1 * jax.random.normal(ks[10], (EMB * 5, HID), jnp.float32),
        "linear_b": 0.1 * jax.random.normal(ks[11], (EMB * 5,), jnp.float32),
        "linear2_w": 0.1 * jax.random.normal(ks[12], (EMB * NUM_USER_STATE, HID),
                                             jnp.float32),
        "linear2_b": 0.1 * jax.random.normal(ks[13], (EMB * NUM_USER_STATE,),
                                             jnp.float32),
    }

    inputs = jax.random.randint(ks[14], (B, S), 0, NUM_GRAPH, jnp.int32)
    mask = jax.random.bernoulli(ks[15], 0.9, (B, S)).astype(jnp.int32)
    label = jax.random.randint(ks[16], (B, S, LBL), 0, NUM_VIDEOS, jnp.int32)
    label_type = jax.random.bernoulli(ks[17], 0.7, (B, S, LBL)).astype(jnp.float32)
    last_label = jax.random.randint(ks[18], (B, LAST_LBL), 0, NUM_VIDEOS, jnp.int32)
    last_label_type = jax.random.bernoulli(ks[19], 0.7,
                                           (B, LAST_LBL)).astype(jnp.float32)

    # raw (pre-scale) logits for validation
    raw_logits, raw_last = policy_net_regression_forward(
        params, inputs, label, label_type, last_label, last_label_type, mask,
        EMB, NUM_USER_STATE, return_raw=True)
    # module-semantics outputs
    out0, out1 = policy_net_regression_forward(
        params, inputs, label, label_type, last_label, last_label_type, mask,
        EMB, NUM_USER_STATE)
    jax.block_until_ready((raw_logits, raw_last, out0, out1))

    ref_logits, ref_last = reference_forward(
        params, inputs, label, label_type, last_label, last_label_type, mask,
        EMB, NUM_USER_STATE)

    assert jnp.allclose(raw_logits, ref_logits, atol=1e-2, rtol=1e-2)
    assert jnp.allclose(raw_last, ref_last, atol=1e-2, rtol=1e-2)
    assert jnp.allclose(out0, -ref_logits * 0.0, atol=1e-2, rtol=1e-2)
    assert jnp.allclose(out1, -ref_last * 0.5, atol=1e-2, rtol=1e-2)

    print("KERNEL_OK")
</pallas_src>

<mosaic_0001>
module attributes {stable_mosaic.version = 11 : i64} {
  func.func @_lstm_kernel(%arg0: i32, %arg1: i32, %arg2: memref<8x8x512xf32, #tpu.memory_space<vmem>>, %arg3: memref<128x512xf32, #tpu.memory_space<vmem>>, %arg4: memref<256x512xf32, #tpu.memory_space<vmem>>, %arg5: memref<1x512xf32, #tpu.memory_space<vmem>>, %arg6: memref<8x8x128xf32, #tpu.memory_space<vmem>>, %arg7: memref<8x256xf32, #tpu.memory_space<vmem>>, %arg8: memref<8x128xf32, #tpu.memory_space<vmem>>, %arg9: memref<8x128xf32, #tpu.memory_space<vmem>>) attributes {dimension_semantics = [#tpu.dimension_semantics<parallel>, #tpu.dimension_semantics<arbitrary>], iteration_bounds = array<i64: 1, 1>, scalar_prefetch = 0 : i64, scratch_operands = 3 : i64, tpu.core_type = #tpu.core_type<tc>, window_params = [{transform_indices = @transform_0, window_bounds = array<i64: 8, 8, 512>}, {pipeline_mode = #tpu.pipeline_mode<synchronous>, transform_indices = @transform_1, window_bounds = array<i64: 128, 512>}, {pipeline_mode = #tpu.pipeline_mode<synchronous>, transform_indices = @transform_2, window_bounds = array<i64: 256, 512>}, {pipeline_mode = #tpu.pipeline_mode<synchronous>, transform_indices = @transform_3, window_bounds = array<i64: 1, 512>}, {transform_indices = @transform_4, window_bounds = array<i64: 8, 8, 128>}]} {
    %c0_i32 = arith.constant 0 : i32
    %0 = arith.cmpi eq, %arg1, %c0_i32 : i32
    %1 = arith.extui %0 : i1 to i32
    %c0_i32_0 = arith.constant 0 : i32
    %2 = arith.cmpi ne, %1, %c0_i32_0 : i32
    scf.if %2 {
      %cst_229 = arith.constant 0.000000e+00 : f32
      %560 = vector.broadcast %cst_229 : f32 to vector<8x256xf32>
      %c0_230 = arith.constant 0 : index
      %c0_231 = arith.constant 0 : index
      %561 = vector.load %arg7[%c0_230, %c0_231] : memref<8x256xf32, #tpu.memory_space<vmem>>, vector<8x256xf32>
      tpu.vector_store %arg7[%c0_230, %c0_231], %560 {strides = array<i32>} : memref<8x256xf32, #tpu.memory_space<vmem>>, vector<8x256xf32>,
      %cst_232 = arith.constant 0.000000e+00 : f32
      %562 = vector.broadcast %cst_232 : f32 to vector<8x128xf32>
      %c0_233 = arith.constant 0 : index
      %c0_234 = arith.constant 0 : index
      %563 = vector.load %arg8[%c0_233, %c0_234] : memref<8x128xf32, #tpu.memory_space<vmem>>, vector<8x128xf32>
      tpu.vector_store %arg8[%c0_233, %c0_234], %562 {strides = array<i32>} : memref<8x128xf32, #tpu.memory_space<vmem>>, vector<8x128xf32>,
      %cst_235 = arith.constant 0.000000e+00 : f32
      %564 = vector.broadcast %cst_235 : f32 to vector<8x128xf32>
      %c0_236 = arith.constant 0 : index
      %c0_237 = arith.constant 0 : index
      %565 = vector.load %arg9[%c0_236, %c0_237] : memref<8x128xf32, #tpu.memory_space<vmem>>, vector<8x128xf32>
      tpu.vector_store %arg9[%c0_236, %c0_237], %564 {strides = array<i32>} : memref<8x128xf32, #tpu.memory_space<vmem>>, vector<8x128xf32>,
    } else {
    }
    %c0 = arith.constant 0 : index
    %c0_1 = arith.constant 0 : index
    %3 = vector.load %arg3[%c0, %c0_1] : memref<128x512xf32, #tpu.memory_space<vmem>>, vector<128x512xf32>
    %c0_2 = arith.constant 0 : index
    %c0_3 = arith.constant 0 : index
    %4 = vector.load %arg4[%c0_2, %c0_3] : memref<256x512xf32, #tpu.memory_space<vmem>>, vector<256x512xf32>
    %c0_4 = arith.constant 0 : index
    %c0_5 = arith.constant 0 : index
    %5 = vector.load %arg5[%c0_4, %c0_5] : memref<1x512xf32, #tpu.memory_space<vmem>>, vector<1x512xf32>
    %6 = vector.shape_cast %5 : vector<1x512xf32> to vector<1x512xf32>
    %7 = vector.broadcast %6 : vector<1x512xf32> to vector<8x512xf32>
    %c0_i32_6 = arith.constant 0 : i32
    %8 = arith.index_cast %c0_i32_6 : i32 to index
    %c0_7 = arith.constant 0 : index
    %c0_8 = arith.constant 0 : index
    %9 = vector.load %arg2[%8, %c0_7, %c0_8] : memref<8x8x512xf32, #tpu.memory_space<vmem>>, vector<1x8x512xf32>
    %10 = vector.shape_cast %9 : vector<1x8x512xf32> to vector<8x512xf32>
    %c0_9 = arith.constant 0 : index
    %c0_10 = arith.constant 0 : index
    %11 = vector.load %arg7[%c0_9, %c0_10] : memref<8x256xf32, #tpu.memory_space<vmem>>, vector<8x128xf32>
    %cst = arith.constant dense<0.000000e+00> : vector<8x512xf32>
    %12 = tpu.matmul %11, %3, %cst {dimension_numbers = #tpu.dot_dimension_numbers<[1], [0], [0], [1], [0, 0, 1, 1], [], []>} : vector<8x128xf32>, vector<128x512xf32>, vector<8x512xf32> -> vector<8x512xf32>
    %13 = arith.addf %10, %12 : vector<8x512xf32>
    %14 = vector.extract_strided_slice %13 {offsets = [0, 0], sizes = [8, 128], strides = [1, 1]} : vector<8x512xf32> to vector<8x128xf32>
    %15 = arith.negf %14 : vector<8x128xf32>
    %16 = math.exp %15 : vector<8x128xf32>
    %cst_11 = arith.constant 1.000000e+00 : f32
    %17 = vector.broadcast %cst_11 : f32 to vector<8x128xf32>
    %18 = arith.addf %17, %16 : vector<8x128xf32>
    %19 = arith.divf %17, %18 : vector<8x128xf32>
    %20 = vector.extract_strided_slice %13 {offsets = [0, 128], sizes = [8, 128], strides = [1, 1]} : vector<8x512xf32> to vector<8x128xf32>
    %21 = arith.negf %20 : vector<8x128xf32>
    %22 = math.exp %21 : vector<8x128xf32>
    %cst_12 = arith.constant 1.000000e+00 : f32
    %23 = vector.broadcast %cst_12 : f32 to vector<8x128xf32>
    %24 = arith.addf %23, %22 : vector<8x128xf32>
    %25 = arith.divf %23, %24 : vector<8x128xf32>
    %26 = vector.extract_strided_slice %13 {offsets = [0, 256], sizes = [8, 128], strides = [1, 1]} : vector<8x512xf32> to vector<8x128xf32>
    %27 = math.tanh %26 : vector<8x128xf32>
    %28 = vector.extract_strided_slice %13 {offsets = [0, 384], sizes = [8, 128], strides = [1, 1]} : vector<8x512xf32> to vector<8x128xf32>
    %29 = arith.negf %28 : vector<8x128xf32>
    %30 = math.exp %29 : vector<8x128xf32>
    %cst_13 = arith.constant 1.000000e+00 : f32
    %31 = vector.broadcast %cst_13 : f32 to vector<8x128xf32>
    %32 = arith.addf %31, %30 : vector<8x128xf32>
    %33 = arith.divf %31, %32 : vector<8x128xf32>
    %c0_14 = arith.constant 0 : index
    %c0_15 = arith.constant 0 : index
    %34 = vector.load %arg8[%c0_14, %c0_15] : memref<8x128xf32, #tpu.memory_space<vmem>>, vector<8x128xf32>
    %35 = arith.mulf %25, %34 : vector<8x128xf32>
    %36 = arith.mulf %19, %27 : vector<8x128xf32>
    %37 = arith.addf %35, %36 : vector<8x128xf32>
    %38 = math.tanh %37 : vector<8x128xf32>
    %39 = arith.mulf %33, %38 : vector<8x128xf32>
    %c0_16 = arith.constant 0 : index
    %c0_17 = arith.constant 0 : index
    %40 = vector.load %arg8[%c0_16, %c0_17] : memref<8x128xf32, #tpu.memory_space<vmem>>, vector<8x128xf32>
    tpu.vector_store %arg8[%c0_16, %c0_17], %37 {strides = array<i32>} : memref<8x128xf32, #tpu.memory_space<vmem>>, vector<8x128xf32>,
    %c0_18 = arith.constant 0 : index
    %c0_19 = arith.constant 0 : index
    %41 = vector.load %arg7[%c0_18, %c0_19] : memref<8x256xf32, #tpu.memory_space<vmem>>, vector<8x128xf32>
    tpu.vector_store %arg7[%c0_18, %c0_19], %39 {strides = array<i32>} : memref<8x256xf32, #tpu.memory_space<vmem>>, vector<8x128xf32>,
    %c0_20 = arith.constant 0 : index
    %c0_21 = arith.constant 0 : index
    %42 = vector.load %arg7[%c0_20, %c0_21] : memref<8x256xf32, #tpu.memory_space<vmem>>, vector<8x256xf32>
    %cst_22 = arith.constant dense<0.000000e+00> : vector<8x512xf32>
    %43 = tpu.matmul %42, %4, %cst_22 {dimension_numbers = #tpu.dot_dimension_numbers<[1], [0], [0], [1], [0, 0, 1, 1], [], []>} : vector<8x256xf32>, vector<256x512xf32>, vector<8x512xf32> -> vector<8x512xf32>
    %44 = arith.addf %43, %7 : vector<8x512xf32>
    %45 = vector.extract_strided_slice %44 {offsets = [0, 0], sizes = [8, 128], strides = [1, 1]} : vector<8x512xf32> to vector<8x128xf32>
    %46 = arith.negf %45 : vector<8x128xf32>
    %47 = math.exp %46 : vector<8x128xf32>
    %cst_23 = arith.constant 1.000000e+00 : f32
    %48 = vector.broadcast %cst_23 : f32 to vector<8x128xf32>
    %49 = arith.addf %48, %47 : vector<8x128xf32>
    %50 = arith.divf %48, %49 : vector<8x128xf32>
    %51 = vector.extract_strided_slice %44 {offsets = [0, 128], sizes = [8, 128], strides = [1, 1]} : vector<8x512xf32> to vector<8x128xf32>
    %52 = arith.negf %51 : vector<8x128xf32>
    %53 = math.exp %52 : vector<8x128xf32>
    %cst_24 = arith.constant 1.000000e+00 : f32
    %54 = vector.broadcast %cst_24 : f32 to vector<8x128xf32>
    %55 = arith.addf %54, %53 : vector<8x128xf32>
    %56 = arith.divf %54, %55 : vector<8x128xf32>
    %57 = vector.extract_strided_slice %44 {offsets = [0, 256], sizes = [8, 128], strides = [1, 1]} : vector<8x512xf32> to vector<8x128xf32>
    %58 = math.tanh %57 : vector<8x128xf32>
    %59 = vector.extract_strided_slice %44 {offsets = [0, 384], sizes = [8, 128], strides = [1, 1]} : vector<8x512xf32> to vector<8x128xf32>
    %60 = arith.negf %59 : vector<8x128xf32>
    %61 = math.exp %60 : vector<8x128xf32>
    %cst_25 = arith.constant 1.000000e+00 : f32
    %62 = vector.broadcast %cst_25 : f32 to vector<8x128xf32>
    %63 = arith.addf %62, %61 : vector<8x128xf32>
    %64 = arith.divf %62, %63 : vector<8x128xf32>
    %c0_26 = arith.constant 0 : index
    %c0_27 = arith.constant 0 : index
    %65 = vector.load %arg9[%c0_26, %c0_27] : memref<8x128xf32, #tpu.memory_space<vmem>>, vector<8x128xf32>
    %66 = arith.mulf %56, %65 : vector<8x128xf32>
    %67 = arith.mulf %50, %58 : vector<8x128xf32>
    %68 = arith.addf %66, %67 : vector<8x128xf32>
    %69 = math.tanh %68 : vector<8x128xf32>
    %70 = arith.mulf %64, %69 : vector<8x128xf32>
    %c0_28 = arith.constant 0 : index
    %c0_29 = arith.constant 0 : index
    %71 = vector.load %arg9[%c0_28, %c0_29] : memref<8x128xf32, #tpu.memory_space<vmem>>, vector<8x128xf32>
    tpu.vector_store %arg9[%c0_28, %c0_29], %68 {strides = array<i32>} : memref<8x128xf32, #tpu.memory_space<vmem>>, vector<8x128xf32>,
    %c0_30 = arith.constant 0 : index
    %c128 = arith.constant 128 : index
    %72 = vector.load %arg7[%c0_30, %c128] : memref<8x256xf32, #tpu.memory_space<vmem>>, vector<8x128xf32>
    tpu.vector_store %arg7[%c0_30, %c128], %70 {strides = array<i32>} : memref<8x256xf32, #tpu.memory_space<vmem>>, vector<8x128xf32>,
    %73 = arith.index_cast %c0_i32_6 : i32 to index
    %c0_31 = arith.constant 0 : index
    %c0_32 = arith.constant 0 : index
    %74 = vector.load %arg6[%73, %c0_31, %c0_32] : memref<8x8x128xf32, #tpu.memory_space<vmem>>, vector<1x8x128xf32>
    %75 = vector.shape_cast %74 : vector<1x8x128xf32> to vector<8x128xf32>
    %76 = vector.shape_cast %70 : vector<8x128xf32> to vector<1x8x128xf32>
    tpu.vector_store %arg6[%73, %c0_31, %c0_32], %76 {strides = array<i32>} : memref<8x8x128xf32, #tpu.memory_space<vmem>>, vector<1x8x128xf32>,
    %c1_i32 = arith.constant 1 : i32
    %77 = arith.index_cast %c1_i32 : i32 to index
    %c0_33 = arith.constant 0 : index
    %c0_34 = arith.constant 0 : index
    %78 = vector.load %arg2[%77, %c0_33, %c0_34] : memref<8x8x512xf32, #tpu.memory_space<vmem>>, vector<1x8x512xf32>
    %79 = vector.shape_cast %78 : vector<1x8x512xf32> to vector<8x512xf32>
    %c0_35 = arith.constant 0 : index
    %c0_36 = arith.constant 0 : index
    %80 = vector.load %arg7[%c0_35, %c0_36] : memref<8x256xf32, #tpu.memory_space<vmem>>, vector<8x128xf32>
    %cst_37 = arith.constant dense<0.000000e+00> : vector<8x512xf32>
    %81 = tpu.matmul %80, %3, %cst_37 {dimension_numbers = #tpu.dot_dimension_numbers<[1], [0], [0], [1], [0, 0, 1, 1], [], []>} : vector<8x128xf32>, vector<128x512xf32>, vector<8x512xf32> -> vector<8x512xf32>
    %82 = arith.addf %79, %81 : vector<8x512xf32>
    %83 = vector.extract_strided_slice %82 {offsets = [0, 0], sizes = [8, 128], strides = [1, 1]} : vector<8x512xf32> to vector<8x128xf32>
    %84 = arith.negf %83 : vector<8x128xf32>
    %85 = math.exp %84 : vector<8x128xf32>
    %cst_38 = arith.constant 1.000000e+00 : f32
    %86 = vector.broadcast %cst_38 : f32 to vector<8x128xf32>
    %87 = arith.addf %86, %85 : vector<8x128xf32>
    %88 = arith.divf %86, %87 : vector<8x128xf32>
    %89 = vector.extract_strided_slice %82 {offsets = [0, 128], sizes = [8, 128], strides = [1, 1]} : vector<8x512xf32> to vector<8x128xf32>
    %90 = arith.negf %89 : vector<8x128xf32>
    %91 = math.exp %90 : vector<8x128xf32>
    %cst_39 = arith.constant 1.000000e+00 : f32
    %92 = vector.broadcast %cst_39 : f32 to vector<8x128xf32>
    %93 = arith.addf %92, %91 : vector<8x128xf32>
    %94 = arith.divf %92, %93 : vector<8x128xf32>
    %95 = vector.extract_strided_slice %82 {offsets = [0, 256], sizes = [8, 128], strides = [1, 1]} : vector<8x512xf32> to vector<8x128xf32>
    %96 = math.tanh %95 : vector<8x128xf32>
    %97 = vector.extract_strided_slice %82 {offsets = [0, 384], sizes = [8, 128], strides = [1, 1]} : vector<8x512xf32> to vector<8x128xf32>
    %98 = arith.negf %97 : vector<8x128xf32>
    %99 = math.exp %98 : vector<8x128xf32>
    %cst_40 = arith.constant 1.000000e+00 : f32
    %100 = vector.broadcast %cst_40 : f32 to vector<8x128xf32>
    %101 = arith.addf %100, %99 : vector<8x128xf32>
    %102 = arith.divf %100, %101 : vector<8x128xf32>
    %c0_41 = arith.constant 0 : index
    %c0_42 = arith.constant 0 : index
    %103 = vector.load %arg8[%c0_41, %c0_42] : memref<8x128xf32, #tpu.memory_space<vmem>>, vector<8x128xf32>
    %104 = arith.mulf %94, %103 : vector<8x128xf32>
    %105 = arith.mulf %88, %96 : vector<8x128xf32>
    %106 = arith.addf %104, %105 : vector<8x128xf32>
    %107 = math.tanh %106 : vector<8x128xf32>
    %108 = arith.mulf %102, %107 : vector<8x128xf32>
    %c0_43 = arith.constant 0 : index
    %c0_44 = arith.constant 0 : index
    %109 = vector.load %arg8[%c0_43, %c0_44] : memref<8x128xf32, #tpu.memory_space<vmem>>, vector<8x128xf32>
    tpu.vector_store %arg8[%c0_43, %c0_44], %106 {strides = array<i32>} : memref<8x128xf32, #tpu.memory_space<vmem>>, vector<8x128xf32>,
    %c0_45 = arith.constant 0 : index
    %c0_46 = arith.constant 0 : index
    %110 = vector.load %arg7[%c0_45, %c0_46] : memref<8x256xf32, #tpu.memory_space<vmem>>, vector<8x128xf32>
    tpu.vector_store %arg7[%c0_45, %c0_46], %108 {strides = array<i32>} : memref<8x256xf32, #tpu.memory_space<vmem>>, vector<8x128xf32>,
    %c0_47 = arith.constant 0 : index
    %c0_48 = arith.constant 0 : index
    %111 = vector.load %arg7[%c0_47, %c0_48] : memref<8x256xf32, #tpu.memory_space<vmem>>, vector<8x256xf32>
    %cst_49 = arith.constant dense<0.000000e+00> : vector<8x512xf32>
    %112 = tpu.matmul %111, %4, %cst_49 {dimension_numbers = #tpu.dot_dimension_numbers<[1], [0], [0], [1], [0, 0, 1, 1], [], []>} : vector<8x256xf32>, vector<256x512xf32>, vector<8x512xf32> -> vector<8x512xf32>
    %113 = arith.addf %112, %7 : vector<8x512xf32>
    %114 = vector.extract_strided_slice %113 {offsets = [0, 0], sizes = [8, 128], strides = [1, 1]} : vector<8x512xf32> to vector<8x128xf32>
    %115 = arith.negf %114 : vector<8x128xf32>
    %116 = math.exp %115 : vector<8x128xf32>
    %cst_50 = arith.constant 1.000000e+00 : f32
    %117 = vector.broadcast %cst_50 : f32 to vector<8x128xf32>
    %118 = arith.addf %117, %116 : vector<8x128xf32>
    %119 = arith.divf %117, %118 : vector<8x128xf32>
    %120 = vector.extract_strided_slice %113 {offsets = [0, 128], sizes = [8, 128], strides = [1, 1]} : vector<8x512xf32> to vector<8x128xf32>
    %121 = arith.negf %120 : vector<8x128xf32>
    %122 = math.exp %121 : vector<8x128xf32>
    %cst_51 = arith.constant 1.000000e+00 : f32
    %123 = vector.broadcast %cst_51 : f32 to vector<8x128xf32>
    %124 = arith.addf %123, %122 : vector<8x128xf32>
    %125 = arith.divf %123, %124 : vector<8x128xf32>
    %126 = vector.extract_strided_slice %113 {offsets = [0, 256], sizes = [8, 128], strides = [1, 1]} : vector<8x512xf32> to vector<8x128xf32>
    %127 = math.tanh %126 : vector<8x128xf32>
    %128 = vector.extract_strided_slice %113 {offsets = [0, 384], sizes = [8, 128], strides = [1, 1]} : vector<8x512xf32> to vector<8x128xf32>
    %129 = arith.negf %128 : vector<8x128xf32>
    %130 = math.exp %129 : vector<8x128xf32>
    %cst_52 = arith.constant 1.000000e+00 : f32
    %131 = vector.broadcast %cst_52 : f32 to vector<8x128xf32>
    %132 = arith.addf %131, %130 : vector<8x128xf32>
    %133 = arith.divf %131, %132 : vector<8x128xf32>
    %c0_53 = arith.constant 0 : index
    %c0_54 = arith.constant 0 : index
    %134 = vector.load %arg9[%c0_53, %c0_54] : memref<8x128xf32, #tpu.memory_space<vmem>>, vector<8x128xf32>
    %135 = arith.mulf %125, %134 : vector<8x128xf32>
    %136 = arith.mulf %119, %127 : vector<8x128xf32>
    %137 = arith.addf %135, %136 : vector<8x128xf32>
    %138 = math.tanh %137 : vector<8x128xf32>
    %139 = arith.mulf %133, %138 : vector<8x128xf32>
    %c0_55 = arith.constant 0 : index
    %c0_56 = arith.constant 0 : index
    %140 = vector.load %arg9[%c0_55, %c0_56] : memref<8x128xf32, #tpu.memory_space<vmem>>, vector<8x128xf32>
    tpu.vector_store %arg9[%c0_55, %c0_56], %137 {strides = array<i32>} : memref<8x128xf32, #tpu.memory_space<vmem>>, vector<8x128xf32>,
    %c0_57 = arith.constant 0 : index
    %c128_58 = arith.constant 128 : index
    %141 = vector.load %arg7[%c0_57, %c128_58] : memref<8x256xf32, #tpu.memory_space<vmem>>, vector<8x128xf32>
    tpu.vector_store %arg7[%c0_57, %c128_58], %139 {strides = array<i32>} : memref<8x256xf32, #tpu.memory_space<vmem>>, vector<8x128xf32>,
    %142 = arith.index_cast %c1_i32 : i32 to index
    %c0_59 = arith.constant 0 : index
    %c0_60 = arith.constant 0 : index
    %143 = vector.load %arg6[%142, %c0_59, %c0_60] : memref<8x8x128xf32, #tpu.memory_space<vmem>>, vector<1x8x128xf32>
    %144 = vector.shape_cast %143 : vector<1x8x128xf32> to vector<8x128xf32>
    %145 = vector.shape_cast %139 : vector<8x128xf32> to vector<1x8x128xf32>
    tpu.vector_store %arg6[%142, %c0_59, %c0_60], %145 {strides = array<i32>} : memref<8x8x128xf32, #tpu.memory_space<vmem>>, vector<1x8x128xf32>,
    %c2_i32 = arith.constant 2 : i32
    %146 = arith.index_cast %c2_i32 : i32 to index
    %c0_61 = arith.constant 0 : index
    %c0_62 = arith.constant 0 : index
    %147 = vector.load %arg2[%146, %c0_61, %c0_62] : memref<8x8x512xf32, #tpu.memory_space<vmem>>, vector<1x8x512xf32>
    %148 = vector.shape_cast %147 : vector<1x8x512xf32> to vector<8x512xf32>
    %c0_63 = arith.constant 0 : index
    %c0_64 = arith.constant 0 : index
    %149 = vector.load %arg7[%c0_63, %c0_64] : memref<8x256xf32, #tpu.memory_space<vmem>>, vector<8x128xf32>
    %cst_65 = arith.constant dense<0.000000e+00> : vector<8x512xf32>
    %150 = tpu.matmul %149, %3, %cst_65 {dimension_numbers = #tpu.dot_dimension_numbers<[1], [0], [0], [1], [0, 0, 1, 1], [], []>} : vector<8x128xf32>, vector<128x512xf32>, vector<8x512xf32> -> vector<8x512xf32>
    %151 = arith.addf %148, %150 : vector<8x512xf32>
    %152 = vector.extract_strided_slice %151 {offsets = [0, 0], sizes = [8, 128], strides = [1, 1]} : vector<8x512xf32> to vector<8x128xf32>
    %153 = arith.negf %152 : vector<8x128xf32>
    %154 = math.exp %153 : vector<8x128xf32>
    %cst_66 = arith.constant 1.000000e+00 : f32
    %155 = vector.broadcast %cst_66 : f32 to vector<8x128xf32>
    %156 = arith.addf %155, %154 : vector<8x128xf32>
    %157 = arith.divf %155, %156 : vector<8x128xf32>
    %158 = vector.extract_strided_slice %151 {offsets = [0, 128], sizes = [8, 128], strides = [1, 1]} : vector<8x512xf32> to vector<8x128xf32>
    %159 = arith.negf %158 : vector<8x128xf32>
    %160 = math.exp %159 : vector<8x128xf32>
    %cst_67 = arith.constant 1.000000e+00 : f32
    %161 = vector.broadcast %cst_67 : f32 to vector<8x128xf32>
    %162 = arith.addf %161, %160 : vector<8x128xf32>
    %163 = arith.divf %161, %162 : vector<8x128xf32>
    %164 = vector.extract_strided_slice %151 {offsets = [0, 256], sizes = [8, 128], strides = [1, 1]} : vector<8x512xf32> to vector<8x128xf32>
    %165 = math.tanh %164 : vector<8x128xf32>
    %166 = vector.extract_strided_slice %151 {offsets = [0, 384], sizes = [8, 128], strides = [1, 1]} : vector<8x512xf32> to vector<8x128xf32>
    %167 = arith.negf %166 : vector<8x128xf32>
    %168 = math.exp %167 : vector<8x128xf32>
    %cst_68 = arith.constant 1.000000e+00 : f32
    %169 = vector.broadcast %cst_68 : f32 to vector<8x128xf32>
    %170 = arith.addf %169, %168 : vector<8x128xf32>
    %171 = arith.divf %169, %170 : vector<8x128xf32>
    %c0_69 = arith.constant 0 : index
    %c0_70 = arith.constant 0 : index
    %172 = vector.load %arg8[%c0_69, %c0_70] : memref<8x128xf32, #tpu.memory_space<vmem>>, vector<8x128xf32>
    %173 = arith.mulf %163, %172 : vector<8x128xf32>
    %174 = arith.mulf %157, %165 : vector<8x128xf32>
    %175 = arith.addf %173, %174 : vector<8x128xf32>
    %176 = math.tanh %175 : vector<8x128xf32>
    %177 = arith.mulf %171, %176 : vector<8x128xf32>
    %c0_71 = arith.constant 0 : index
    %c0_72 = arith.constant 0 : index
    %178 = vector.load %arg8[%c0_71, %c0_72] : memref<8x128xf32, #tpu.memory_space<vmem>>, vector<8x128xf32>
    tpu.vector_store %arg8[%c0_71, %c0_72], %175 {strides = array<i32>} : memref<8x128xf32, #tpu.memory_space<vmem>>, vector<8x128xf32>,
    %c0_73 = arith.constant 0 : index
    %c0_74 = arith.constant 0 : index
    %179 = vector.load %arg7[%c0_73, %c0_74] : memref<8x256xf32, #tpu.memory_space<vmem>>, vector<8x128xf32>
    tpu.vector_store %arg7[%c0_73, %c0_74], %177 {strides = array<i32>} : memref<8x256xf32, #tpu.memory_space<vmem>>, vector<8x128xf32>,
    %c0_75 = arith.constant 0 : index
    %c0_76 = arith.constant 0 : index
    %180 = vector.load %arg7[%c0_75, %c0_76] : memref<8x256xf32, #tpu.memory_space<vmem>>, vector<8x256xf32>
    %cst_77 = arith.constant dense<0.000000e+00> : vector<8x512xf32>
    %181 = tpu.matmul %180, %4, %cst_77 {dimension_numbers = #tpu.dot_dimension_numbers<[1], [0], [0], [1], [0, 0, 1, 1], [], []>} : vector<8x256xf32>, vector<256x512xf32>, vector<8x512xf32> -> vector<8x512xf32>
    %182 = arith.addf %181, %7 : vector<8x512xf32>
    %183 = vector.extract_strided_slice %182 {offsets = [0, 0], sizes = [8, 128], strides = [1, 1]} : vector<8x512xf32> to vector<8x128xf32>
    %184 = arith.negf %183 : vector<8x128xf32>
    %185 = math.exp %184 : vector<8x128xf32>
    %cst_78 = arith.constant 1.000000e+00 : f32
    %186 = vector.broadcast %cst_78 : f32 to vector<8x128xf32>
    %187 = arith.addf %186, %185 : vector<8x128xf32>
    %188 = arith.divf %186, %187 : vector<8x128xf32>
    %189 = vector.extract_strided_slice %182 {offsets = [0, 128], sizes = [8, 128], strides = [1, 1]} : vector<8x512xf32> to vector<8x128xf32>
    %190 = arith.negf %189 : vector<8x128xf32>
    %191 = math.exp %190 : vector<8x128xf32>
    %cst_79 = arith.constant 1.000000e+00 : f32
    %192 = vector.broadcast %cst_79 : f32 to vector<8x128xf32>
    %193 = arith.addf %192, %191 : vector<8x128xf32>
    %194 = arith.divf %192, %193 : vector<8x128xf32>
    %195 = vector.extract_strided_slice %182 {offsets = [0, 256], sizes = [8, 128], strides = [1, 1]} : vector<8x512xf32> to vector<8x128xf32>
    %196 = math.tanh %195 : vector<8x128xf32>
    %197 = vector.extract_strided_slice %182 {offsets = [0, 384], sizes = [8, 128], strides = [1, 1]} : vector<8x512xf32> to vector<8x128xf32>
    %198 = arith.negf %197 : vector<8x128xf32>
    %199 = math.exp %198 : vector<8x128xf32>
    %cst_80 = arith.constant 1.000000e+00 : f32
    %200 = vector.broadcast %cst_80 : f32 to vector<8x128xf32>
    %201 = arith.addf %200, %199 : vector<8x128xf32>
    %202 = arith.divf %200, %201 : vector<8x128xf32>
    %c0_81 = arith.constant 0 : index
    %c0_82 = arith.constant 0 : index
    %203 = vector.load %arg9[%c0_81, %c0_82] : memref<8x128xf32, #tpu.memory_space<vmem>>, vector<8x128xf32>
    %204 = arith.mulf %194, %203 : vector<8x128xf32>
    %205 = arith.mulf %188, %196 : vector<8x128xf32>
    %206 = arith.addf %204, %205 : vector<8x128xf32>
    %207 = math.tanh %206 : vector<8x128xf32>
    %208 = arith.mulf %202, %207 : vector<8x128xf32>
    %c0_83 = arith.constant 0 : index
    %c0_84 = arith.constant 0 : index
    %209 = vector.load %arg9[%c0_83, %c0_84] : memref<8x128xf32, #tpu.memory_space<vmem>>, vector<8x128xf32>
    tpu.vector_store %arg9[%c0_83, %c0_84], %206 {strides = array<i32>} : memref<8x128xf32, #tpu.memory_space<vmem>>, vector<8x128xf32>,
    %c0_85 = arith.constant 0 : index
    %c128_86 = arith.constant 128 : index
    %210 = vector.load %arg7[%c0_85, %c128_86] : memref<8x256xf32, #tpu.memory_space<vmem>>, vector<8x128xf32>
    tpu.vector_store %arg7[%c0_85, %c128_86], %208 {strides = array<i32>} : memref<8x256xf32, #tpu.memory_space<vmem>>, vector<8x128xf32>,
    %211 = arith.index_cast %c2_i32 : i32 to index
    %c0_87 = arith.constant 0 : index
    %c0_88 = arith.constant 0 : index
    %212 = vector.load %arg6[%211, %c0_87, %c0_88] : memref<8x8x128xf32, #tpu.memory_space<vmem>>, vector<1x8x128xf32>
    %213 = vector.shape_cast %212 : vector<1x8x128xf32> to vector<8x128xf32>
    %214 = vector.shape_cast %208 : vector<8x128xf32> to vector<1x8x128xf32>
    tpu.vector_store %arg6[%211, %c0_87, %c0_88], %214 {strides = array<i32>} : memref<8x8x128xf32, #tpu.memory_space<vmem>>, vector<1x8x128xf32>,
    %c3_i32 = arith.constant 3 : i32
    %215 = arith.index_cast %c3_i32 : i32 to index
    %c0_89 = arith.constant 0 : index
    %c0_90 = arith.constant 0 : index
    %216 = vector.load %arg2[%215, %c0_89, %c0_90] : memref<8x8x512xf32, #tpu.memory_space<vmem>>, vector<1x8x512xf32>
    %217 = vector.shape_cast %216 : vector<1x8x512xf32> to vector<8x512xf32>
    %c0_91 = arith.constant 0 : index
    %c0_92 = arith.constant 0 : index
    %218 = vector.load %arg7[%c0_91, %c0_92] : memref<8x256xf32, #tpu.memory_space<vmem>>, vector<8x128xf32>
    %cst_93 = arith.constant dense<0.000000e+00> : vector<8x512xf32>
    %219 = tpu.matmul %218, %3, %cst_93 {dimension_numbers = #tpu.dot_dimension_numbers<[1], [0], [0], [1], [0, 0, 1, 1], [], []>} : vector<8x128xf32>, vector<128x512xf32>, vector<8x512xf32> -> vector<8x512xf32>
    %220 = arith.addf %217, %219 : vector<8x512xf32>
    %221 = vector.extract_strided_slice %220 {offsets = [0, 0], sizes = [8, 128], strides = [1, 1]} : vector<8x512xf32> to vector<8x128xf32>
    %222 = arith.negf %221 : vector<8x128xf32>
    %223 = math.exp %222 : vector<8x128xf32>
    %cst_94 = arith.constant 1.000000e+00 : f32
    %224 = vector.broadcast %cst_94 : f32 to vector<8x128xf32>
    %225 = arith.addf %224, %223 : vector<8x128xf32>
    %226 = arith.divf %224, %225 : vector<8x128xf32>
    %227 = vector.extract_strided_slice %220 {offsets = [0, 128], sizes = [8, 128], strides = [1, 1]} : vector<8x512xf32> to vector<8x128xf32>
    %228 = arith.negf %227 : vector<8x128xf32>
    %229 = math.exp %228 : vector<8x128xf32>
    %cst_95 = arith.constant 1.000000e+00 : f32
    %230 = vector.broadcast %cst_95 : f32 to vector<8x128xf32>
    %231 = arith.addf %230, %229 : vector<8x128xf32>
    %232 = arith.divf %230, %231 : vector<8x128xf32>
    %233 = vector.extract_strided_slice %220 {offsets = [0, 256], sizes = [8, 128], strides = [1, 1]} : vector<8x512xf32> to vector<8x128xf32>
    %234 = math.tanh %233 : vector<8x128xf32>
    %235 = vector.extract_strided_slice %220 {offsets = [0, 384], sizes = [8, 128], strides = [1, 1]} : vector<8x512xf32> to vector<8x128xf32>
    %236 = arith.negf %235 : vector<8x128xf32>
    %237 = math.exp %236 : vector<8x128xf32>
    %cst_96 = arith.constant 1.000000e+00 : f32
    %238 = vector.broadcast %cst_96 : f32 to vector<8x128xf32>
    %239 = arith.addf %238, %237 : vector<8x128xf32>
    %240 = arith.divf %238, %239 : vector<8x128xf32>
    %c0_97 = arith.constant 0 : index
    %c0_98 = arith.constant 0 : index
    %241 = vector.load %arg8[%c0_97, %c0_98] : memref<8x128xf32, #tpu.memory_space<vmem>>, vector<8x128xf32>
    %242 = arith.mulf %232, %241 : vector<8x128xf32>
    %243 = arith.mulf %226, %234 : vector<8x128xf32>
    %244 = arith.addf %242, %243 : vector<8x128xf32>
    %245 = math.tanh %244 : vector<8x128xf32>
    %246 = arith.mulf %240, %245 : vector<8x128xf32>
    %c0_99 = arith.constant 0 : index
    %c0_100 = arith.constant 0 : index
    %247 = vector.load %arg8[%c0_99, %c0_100] : memref<8x128xf32, #tpu.memory_space<vmem>>, vector<8x128xf32>
    tpu.vector_store %arg8[%c0_99, %c0_100], %244 {strides = array<i32>} : memref<8x128xf32, #tpu.memory_space<vmem>>, vector<8x128xf32>,
    %c0_101 = arith.constant 0 : index
    %c0_102 = arith.constant 0 : index
    %248 = vector.load %arg7[%c0_101, %c0_102] : memref<8x256xf32, #tpu.memory_space<vmem>>, vector<8x128xf32>
    tpu.vector_store %arg7[%c0_101, %c0_102], %246 {strides = array<i32>} : memref<8x256xf32, #tpu.memory_space<vmem>>, vector<8x128xf32>,
    %c0_103 = arith.constant 0 : index
    %c0_104 = arith.constant 0 : index
    %249 = vector.load %arg7[%c0_103, %c0_104] : memref<8x256xf32, #tpu.memory_space<vmem>>, vector<8x256xf32>
    %cst_105 = arith.constant dense<0.000000e+00> : vector<8x512xf32>
    %250 = tpu.matmul %249, %4, %cst_105 {dimension_numbers = #tpu.dot_dimension_numbers<[1], [0], [0], [1], [0, 0, 1, 1], [], []>} : vector<8x256xf32>, vector<256x512xf32>, vector<8x512xf32> -> vector<8x512xf32>
    %251 = arith.addf %250, %7 : vector<8x512xf32>
    %252 = vector.extract_strided_slice %251 {offsets = [0, 0], sizes = [8, 128], strides = [1, 1]} : vector<8x512xf32> to vector<8x128xf32>
    %253 = arith.negf %252 : vector<8x128xf32>
    %254 = math.exp %253 : vector<8x128xf32>
    %cst_106 = arith.constant 1.000000e+00 : f32
    %255 = vector.broadcast %cst_106 : f32 to vector<8x128xf32>
    %256 = arith.addf %255, %254 : vector<8x128xf32>
    %257 = arith.divf %255, %256 : vector<8x128xf32>
    %258 = vector.extract_strided_slice %251 {offsets = [0, 128], sizes = [8, 128], strides = [1, 1]} : vector<8x512xf32> to vector<8x128xf32>
    %259 = arith.negf %258 : vector<8x128xf32>
    %260 = math.exp %259 : vector<8x128xf32>
    %cst_107 = arith.constant 1.000000e+00 : f32
    %261 = vector.broadcast %cst_107 : f32 to vector<8x128xf32>
    %262 = arith.addf %261, %260 : vector<8x128xf32>
    %263 = arith.divf %261, %262 : vector<8x128xf32>
    %264 = vector.extract_strided_slice %251 {offsets = [0, 256], sizes = [8, 128], strides = [1, 1]} : vector<8x512xf32> to vector<8x128xf32>
    %265 = math.tanh %264 : vector<8x128xf32>
    %266 = vector.extract_strided_slice %251 {offsets = [0, 384], sizes = [8, 128], strides = [1, 1]} : vector<8x512xf32> to vector<8x128xf32>
    %267 = arith.negf %266 : vector<8x128xf32>
    %268 = math.exp %267 : vector<8x128xf32>
    %cst_108 = arith.constant 1.000000e+00 : f32
    %269 = vector.broadcast %cst_108 : f32 to vector<8x128xf32>
    %270 = arith.addf %269, %268 : vector<8x128xf32>
    %271 = arith.divf %269, %270 : vector<8x128xf32>
    %c0_109 = arith.constant 0 : index
    %c0_110 = arith.constant 0 : index
    %272 = vector.load %arg9[%c0_109, %c0_110] : memref<8x128xf32, #tpu.memory_space<vmem>>, vector<8x128xf32>
    %273 = arith.mulf %263, %272 : vector<8x128xf32>
    %274 = arith.mulf %257, %265 : vector<8x128xf32>
    %275 = arith.addf %273, %274 : vector<8x128xf32>
    %276 = math.tanh %275 : vector<8x128xf32>
    %277 = arith.mulf %271, %276 : vector<8x128xf32>
    %c0_111 = arith.constant 0 : index
    %c0_112 = arith.constant 0 : index
    %278 = vector.load %arg9[%c0_111, %c0_112] : memref<8x128xf32, #tpu.memory_space<vmem>>, vector<8x128xf32>
    tpu.vector_store %arg9[%c0_111, %c0_112], %275 {strides = array<i32>} : memref<8x128xf32, #tpu.memory_space<vmem>>, vector<8x128xf32>,
    %c0_113 = arith.constant 0 : index
    %c128_114 = arith.constant 128 : index
    %279 = vector.load %arg7[%c0_113, %c128_114] : memref<8x256xf32, #tpu.memory_space<vmem>>, vector<8x128xf32>
    tpu.vector_store %arg7[%c0_113, %c128_114], %277 {strides = array<i32>} : memref<8x256xf32, #tpu.memory_space<vmem>>, vector<8x128xf32>,
    %280 = arith.index_cast %c3_i32 : i32 to index
    %c0_115 = arith.constant 0 : index
    %c0_116 = arith.constant 0 : index
    %281 = vector.load %arg6[%280, %c0_115, %c0_116] : memref<8x8x128xf32, #tpu.memory_space<vmem>>, vector<1x8x128xf32>
    %282 = vector.shape_cast %281 : vector<1x8x128xf32> to vector<8x128xf32>
    %283 = vector.shape_cast %277 : vector<8x128xf32> to vector<1x8x128xf32>
    tpu.vector_store %arg6[%280, %c0_115, %c0_116], %283 {strides = array<i32>} : memref<8x8x128xf32, #tpu.memory_space<vmem>>, vector<1x8x128xf32>,
    %c4_i32 = arith.constant 4 : i32
    %284 = arith.index_cast %c4_i32 : i32 to index
    %c0_117 = arith.constant 0 : index
    %c0_118 = arith.constant 0 : index
    %285 = vector.load %arg2[%284, %c0_117, %c0_118] : memref<8x8x512xf32, #tpu.memory_space<vmem>>, vector<1x8x512xf32>
    %286 = vector.shape_cast %285 : vector<1x8x512xf32> to vector<8x512xf32>
    %c0_119 = arith.constant 0 : index
    %c0_120 = arith.constant 0 : index
    %287 = vector.load %arg7[%c0_119, %c0_120] : memref<8x256xf32, #tpu.memory_space<vmem>>, vector<8x128xf32>
    %cst_121 = arith.constant dense<0.000000e+00> : vector<8x512xf32>
    %288 = tpu.matmul %287, %3, %cst_121 {dimension_numbers = #tpu.dot_dimension_numbers<[1], [0], [0], [1], [0, 0, 1, 1], [], []>} : vector<8x128xf32>, vector<128x512xf32>, vector<8x512xf32> -> vector<8x512xf32>
    %289 = arith.addf %286, %288 : vector<8x512xf32>
    %290 = vector.extract_strided_slice %289 {offsets = [0, 0], sizes = [8, 128], strides = [1, 1]} : vector<8x512xf32> to vector<8x128xf32>
    %291 = arith.negf %290 : vector<8x128xf32>
    %292 = math.exp %291 : vector<8x128xf32>
    %cst_122 = arith.constant 1.000000e+00 : f32
    %293 = vector.broadcast %cst_122 : f32 to vector<8x128xf32>
    %294 = arith.addf %293, %292 : vector<8x128xf32>
    %295 = arith.divf %293, %294 : vector<8x128xf32>
    %296 = vector.extract_strided_slice %289 {offsets = [0, 128], sizes = [8, 128], strides = [1, 1]} : vector<8x512xf32> to vector<8x128xf32>
    %297 = arith.negf %296 : vector<8x128xf32>
    %298 = math.exp %297 : vector<8x128xf32>
    %cst_123 = arith.constant 1.000000e+00 : f32
    %299 = vector.broadcast %cst_123 : f32 to vector<8x128xf32>
    %300 = arith.addf %299, %298 : vector<8x128xf32>
    %301 = arith.divf %299, %300 : vector<8x128xf32>
    %302 = vector.extract_strided_slice %289 {offsets = [0, 256], sizes = [8, 128], strides = [1, 1]} : vector<8x512xf32> to vector<8x128xf32>
    %303 = math.tanh %302 : vector<8x128xf32>
    %304 = vector.extract_strided_slice %289 {offsets = [0, 384], sizes = [8, 128], strides = [1, 1]} : vector<8x512xf32> to vector<8x128xf32>
    %305 = arith.negf %304 : vector<8x128xf32>
    %306 = math.exp %305 : vector<8x128xf32>
    %cst_124 = arith.constant 1.000000e+00 : f32
    %307 = vector.broadcast %cst_124 : f32 to vector<8x128xf32>
    %308 = arith.addf %307, %306 : vector<8x128xf32>
    %309 = arith.divf %307, %308 : vector<8x128xf32>
    %c0_125 = arith.constant 0 : index
    %c0_126 = arith.constant 0 : index
    %310 = vector.load %arg8[%c0_125, %c0_126] : memref<8x128xf32, #tpu.memory_space<vmem>>, vector<8x128xf32>
    %311 = arith.mulf %301, %310 : vector<8x128xf32>
    %312 = arith.mulf %295, %303 : vector<8x128xf32>
    %313 = arith.addf %311, %312 : vector<8x128xf32>
    %314 = math.tanh %313 : vector<8x128xf32>
    %315 = arith.mulf %309, %314 : vector<8x128xf32>
    %c0_127 = arith.constant 0 : index
    %c0_128 = arith.constant 0 : index
    %316 = vector.load %arg8[%c0_127, %c0_128] : memref<8x128xf32, #tpu.memory_space<vmem>>, vector<8x128xf32>
    tpu.vector_store %arg8[%c0_127, %c0_128], %313 {strides = array<i32>} : memref<8x128xf32, #tpu.memory_space<vmem>>, vector<8x128xf32>,
    %c0_129 = arith.constant 0 : index
    %c0_130 = arith.constant 0 : index
    %317 = vector.load %arg7[%c0_129, %c0_130] : memref<8x256xf32, #tpu.memory_space<vmem>>, vector<8x128xf32>
    tpu.vector_store %arg7[%c0_129, %c0_130], %315 {strides = array<i32>} : memref<8x256xf32, #tpu.memory_space<vmem>>, vector<8x128xf32>,
    %c0_131 = arith.constant 0 : index
    %c0_132 = arith.constant 0 : index
    %318 = vector.load %arg7[%c0_131, %c0_132] : memref<8x256xf32, #tpu.memory_space<vmem>>, vector<8x256xf32>
    %cst_133 = arith.constant dense<0.000000e+00> : vector<8x512xf32>
    %319 = tpu.matmul %318, %4, %cst_133 {dimension_numbers = #tpu.dot_dimension_numbers<[1], [0], [0], [1], [0, 0, 1, 1], [], []>} : vector<8x256xf32>, vector<256x512xf32>, vector<8x512xf32> -> vector<8x512xf32>
    %320 = arith.addf %319, %7 : vector<8x512xf32>
    %321 = vector.extract_strided_slice %320 {offsets = [0, 0], sizes = [8, 128], strides = [1, 1]} : vector<8x512xf32> to vector<8x128xf32>
    %322 = arith.negf %321 : vector<8x128xf32>
    %323 = math.exp %322 : vector<8x128xf32>
    %cst_134 = arith.constant 1.000000e+00 : f32
    %324 = vector.broadcast %cst_134 : f32 to vector<8x128xf32>
    %325 = arith.addf %324, %323 : vector<8x128xf32>
    %326 = arith.divf %324, %325 : vector<8x128xf32>
    %327 = vector.extract_strided_slice %320 {offsets = [0, 128], sizes = [8, 128], strides = [1, 1]} : vector<8x512xf32> to vector<8x128xf32>
    %328 = arith.negf %327 : vector<8x128xf32>
    %329 = math.exp %328 : vector<8x128xf32>
    %cst_135 = arith.constant 1.000000e+00 : f32
    %330 = vector.broadcast %cst_135 : f32 to vector<8x128xf32>
    %331 = arith.addf %330, %329 : vector<8x128xf32>
    %332 = arith.divf %330, %331 : vector<8x128xf32>
    %333 = vector.extract_strided_slice %320 {offsets = [0, 256], sizes = [8, 128], strides = [1, 1]} : vector<8x512xf32> to vector<8x128xf32>
    %334 = math.tanh %333 : vector<8x128xf32>
    %335 = vector.extract_strided_slice %320 {offsets = [0, 384], sizes = [8, 128], strides = [1, 1]} : vector<8x512xf32> to vector<8x128xf32>
    %336 = arith.negf %335 : vector<8x128xf32>
    %337 = math.exp %336 : vector<8x128xf32>
    %cst_136 = arith.constant 1.000000e+00 : f32
    %338 = vector.broadcast %cst_136 : f32 to vector<8x128xf32>
    %339 = arith.addf %338, %337 : vector<8x128xf32>
    %340 = arith.divf %338, %339 : vector<8x128xf32>
    %c0_137 = arith.constant 0 : index
    %c0_138 = arith.constant 0 : index
    %341 = vector.load %arg9[%c0_137, %c0_138] : memref<8x128xf32, #tpu.memory_space<vmem>>, vector<8x128xf32>
    %342 = arith.mulf %332, %341 : vector<8x128xf32>
    %343 = arith.mulf %326, %334 : vector<8x128xf32>
    %344 = arith.addf %342, %343 : vector<8x128xf32>
    %345 = math.tanh %344 : vector<8x128xf32>
    %346 = arith.mulf %340, %345 : vector<8x128xf32>
    %c0_139 = arith.constant 0 : index
    %c0_140 = arith.constant 0 : index
    %347 = vector.load %arg9[%c0_139, %c0_140] : memref<8x128xf32, #tpu.memory_space<vmem>>, vector<8x128xf32>
    tpu.vector_store %arg9[%c0_139, %c0_140], %344 {strides = array<i32>} : memref<8x128xf32, #tpu.memory_space<vmem>>, vector<8x128xf32>,
    %c0_141 = arith.constant 0 : index
    %c128_142 = arith.constant 128 : index
    %348 = vector.load %arg7[%c0_141, %c128_142] : memref<8x256xf32, #tpu.memory_space<vmem>>, vector<8x128xf32>
    tpu.vector_store %arg7[%c0_141, %c128_142], %346 {strides = array<i32>} : memref<8x256xf32, #tpu.memory_space<vmem>>, vector<8x128xf32>,
    %349 = arith.index_cast %c4_i32 : i32 to index
    %c0_143 = arith.constant 0 : index
    %c0_144 = arith.constant 0 : index
    %350 = vector.load %arg6[%349, %c0_143, %c0_144] : memref<8x8x128xf32, #tpu.memory_space<vmem>>, vector<1x8x128xf32>
    %351 = vector.shape_cast %350 : vector<1x8x128xf32> to vector<8x128xf32>
    %352 = vector.shape_cast %346 : vector<8x128xf32> to vector<1x8x128xf32>
    tpu.vector_store %arg6[%349, %c0_143, %c0_144], %352 {strides = array<i32>} : memref<8x8x128xf32, #tpu.memory_space<vmem>>, vector<1x8x128xf32>,
    %c5_i32 = arith.constant 5 : i32
    %353 = arith.index_cast %c5_i32 : i32 to index
    %c0_145 = arith.constant 0 : index
    %c0_146 = arith.constant 0 : index
    %354 = vector.load %arg2[%353, %c0_145, %c0_146] : memref<8x8x512xf32, #tpu.memory_space<vmem>>, vector<1x8x512xf32>
    %355 = vector.shape_cast %354 : vector<1x8x512xf32> to vector<8x512xf32>
    %c0_147 = arith.constant 0 : index
    %c0_148 = arith.constant 0 : index
    %356 = vector.load %arg7[%c0_147, %c0_148] : memref<8x256xf32, #tpu.memory_space<vmem>>, vector<8x128xf32>
    %cst_149 = arith.constant dense<0.000000e+00> : vector<8x512xf32>
    %357 = tpu.matmul %356, %3, %cst_149 {dimension_numbers = #tpu.dot_dimension_numbers<[1], [0], [0], [1], [0, 0, 1, 1], [], []>} : vector<8x128xf32>, vector<128x512xf32>, vector<8x512xf32> -> vector<8x512xf32>
    %358 = arith.addf %355, %357 : vector<8x512xf32>
    %359 = vector.extract_strided_slice %358 {offsets = [0, 0], sizes = [8, 128], strides = [1, 1]} : vector<8x512xf32> to vector<8x128xf32>
    %360 = arith.negf %359 : vector<8x128xf32>
    %361 = math.exp %360 : vector<8x128xf32>
    %cst_150 = arith.constant 1.000000e+00 : f32
    %362 = vector.broadcast %cst_150 : f32 to vector<8x128xf32>
    %363 = arith.addf %362, %361 : vector<8x128xf32>
    %364 = arith.divf %362, %363 : vector<8x128xf32>
    %365 = vector.extract_strided_slice %358 {offsets = [0, 128], sizes = [8, 128], strides = [1, 1]} : vector<8x512xf32> to vector<8x128xf32>
    %366 = arith.negf %365 : vector<8x128xf32>
    %367 = math.exp %366 : vector<8x128xf32>
    %cst_151 = arith.constant 1.000000e+00 : f32
    %368 = vector.broadcast %cst_151 : f32 to vector<8x128xf32>
    %369 = arith.addf %368, %367 : vector<8x128xf32>
    %370 = arith.divf %368, %369 : vector<8x128xf32>
    %371 = vector.extract_strided_slice %358 {offsets = [0, 256], sizes = [8, 128], strides = [1, 1]} : vector<8x512xf32> to vector<8x128xf32>
    %372 = math.tanh %371 : vector<8x128xf32>
    %373 = vector.extract_strided_slice %358 {offsets = [0, 384], sizes = [8, 128], strides = [1, 1]} : vector<8x512xf32> to vector<8x128xf32>
    %374 = arith.negf %373 : vector<8x128xf32>
    %375 = math.exp %374 : vector<8x128xf32>
    %cst_152 = arith.constant 1.000000e+00 : f32
    %376 = vector.broadcast %cst_152 : f32 to vector<8x128xf32>
    %377 = arith.addf %376, %375 : vector<8x128xf32>
    %378 = arith.divf %376, %377 : vector<8x128xf32>
    %c0_153 = arith.constant 0 : index
    %c0_154 = arith.constant 0 : index
    %379 = vector.load %arg8[%c0_153, %c0_154] : memref<8x128xf32, #tpu.memory_space<vmem>>, vector<8x128xf32>
    %380 = arith.mulf %370, %379 : vector<8x128xf32>
    %381 = arith.mulf %364, %372 : vector<8x128xf32>
    %382 = arith.addf %380, %381 : vector<8x128xf32>
    %383 = math.tanh %382 : vector<8x128xf32>
    %384 = arith.mulf %378, %383 : vector<8x128xf32>
    %c0_155 = arith.constant 0 : index
    %c0_156 = arith.constant 0 : index
    %385 = vector.load %arg8[%c0_155, %c0_156] : memref<8x128xf32, #tpu.memory_space<vmem>>, vector<8x128xf32>
    tpu.vector_store %arg8[%c0_155, %c0_156], %382 {strides = array<i32>} : memref<8x128xf32, #tpu.memory_space<vmem>>, vector<8x128xf32>,
    %c0_157 = arith.constant 0 : index
    %c0_158 = arith.constant 0 : index
    %386 = vector.load %arg7[%c0_157, %c0_158] : memref<8x256xf32, #tpu.memory_space<vmem>>, vector<8x128xf32>
    tpu.vector_store %arg7[%c0_157, %c0_158], %384 {strides = array<i32>} : memref<8x256xf32, #tpu.memory_space<vmem>>, vector<8x128xf32>,
    %c0_159 = arith.constant 0 : index
    %c0_160 = arith.constant 0 : index
    %387 = vector.load %arg7[%c0_159, %c0_160] : memref<8x256xf32, #tpu.memory_space<vmem>>, vector<8x256xf32>
    %cst_161 = arith.constant dense<0.000000e+00> : vector<8x512xf32>
    %388 = tpu.matmul %387, %4, %cst_161 {dimension_numbers = #tpu.dot_dimension_numbers<[1], [0], [0], [1], [0, 0, 1, 1], [], []>} : vector<8x256xf32>, vector<256x512xf32>, vector<8x512xf32> -> vector<8x512xf32>
    %389 = arith.addf %388, %7 : vector<8x512xf32>
    %390 = vector.extract_strided_slice %389 {offsets = [0, 0], sizes = [8, 128], strides = [1, 1]} : vector<8x512xf32> to vector<8x128xf32>
    %391 = arith.negf %390 : vector<8x128xf32>
    %392 = math.exp %391 : vector<8x128xf32>
    %cst_162 = arith.constant 1.000000e+00 : f32
    %393 = vector.broadcast %cst_162 : f32 to vector<8x128xf32>
    %394 = arith.addf %393, %392 : vector<8x128xf32>
    %395 = arith.divf %393, %394 : vector<8x128xf32>
    %396 = vector.extract_strided_slice %389 {offsets = [0, 128], sizes = [8, 128], strides = [1, 1]} : vector<8x512xf32> to vector<8x128xf32>
    %397 = arith.negf %396 : vector<8x128xf32>
    %398 = math.exp %397 : vector<8x128xf32>
    %cst_163 = arith.constant 1.000000e+00 : f32
    %399 = vector.broadcast %cst_163 : f32 to vector<8x128xf32>
    %400 = arith.addf %399, %398 : vector<8x128xf32>
    %401 = arith.divf %399, %400 : vector<8x128xf32>
    %402 = vector.extract_strided_slice %389 {offsets = [0, 256], sizes = [8, 128], strides = [1, 1]} : vector<8x512xf32> to vector<8x128xf32>
    %403 = math.tanh %402 : vector<8x128xf32>
    %404 = vector.extract_strided_slice %389 {offsets = [0, 384], sizes = [8, 128], strides = [1, 1]} : vector<8x512xf32> to vector<8x128xf32>
    %405 = arith.negf %404 : vector<8x128xf32>
    %406 = math.exp %405 : vector<8x128xf32>
    %cst_164 = arith.constant 1.000000e+00 : f32
    %407 = vector.broadcast %cst_164 : f32 to vector<8x128xf32>
    %408 = arith.addf %407, %406 : vector<8x128xf32>
    %409 = arith.divf %407, %408 : vector<8x128xf32>
    %c0_165 = arith.constant 0 : index
    %c0_166 = arith.constant 0 : index
    %410 = vector.load %arg9[%c0_165, %c0_166] : memref<8x128xf32, #tpu.memory_space<vmem>>, vector<8x128xf32>
    %411 = arith.mulf %401, %410 : vector<8x128xf32>
    %412 = arith.mulf %395, %403 : vector<8x128xf32>
    %413 = arith.addf %411, %412 : vector<8x128xf32>
    %414 = math.tanh %413 : vector<8x128xf32>
    %415 = arith.mulf %409, %414 : vector<8x128xf32>
    %c0_167 = arith.constant 0 : index
    %c0_168 = arith.constant 0 : index
    %416 = vector.load %arg9[%c0_167, %c0_168] : memref<8x128xf32, #tpu.memory_space<vmem>>, vector<8x128xf32>
    tpu.vector_store %arg9[%c0_167, %c0_168], %413 {strides = array<i32>} : memref<8x128xf32, #tpu.memory_space<vmem>>, vector<8x128xf32>,
    %c0_169 = arith.constant 0 : index
    %c128_170 = arith.constant 128 : index
    %417 = vector.load %arg7[%c0_169, %c128_170] : memref<8x256xf32, #tpu.memory_space<vmem>>, vector<8x128xf32>
    tpu.vector_store %arg7[%c0_169, %c128_170], %415 {strides = array<i32>} : memref<8x256xf32, #tpu.memory_space<vmem>>, vector<8x128xf32>,
    %418 = arith.index_cast %c5_i32 : i32 to index
    %c0_171 = arith.constant 0 : index
    %c0_172 = arith.constant 0 : index
    %419 = vector.load %arg6[%418, %c0_171, %c0_172] : memref<8x8x128xf32, #tpu.memory_space<vmem>>, vector<1x8x128xf32>
    %420 = vector.shape_cast %419 : vector<1x8x128xf32> to vector<8x128xf32>
    %421 = vector.shape_cast %415 : vector<8x128xf32> to vector<1x8x128xf32>
    tpu.vector_store %arg6[%418, %c0_171, %c0_172], %421 {strides = array<i32>} : memref<8x8x128xf32, #tpu.memory_space<vmem>>, vector<1x8x128xf32>,
    %c6_i32 = arith.constant 6 : i32
    %422 = arith.index_cast %c6_i32 : i32 to index
    %c0_173 = arith.constant 0 : index
    %c0_174 = arith.constant 0 : index
    %423 = vector.load %arg2[%422, %c0_173, %c0_174] : memref<8x8x512xf32, #tpu.memory_space<vmem>>, vector<1x8x512xf32>
    %424 = vector.shape_cast %423 : vector<1x8x512xf32> to vector<8x512xf32>
    %c0_175 = arith.constant 0 : index
    %c0_176 = arith.constant 0 : index
    %425 = vector.load %arg7[%c0_175, %c0_176] : memref<8x256xf32, #tpu.memory_space<vmem>>, vector<8x128xf32>
    %cst_177 = arith.constant dense<0.000000e+00> : vector<8x512xf32>
    %426 = tpu.matmul %425, %3, %cst_177 {dimension_numbers = #tpu.dot_dimension_numbers<[1], [0], [0], [1], [0, 0, 1, 1], [], []>} : vector<8x128xf32>, vector<128x512xf32>, vector<8x512xf32> -> vector<8x512xf32>
    %427 = arith.addf %424, %426 : vector<8x512xf32>
    %428 = vector.extract_strided_slice %427 {offsets = [0, 0], sizes = [8, 128], strides = [1, 1]} : vector<8x512xf32> to vector<8x128xf32>
    %429 = arith.negf %428 : vector<8x128xf32>
    %430 = math.exp %429 : vector<8x128xf32>
    %cst_178 = arith.constant 1.000000e+00 : f32
    %431 = vector.broadcast %cst_178 : f32 to vector<8x128xf32>
    %432 = arith.addf %431, %430 : vector<8x128xf32>
    %433 = arith.divf %431, %432 : vector<8x128xf32>
    %434 = vector.extract_strided_slice %427 {offsets = [0, 128], sizes = [8, 128], strides = [1, 1]} : vector<8x512xf32> to vector<8x128xf32>
    %435 = arith.negf %434 : vector<8x128xf32>
    %436 = math.exp %435 : vector<8x128xf32>
    %cst_179 = arith.constant 1.000000e+00 : f32
    %437 = vector.broadcast %cst_179 : f32 to vector<8x128xf32>
    %438 = arith.addf %437, %436 : vector<8x128xf32>
    %439 = arith.divf %437, %438 : vector<8x128xf32>
    %440 = vector.extract_strided_slice %427 {offsets = [0, 256], sizes = [8, 128], strides = [1, 1]} : vector<8x512xf32> to vector<8x128xf32>
    %441 = math.tanh %440 : vector<8x128xf32>
    %442 = vector.extract_strided_slice %427 {offsets = [0, 384], sizes = [8, 128], strides = [1, 1]} : vector<8x512xf32> to vector<8x128xf32>
    %443 = arith.negf %442 : vector<8x128xf32>
    %444 = math.exp %443 : vector<8x128xf32>
    %cst_180 = arith.constant 1.000000e+00 : f32
    %445 = vector.broadcast %cst_180 : f32 to vector<8x128xf32>
    %446 = arith.addf %445, %444 : vector<8x128xf32>
    %447 = arith.divf %445, %446 : vector<8x128xf32>
    %c0_181 = arith.constant 0 : index
    %c0_182 = arith.constant 0 : index
    %448 = vector.load %arg8[%c0_181, %c0_182] : memref<8x128xf32, #tpu.memory_space<vmem>>, vector<8x128xf32>
    %449 = arith.mulf %439, %448 : vector<8x128xf32>
    %450 = arith.mulf %433, %441 : vector<8x128xf32>
    %451 = arith.addf %449, %450 : vector<8x128xf32>
    %452 = math.tanh %451 : vector<8x128xf32>
    %453 = arith.mulf %447, %452 : vector<8x128xf32>
    %c0_183 = arith.constant 0 : index
    %c0_184 = arith.constant 0 : index
    %454 = vector.load %arg8[%c0_183, %c0_184] : memref<8x128xf32, #tpu.memory_space<vmem>>, vector<8x128xf32>
    tpu.vector_store %arg8[%c0_183, %c0_184], %451 {strides = array<i32>} : memref<8x128xf32, #tpu.memory_space<vmem>>, vector<8x128xf32>,
    %c0_185 = arith.constant 0 : index
    %c0_186 = arith.constant 0 : index
    %455 = vector.load %arg7[%c0_185, %c0_186] : memref<8x256xf32, #tpu.memory_space<vmem>>, vector<8x128xf32>
    tpu.vector_store %arg7[%c0_185, %c0_186], %453 {strides = array<i32>} : memref<8x256xf32, #tpu.memory_space<vmem>>, vector<8x128xf32>,
    %c0_187 = arith.constant 0 : index
    %c0_188 = arith.constant 0 : index
    %456 = vector.load %arg7[%c0_187, %c0_188] : memref<8x256xf32, #tpu.memory_space<vmem>>, vector<8x256xf32>
    %cst_189 = arith.constant dense<0.000000e+00> : vector<8x512xf32>
    %457 = tpu.matmul %456, %4, %cst_189 {dimension_numbers = #tpu.dot_dimension_numbers<[1], [0], [0], [1], [0, 0, 1, 1], [], []>} : vector<8x256xf32>, vector<256x512xf32>, vector<8x512xf32> -> vector<8x512xf32>
    %458 = arith.addf %457, %7 : vector<8x512xf32>
    %459 = vector.extract_strided_slice %458 {offsets = [0, 0], sizes = [8, 128], strides = [1, 1]} : vector<8x512xf32> to vector<8x128xf32>
    %460 = arith.negf %459 : vector<8x128xf32>
    %461 = math.exp %460 : vector<8x128xf32>
    %cst_190 = arith.constant 1.000000e+00 : f32
    %462 = vector.broadcast %cst_190 : f32 to vector<8x128xf32>
    %463 = arith.addf %462, %461 : vector<8x128xf32>
    %464 = arith.divf %462, %463 : vector<8x128xf32>
    %465 = vector.extract_strided_slice %458 {offsets = [0, 128], sizes = [8, 128], strides = [1, 1]} : vector<8x512xf32> to vector<8x128xf32>
    %466 = arith.negf %465 : vector<8x128xf32>
    %467 = math.exp %466 : vector<8x128xf32>
    %cst_191 = arith.constant 1.000000e+00 : f32
    %468 = vector.broadcast %cst_191 : f32 to vector<8x128xf32>
    %469 = arith.addf %468, %467 : vector<8x128xf32>
    %470 = arith.divf %468, %469 : vector<8x128xf32>
    %471 = vector.extract_strided_slice %458 {offsets = [0, 256], sizes = [8, 128], strides = [1, 1]} : vector<8x512xf32> to vector<8x128xf32>
    %472 = math.tanh %471 : vector<8x128xf32>
    %473 = vector.extract_strided_slice %458 {offsets = [0, 384], sizes = [8, 128], strides = [1, 1]} : vector<8x512xf32> to vector<8x128xf32>
    %474 = arith.negf %473 : vector<8x128xf32>
    %475 = math.exp %474 : vector<8x128xf32>
    %cst_192 = arith.constant 1.000000e+00 : f32
    %476 = vector.broadcast %cst_192 : f32 to vector<8x128xf32>
    %477 = arith.addf %476, %475 : vector<8x128xf32>
    %478 = arith.divf %476, %477 : vector<8x128xf32>
    %c0_193 = arith.constant 0 : index
    %c0_194 = arith.constant 0 : index
    %479 = vector.load %arg9[%c0_193, %c0_194] : memref<8x128xf32, #tpu.memory_space<vmem>>, vector<8x128xf32>
    %480 = arith.mulf %470, %479 : vector<8x128xf32>
    %481 = arith.mulf %464, %472 : vector<8x128xf32>
    %482 = arith.addf %480, %481 : vector<8x128xf32>
    %483 = math.tanh %482 : vector<8x128xf32>
    %484 = arith.mulf %478, %483 : vector<8x128xf32>
    %c0_195 = arith.constant 0 : index
    %c0_196 = arith.constant 0 : index
    %485 = vector.load %arg9[%c0_195, %c0_196] : memref<8x128xf32, #tpu.memory_space<vmem>>, vector<8x128xf32>
    tpu.vector_store %arg9[%c0_195, %c0_196], %482 {strides = array<i32>} : memref<8x128xf32, #tpu.memory_space<vmem>>, vector<8x128xf32>,
    %c0_197 = arith.constant 0 : index
    %c128_198 = arith.constant 128 : index
    %486 = vector.load %arg7[%c0_197, %c128_198] : memref<8x256xf32, #tpu.memory_space<vmem>>, vector<8x128xf32>
    tpu.vector_store %arg7[%c0_197, %c128_198], %484 {strides = array<i32>} : memref<8x256xf32, #tpu.memory_space<vmem>>, vector<8x128xf32>,
    %487 = arith.index_cast %c6_i32 : i32 to index
    %c0_199 = arith.constant 0 : index
    %c0_200 = arith.constant 0 : index
    %488 = vector.load %arg6[%487, %c0_199, %c0_200] : memref<8x8x128xf32, #tpu.memory_space<vmem>>, vector<1x8x128xf32>
    %489 = vector.shape_cast %488 : vector<1x8x128xf32> to vector<8x128xf32>
    %490 = vector.shape_cast %484 : vector<8x128xf32> to vector<1x8x128xf32>
    tpu.vector_store %arg6[%487, %c0_199, %c0_200], %490 {strides = array<i32>} : memref<8x8x128xf32, #tpu.memory_space<vmem>>, vector<1x8x128xf32>,
    %c7_i32 = arith.constant 7 : i32
    %491 = arith.index_cast %c7_i32 : i32 to index
    %c0_201 = arith.constant 0 : index
    %c0_202 = arith.constant 0 : index
    %492 = vector.load %arg2[%491, %c0_201, %c0_202] : memref<8x8x512xf32, #tpu.memory_space<vmem>>, vector<1x8x512xf32>
    %493 = vector.shape_cast %492 : vector<1x8x512xf32> to vector<8x512xf32>
    %c0_203 = arith.constant 0 : index
    %c0_204 = arith.constant 0 : index
    %494 = vector.load %arg7[%c0_203, %c0_204] : memref<8x256xf32, #tpu.memory_space<vmem>>, vector<8x128xf32>
    %cst_205 = arith.constant dense<0.000000e+00> : vector<8x512xf32>
    %495 = tpu.matmul %494, %3, %cst_205 {dimension_numbers = #tpu.dot_dimension_numbers<[1], [0], [0], [1], [0, 0, 1, 1], [], []>} : vector<8x128xf32>, vector<128x512xf32>, vector<8x512xf32> -> vector<8x512xf32>
    %496 = arith.addf %493, %495 : vector<8x512xf32>
    %497 = vector.extract_strided_slice %496 {offsets = [0, 0], sizes = [8, 128], strides = [1, 1]} : vector<8x512xf32> to vector<8x128xf32>
    %498 = arith.negf %497 : vector<8x128xf32>
    %499 = math.exp %498 : vector<8x128xf32>
    %cst_206 = arith.constant 1.000000e+00 : f32
    %500 = vector.broadcast %cst_206 : f32 to vector<8x128xf32>
    %501 = arith.addf %500, %499 : vector<8x128xf32>
    %502 = arith.divf %500, %501 : vector<8x128xf32>
    %503 = vector.extract_strided_slice %496 {offsets = [0, 128], sizes = [8, 128], strides = [1, 1]} : vector<8x512xf32> to vector<8x128xf32>
    %504 = arith.negf %503 : vector<8x128xf32>
    %505 = math.exp %504 : vector<8x128xf32>
    %cst_207 = arith.constant 1.000000e+00 : f32
    %506 = vector.broadcast %cst_207 : f32 to vector<8x128xf32>
    %507 = arith.addf %506, %505 : vector<8x128xf32>
    %508 = arith.divf %506, %507 : vector<8x128xf32>
    %509 = vector.extract_strided_slice %496 {offsets = [0, 256], sizes = [8, 128], strides = [1, 1]} : vector<8x512xf32> to vector<8x128xf32>
    %510 = math.tanh %509 : vector<8x128xf32>
    %511 = vector.extract_strided_slice %496 {offsets = [0, 384], sizes = [8, 128], strides = [1, 1]} : vector<8x512xf32> to vector<8x128xf32>
    %512 = arith.negf %511 : vector<8x128xf32>
    %513 = math.exp %512 : vector<8x128xf32>
    %cst_208 = arith.constant 1.000000e+00 : f32
    %514 = vector.broadcast %cst_208 : f32 to vector<8x128xf32>
    %515 = arith.addf %514, %513 : vector<8x128xf32>
    %516 = arith.divf %514, %515 : vector<8x128xf32>
    %c0_209 = arith.constant 0 : index
    %c0_210 = arith.constant 0 : index
    %517 = vector.load %arg8[%c0_209, %c0_210] : memref<8x128xf32, #tpu.memory_space<vmem>>, vector<8x128xf32>
    %518 = arith.mulf %508, %517 : vector<8x128xf32>
    %519 = arith.mulf %502, %510 : vector<8x128xf32>
    %520 = arith.addf %518, %519 : vector<8x128xf32>
    %521 = math.tanh %520 : vector<8x128xf32>
    %522 = arith.mulf %516, %521 : vector<8x128xf32>
    %c0_211 = arith.constant 0 : index
    %c0_212 = arith.constant 0 : index
    %523 = vector.load %arg8[%c0_211, %c0_212] : memref<8x128xf32, #tpu.memory_space<vmem>>, vector<8x128xf32>
    tpu.vector_store %arg8[%c0_211, %c0_212], %520 {strides = array<i32>} : memref<8x128xf32, #tpu.memory_space<vmem>>, vector<8x128xf32>,
    %c0_213 = arith.constant 0 : index
    %c0_214 = arith.constant 0 : index
    %524 = vector.load %arg7[%c0_213, %c0_214] : memref<8x256xf32, #tpu.memory_space<vmem>>, vector<8x128xf32>
    tpu.vector_store %arg7[%c0_213, %c0_214], %522 {strides = array<i32>} : memref<8x256xf32, #tpu.memory_space<vmem>>, vector<8x128xf32>,
    %c0_215 = arith.constant 0 : index
    %c0_216 = arith.constant 0 : index
    %525 = vector.load %arg7[%c0_215, %c0_216] : memref<8x256xf32, #tpu.memory_space<vmem>>, vector<8x256xf32>
    %cst_217 = arith.constant dense<0.000000e+00> : vector<8x512xf32>
    %526 = tpu.matmul %525, %4, %cst_217 {dimension_numbers = #tpu.dot_dimension_numbers<[1], [0], [0], [1], [0, 0, 1, 1], [], []>} : vector<8x256xf32>, vector<256x512xf32>, vector<8x512xf32> -> vector<8x512xf32>
    %527 = arith.addf %526, %7 : vector<8x512xf32>
    %528 = vector.extract_strided_slice %527 {offsets = [0, 0], sizes = [8, 128], strides = [1, 1]} : vector<8x512xf32> to vector<8x128xf32>
    %529 = arith.negf %528 : vector<8x128xf32>
    %530 = math.exp %529 : vector<8x128xf32>
    %cst_218 = arith.constant 1.000000e+00 : f32
    %531 = vector.broadcast %cst_218 : f32 to vector<8x128xf32>
    %532 = arith.addf %531, %530 : vector<8x128xf32>
    %533 = arith.divf %531, %532 : vector<8x128xf32>
    %534 = vector.extract_strided_slice %527 {offsets = [0, 128], sizes = [8, 128], strides = [1, 1]} : vector<8x512xf32> to vector<8x128xf32>
    %535 = arith.negf %534 : vector<8x128xf32>
    %536 = math.exp %535 : vector<8x128xf32>
    %cst_219 = arith.constant 1.000000e+00 : f32
    %537 = vector.broadcast %cst_219 : f32 to vector<8x128xf32>
    %538 = arith.addf %537, %536 : vector<8x128xf32>
    %539 = arith.divf %537, %538 : vector<8x128xf32>
    %540 = vector.extract_strided_slice %527 {offsets = [0, 256], sizes = [8, 128], strides = [1, 1]} : vector<8x512xf32> to vector<8x128xf32>
    %541 = math.tanh %540 : vector<8x128xf32>
    %542 = vector.extract_strided_slice %527 {offsets = [0, 384], sizes = [8, 128], strides = [1, 1]} : vector<8x512xf32> to vector<8x128xf32>
    %543 = arith.negf %542 : vector<8x128xf32>
    %544 = math.exp %543 : vector<8x128xf32>
    %cst_220 = arith.constant 1.000000e+00 : f32
    %545 = vector.broadcast %cst_220 : f32 to vector<8x128xf32>
    %546 = arith.addf %545, %544 : vector<8x128xf32>
    %547 = arith.divf %545, %546 : vector<8x128xf32>
    %c0_221 = arith.constant 0 : index
    %c0_222 = arith.constant 0 : index
    %548 = vector.load %arg9[%c0_221, %c0_222] : memref<8x128xf32, #tpu.memory_space<vmem>>, vector<8x128xf32>
    %549 = arith.mulf %539, %548 : vector<8x128xf32>
    %550 = arith.mulf %533, %541 : vector<8x128xf32>
    %551 = arith.addf %549, %550 : vector<8x128xf32>
    %552 = math.tanh %551 : vector<8x128xf32>
    %553 = arith.mulf %547, %552 : vector<8x128xf32>
    %c0_223 = arith.constant 0 : index
    %c0_224 = arith.constant 0 : index
    %554 = vector.load %arg9[%c0_223, %c0_224] : memref<8x128xf32, #tpu.memory_space<vmem>>, vector<8x128xf32>
    tpu.vector_store %arg9[%c0_223, %c0_224], %551 {strides = array<i32>} : memref<8x128xf32, #tpu.memory_space<vmem>>, vector<8x128xf32>,
    %c0_225 = arith.constant 0 : index
    %c128_226 = arith.constant 128 : index
    %555 = vector.load %arg7[%c0_225, %c128_226] : memref<8x256xf32, #tpu.memory_space<vmem>>, vector<8x128xf32>
    tpu.vector_store %arg7[%c0_225, %c128_226], %553 {strides = array<i32>} : memref<8x256xf32, #tpu.memory_space<vmem>>, vector<8x128xf32>,
    %556 = arith.index_cast %c7_i32 : i32 to index
    %c0_227 = arith.constant 0 : index
    %c0_228 = arith.constant 0 : index
    %557 = vector.load %arg6[%556, %c0_227, %c0_228] : memref<8x8x128xf32, #tpu.memory_space<vmem>>, vector<1x8x128xf32>
    %558 = vector.shape_cast %557 : vector<1x8x128xf32> to vector<8x128xf32>
    %559 = vector.shape_cast %553 : vector<8x128xf32> to vector<1x8x128xf32>
    tpu.vector_store %arg6[%556, %c0_227, %c0_228], %559 {strides = array<i32>} : memref<8x8x128xf32, #tpu.memory_space<vmem>>, vector<1x8x128xf32>,
    %c8_i32 = arith.constant 8 : i32
    return
  }
  func.func @transform_0(%arg0: i32, %arg1: i32) -> (i32, i32, i32) {
    %c0_i32 = arith.constant 0 : i32
    %c0_i32_0 = arith.constant 0 : i32
    return %arg1, %arg0, %c0_i32 : i32, i32, i32
  }
  func.func @transform_1(%arg0: i32, %arg1: i32) -> (i32, i32) {
    %c0_i32 = arith.constant 0 : i32
    %c0_i32_0 = arith.constant 0 : i32
    %c0_i32_1 = arith.constant 0 : i32
    return %c0_i32, %c0_i32_0 : i32, i32
  }
  func.func @transform_2(%arg0: i32, %arg1: i32) -> (i32, i32) {
    %c0_i32 = arith.constant 0 : i32
    %c0_i32_0 = arith.constant 0 : i32
    %c0_i32_1 = arith.constant 0 : i32
    return %c0_i32, %c0_i32_0 : i32, i32
  }
  func.func @transform_3(%arg0: i32, %arg1: i32) -> (i32, i32) {
    %c0_i32 = arith.constant 0 : i32
    %c0_i32_0 = arith.constant 0 : i32
    %c0_i32_1 = arith.constant 0 : i32
    return %c0_i32, %c0_i32_0 : i32, i32
  }
  func.func @transform_4(%arg0: i32, %arg1: i32) -> (i32, i32, i32) {
    %c0_i32 = arith.constant 0 : i32
    %c0_i32_0 = arith.constant 0 : i32
    return %arg1, %arg0, %c0_i32 : i32, i32, i32
  }
}

</mosaic_0001>

<bundles_post_ra>
// kernel: tpu_custom_call.1
= control target key start
LH: loop header
LB: loop body
LE: loop exit
PB: predicated region body
PF: predicated region fallthrough
CT: control target
= control target key end

     0   :  { %9 = vsyncpa [#allocation6], 0  ;;  %s6233_s0 = inlined_call_operand.hbm [shape: f32[8,8,512], index: 0, kind: input, shape index: {}]   ;;  %s6234_s1 = inlined_call_operand.hbm [shape: f32[128,512], index: 1, kind: input, shape index: {}]   ;;  %s6235_s2 = inlined_call_operand.hbm [shape: f32[256,512], index: 2, kind: input, shape index: {}]   ;;  %s6236_s3 = inlined_call_operand.vmem [shape: f32[1,512], index: 3, kind: input, shape index: {}]   ;;  %s6237_s4 = inlined_call_operand.hbm [shape: f32[8,8,128], index: 4, kind: output, shape index: {}]  }
   0x1   :  { %10 = vsyncpa [#allocation9], 0 }
   0x2   :  { %11 = vsyncpa [#allocation7], 0  ;;  %s5056_s15 = smov [#allocation8]   ;;  %s5057_s17 = smov [#allocation5]  }
   0x3   :  { %s29_s16 = sshll.u32 %s5056_s15, 4  ;;  %s17_s18 = sshll.u32 %s5057_s17, 4  ;;  %s30_s16 = int_to_ptr.vmem [resolvable:$true] %s29_s16  ;;  %s5090_s18 = int_to_ptr.vmem [resolvable:$true] %s17_s18 }
   0x4   :  { %s4962_s21 = scalar_lea.hbm %s6234_s1, 8192 }
   0x5   :  { %p4963_p0 = scmp.ne.s32.totalorder %s6234_s1, %s4962_s21  ;;  %p4966_p1 = scmp.lt.u32.totalorder %s4962_s21, %s6234_s1 }
   0x7   :  { %p4968_p2 = pnand %p4966_p1, %p4963_p0 }
   0x9   :  { %4971 = shalt.err (!%p4968_p2)
}
   0xa   :  { %s4972_s26 = scalar_lea.vmem %s30_s16, 8192  ;;  %p4977_p4 = scmp.lt.s32.totalorder %s30_s16, %s30_s16 }
   0xb   :  { %p4973_p3 = scmp.ne.s32.totalorder %s30_s16, %s4972_s26  ;;  %p4978_p5 = scmp.lt.s32.totalorder %s4972_s26, %s4972_s26 }
   0xd   :  { %p4979_p6 = por %p4978_p5, %p4977_p4 }
   0xf   :  { %p4980_p7 = pnand %p4979_p6, %p4973_p3 }
  0x11   :  { %4983 = shalt.err (!%p4980_p7)
}
  0x12   :  { %s5058_s27 = smov 512   ;;  %s5059_s28 = smov 32  }
  0x13   :  { %35 = dma.hbm_to_vmem [thread:$0]  %s6234_s1, 8192, %s30_s16, [#allocation9], %s5058_s27, %s5058_s27, %s5059_s28  }
  0x14   :  { %s4984_s7 = scalar_lea.hbm %s6233_s0, 4096 }
  0x15   :  { %p4985_p8 = scmp.ne.s32.totalorder %s6233_s0, %s4984_s7  ;;  %p4988_p9 = scmp.lt.u32.totalorder %s4984_s7, %s6233_s0 }
  0x17   :  { %p4990_p10 = pnand %p4988_p9, %p4985_p8 }
  0x19   :  { %4993 = shalt.err (!%p4990_p10)
}
  0x1a   :  { %s4994_s12 = scalar_lea.vmem %s5090_s18, 4096  ;;  %p4999_p12 = scmp.lt.s32.totalorder %s5090_s18, %s5090_s18 }
  0x1b   :  { %p4995_p11 = scmp.ne.s32.totalorder %s5090_s18, %s4994_s12  ;;  %p5000_p13 = scmp.lt.s32.totalorder %s4994_s12, %s4994_s12 }
  0x1d   :  { %p5001_p0 = por %p5000_p13, %p4999_p12 }
  0x1f   :  { %p5002_p1 = pnand %p5001_p0, %p4995_p11 }
  0x21   :  { %5005 = shalt.err (!%p5002_p1)
}
  0x22   :  { %23 = dma.hbm_to_vmem [thread:$0]  %s6233_s0, 4096, %s5090_s18, [#allocation6], %s5058_s27, %s5058_s27, %s5059_s28  }
  0x23   :  { %s5060_s14 = smov [#allocation10]   ;;  %s5006_s19 = scalar_lea.hbm %s6235_s2, 16384 }
  0x24   :  { %s41_s15 = sshll.u32 %s5060_s14, 4  ;;  %p5007_p2 = scmp.ne.s32.totalorder %s6235_s2, %s5006_s19  ;;  %s42_s15 = int_to_ptr.vmem [resolvable:$true] %s41_s15 }
  0x25   :  { %p5010_p3 = scmp.lt.u32.totalorder %s5006_s19, %s6235_s2 }
  0x27   :  { %p5012_p4 = pnand %p5010_p3, %p5007_p2 }
  0x29   :  { %5015 = shalt.err (!%p5012_p4)
}
  0x2a   :  { %s5016_s24 = scalar_lea.vmem %s42_s15, 16384  ;;  %p5021_p6 = scmp.lt.s32.totalorder %s42_s15, %s42_s15 }
  0x2b   :  { %p5017_p5 = scmp.ne.s32.totalorder %s42_s15, %s5016_s24  ;;  %p5022_p7 = scmp.lt.s32.totalorder %s5016_s24, %s5016_s24 }
  0x2d   :  { %p5023_p8 = por %p5022_p7, %p5021_p6 }
  0x2f   :  { %p5024_p9 = pnand %p5023_p8, %p5017_p5 }
  0x31   :  { %5027 = shalt.err (!%p5024_p9)
}
  0x32   :  { %47 = dma.hbm_to_vmem [thread:$0]  %s6235_s2, 16384, %s42_s15, [#allocation9], %s5058_s27, %s5058_s27, %s5059_s28  }
  0x33   :  { %5050 = dma.done.wait [#allocation6], 4096  }
  0x34   :  { %5051 = vsyncadd [#allocation6], 4294963200 }
  0x35   :  { %5052 = dma.done.wait [#allocation9], 24576  }
  0x36   :  { %5053 = vsyncadd [#allocation9], 4294942720  ;;  %v6238_v0 = vmov 0.0   ;;  %v68_v1 = vld [vmem:[#allocation8 + $0x8] sm:$0xff]  ;;  %v67_v3 = vld [vmem:[#allocation8] sm:$0xff] }
  0x37   :  { %350 = vmatprep.mubr.f32.mxu0 %v6238_v0  ;;  %421 = vmatprep.mubr.f32.mxu1 %v6238_v0  ;;  %v72_v2 = vld [vmem:[#allocation8 + $0x28] sm:$0xff]  ;;  %v71_v5 = vld [vmem:[#allocation8 + $0x20] sm:$0xff]  ;;  %v70_v19 = vld [vmem:[#allocation8 + $0x18] sm:$0xff] }
  0x38   :  { %v5144_v4 = vpack.c.bf16 %v72_v2, %v68_v1  ;;  %v76_v6 = vld [vmem:[#allocation8 + $0x48] sm:$0xff]  ;;  %v5146_v8 = vpack.c.bf16 %v71_v5, %v67_v3  ;;  %v75_v10 = vld [vmem:[#allocation8 + $0x40] sm:$0xff]  ;;  %v74_v20 = vld [vmem:[#allocation8 + $0x38] sm:$0xff] }
  0x39   :  { %v80_v7 = vld [vmem:[#allocation8 + $0x68] sm:$0xff]  ;;  %v79_v11 = vld [vmem:[#allocation8 + $0x60] sm:$0xff]  ;;  %v5157_v22 = vpack.c.bf16 %v74_v20, %v70_v19  ;;  %v69_v23 = vld [vmem:[#allocation8 + $0x10] sm:$0xff] }
  0x3a   :  { %6358 = vst [vmem:[#allocation15_spill] sm:$0xff] %v5144_v4  ;;  %v5148_v9 = vpack.c.bf16 %v80_v7, %v76_v6  ;;  %v84_v12 = vld [vmem:[#allocation8 + $0x88] sm:$0xff]  ;;  %3162 = vmatprep.subr.bf16.mxu0 %v5144_v4  ;;  %v5152_v14 = vpack.c.bf16 %v79_v11, %v75_v10  ;;  %v83_v15 = vld [vmem:[#allocation8 + $0x80] sm:$0xff]  ;;  %v73_v24 = vld [vmem:[#allocation8 + $0x30] sm:$0xff] }
  0x3b   :  { %v88_v13 = vld [vmem:[#allocation8 + $0xa8] sm:$0xff]  ;;  %3164 = vmatpush1.bf16.msra.mxu0 %v5146_v8  ;;  %v87_v16 = vld [vmem:[#allocation8 + $0xa0] sm:$0xff]  ;;  %6359 = vst [vmem:[#allocation16_spill] sm:$0xff] %v5157_v22  ;;  %v5159_v25 = vpack.c.bf16 %v73_v24, %v69_v23  ;;  %3194 = vmatprep.subr.bf16.mxu1 %v5157_v22  ;;  %v78_v27 = vld [vmem:[#allocation8 + $0x58] sm:$0xff] }
  0x3c   :  { %3166 = vmatprep.subr.bf16.mxu0 %v5148_v9  ;;  %v5155_v17 = vpack.c.bf16 %v88_v13, %v84_v12  ;;  %v92_v18 = vld [vmem:[#allocation8 + $0xc8] sm:$0xff]  ;;  %v5162_v26 = vpack.c.bf16 %v87_v16, %v83_v15  ;;  %v82_v28 = vld [vmem:[#allocation8 + $0x78] sm:$0xff]  ;;  %v77_v29 = vld [vmem:[#allocation8 + $0x50] sm:$0xff] }
  0x3d   :  { %v96_v21 = vld [vmem:[#allocation8 + $0xe8] sm:$0xff]  ;;  %v91_v31 = vld [vmem:[#allocation8 + $0xc0] sm:$0xff]  ;;  %3196 = vmatpush1.bf16.msra.mxu1 %v5159_v25  ;;  %v5169_v33 = vpack.c.bf16 %v82_v28, %v78_v27  ;;  %v81_v34 = vld [vmem:[#allocation8 + $0x70] sm:$0xff] }
  0x3e   :  { %v5166_v30 = vpack.c.bf16 %v96_v21, %v92_v18  ;;  %v95_v32 = vld [vmem:[#allocation8 + $0xe0] sm:$0xff]  ;;  %v100_v35 = vld [vmem:[#allocation8 + $0x108] sm:$0xff]  ;;  %v5171_v37 = vpack.c.bf16 %v81_v34, %v77_v29  ;;  %v86_v38 = vld [vmem:[#allocation8 + $0x98] sm:$0xff] }
  0x3f   :  { %3168 = vmatpush1.bf16.msra.mxu0 %v5152_v14  ;;  %v104_v36 = vld [vmem:[#allocation8 + $0x128] sm:$0xff]  ;;  %3198 = vmatprep.subr.bf16.mxu1 %v5169_v33  ;;  %v90_v39 = vld [vmem:[#allocation8 + $0xb8] sm:$0xff]  ;;  %v85_v40 = vld [vmem:[#allocation8 + $0x90] sm:$0xff]  ;;  %v5175_v42 = vpack.c.bf16 %v95_v32, %v91_v31 }
  0x40   :  { %3170 = vmatprep.subr.bf16.mxu0 %v5155_v17  ;;  %v89_v41 = vld [vmem:[#allocation8 + $0xb0] sm:$0xff]  ;;  %v99_v43 = vld [vmem:[#allocation8 + $0x100] sm:$0xff]  ;;  %v5177_v45 = vpack.c.bf16 %v90_v39, %v86_v38  ;;  %v5180_v46 = vpack.c.bf16 %v104_v36, %v100_v35  ;;  %v108_v47 = vld [vmem:[#allocation8 + $0x148] sm:$0xff] }
  0x41   :  { %v103_v44 = vld [vmem:[#allocation8 + $0x120] sm:$0xff]  ;;  %3200 = vmatpush1.bf16.msra.mxu1 %v5171_v37  ;;  %v5183_v48 = vpack.c.bf16 %v89_v41, %v85_v40  ;;  %v94_v49 = vld [vmem:[#allocation8 + $0xd8] sm:$0xff]  ;;  %v112_v51 = vld [vmem:[#allocation8 + $0x168] sm:$0xff] }
  0x42   :  { %v98_v50 = vld [vmem:[#allocation8 + $0xf8] sm:$0xff]  ;;  %3202 = vmatprep.subr.bf16.mxu1 %v5177_v45  ;;  %v93_v53 = vld [vmem:[#allocation8 + $0xd0] sm:$0xff]  ;;  %v5189_v55 = vpack.c.bf16 %v103_v44, %v99_v43  ;;  %v5192_v58 = vpack.c.bf16 %v112_v51, %v108_v47  ;;  %v107_v59 = vld [vmem:[#allocation8 + $0x140] sm:$0xff] }
  0x43   :  { %3172 = vmatpush1.bf16.msra.mxu0 %v5162_v26  ;;  %v5186_v52 = vpack.c.bf16 %v98_v50, %v94_v49  ;;  %v97_v54 = vld [vmem:[#allocation8 + $0xf0] sm:$0xff]  ;;  %v102_v56 = vld [vmem:[#allocation8 + $0x118] sm:$0xff]  ;;  %v111_v60 = vld [vmem:[#allocation8 + $0x160] sm:$0xff] }
  0x44   :  { %3174 = vmatprep.subr.bf16.mxu0 %v5166_v30  ;;  %v106_v57 = vld [vmem:[#allocation8 + $0x138] sm:$0xff]  ;;  %v116_v61 = vld [vmem:[#allocation8 + $0x188] sm:$0xff]  ;;  %v5195_v62 = vpack.c.bf16 %v97_v54, %v93_v53  ;;  %v101_v2 = vld [vmem:[#allocation8 + $0x110] sm:$0xff]  ;;  %v5201_v7 = vpack.c.bf16 %v111_v60, %v107_v59 }
  0x45   :  { %3204 = vmatpush1.bf16.msra.mxu1 %v5183_v48  ;;  %v120_v63 = vld [vmem:[#allocation8 + $0x1a8] sm:$0xff]  ;;  %v5198_v1 = vpack.c.bf16 %v106_v57, %v102_v56  ;;  %v105_v3 = vld [vmem:[#allocation8 + $0x130] sm:$0xff]  ;;  %v110_v5 = vld [vmem:[#allocation8 + $0x158] sm:$0xff] }
  0x46   :  { %3206 = vmatprep.subr.bf16.mxu1 %v5186_v52  ;;  %v114_v6 = vld [vmem:[#allocation8 + $0x178] sm:$0xff]  ;;  %v5204_v10 = vpack.c.bf16 %v120_v63, %v116_v61  ;;  %v115_v11 = vld [vmem:[#allocation8 + $0x180] sm:$0xff]  ;;  %v124_v13 = vld [vmem:[#allocation8 + $0x1c8] sm:$0xff]  ;;  %v5207_v15 = vpack.c.bf16 %v105_v3, %v101_v2 }
  0x47   :  { %3176 = vmatpush1.bf16.msra.mxu0 %v5175_v42  ;;  %v119_v12 = vld [vmem:[#allocation8 + $0x1a0] sm:$0xff]  ;;  %v128_v16 = vld [vmem:[#allocation8 + $0x1e8] sm:$0xff]  ;;  %v5210_v18 = vpack.c.bf16 %v114_v6, %v110_v5  ;;  %v109_v19 = vld [vmem:[#allocation8 + $0x150] sm:$0xff] }
  0x48   :  { %3178 = vmatprep.subr.bf16.mxu0 %v5180_v46  ;;  %v113_v20 = vld [vmem:[#allocation8 + $0x170] sm:$0xff]  ;;  %v118_v21 = vld [vmem:[#allocation8 + $0x198] sm:$0xff]  ;;  %v5213_v24 = vpack.c.bf16 %v119_v12, %v115_v11  ;;  %v5216_v27 = vpack.c.bf16 %v128_v16, %v124_v13  ;;  %v123_v28 = vld [vmem:[#allocation8 + $0x1c0] sm:$0xff] }
  0x49   :  { %3208 = vmatpush1.bf16.msra.mxu1 %v5195_v62  ;;  %v122_v23 = vld [vmem:[#allocation8 + $0x1b8] sm:$0xff]  ;;  %v127_v29 = vld [vmem:[#allocation8 + $0x1e0] sm:$0xff]  ;;  %v5219_v31 = vpack.c.bf16 %v113_v20, %v109_v19  ;;  %v117_v32 = vld [vmem:[#allocation8 + $0x190] sm:$0xff] }
  0x4a   :  { %3210 = vmatprep.subr.bf16.mxu1 %v5198_v1  ;;  %v5222_v34 = vpack.c.bf16 %v122_v23, %v118_v21  ;;  %v121_v35 = vld [vmem:[#allocation8 + $0x1b0] sm:$0xff]  ;;  %v132_v36 = vld [vmem:[#allocation10 + $0x8] sm:$0xff]  ;;  %v126_v39 = vld [vmem:[#allocation8 + $0x1d8] sm:$0xff]  ;;  %v5225_v41 = vpack.c.bf16 %v127_v29, %v123_v28 }
  0x4b   :  { %3180 = vmatpush1.bf16.msra.mxu0 %v5189_v55  ;;  %v136_v38 = vld [vmem:[#allocation10 + $0x28] sm:$0xff]  ;;  %v130_v40 = vld [vmem:[#allocation8 + $0x1f8] sm:$0xff]  ;;  %v5229_v43 = vpack.c.bf16 %v121_v35, %v117_v32  ;;  %v125_v44 = vld [vmem:[#allocation8 + $0x1d0] sm:$0xff] }
  0x4c   :  { %3182 = vmatprep.subr.bf16.mxu0 %v5192_v58  ;;  %v5231_v47 = vpack.c.bf16 %v136_v38, %v132_v36  ;;  %v131_v49 = vld [vmem:[#allocation10] sm:$0xff]  ;;  %v5234_v51 = vpack.c.bf16 %v130_v40, %v126_v39  ;;  %v129_v53 = vld [vmem:[#allocation8 + $0x1f0] sm:$0xff]  ;;  %v140_v54 = vld [vmem:[#allocation10 + $0x48] sm:$0xff] }
  0x4d   :  { %3212 = vmatpush1.bf16.msra.mxu1 %v5207_v15  ;;  %v135_v50 = vld [vmem:[#allocation10 + $0x20] sm:$0xff]  ;;  %v144_v56 = vld [vmem:[#allocation10 + $0x68] sm:$0xff]  ;;  %v134_v57 = vld [vmem:[#allocation10 + $0x18] sm:$0xff]  ;;  %v5240_v61 = vpack.c.bf16 %v129_v53, %v125_v44 }
  0x4e   :  { %3214 = vmatprep.subr.bf16.mxu1 %v5210_v18  ;;  %v138_v59 = vld [vmem:[#allocation10 + $0x38] sm:$0xff]  ;;  %v5237_v60 = vpack.c.bf16 %v135_v50, %v131_v49  ;;  %v133_v63 = vld [vmem:[#allocation10 + $0x10] sm:$0xff]  ;;  %v5243_v2 = vpack.c.bf16 %v144_v56, %v140_v54  ;;  %v139_v3 = vld [vmem:[#allocation10 + $0x40] sm:$0xff] }
  0x4f   :  { %3184 = vmatpush1.bf16.msra.mxu0 %v5201_v7  ;;  %v143_v5 = vld [vmem:[#allocation10 + $0x60] sm:$0xff]  ;;  %v5246_v6 = vpack.c.bf16 %v138_v59, %v134_v57  ;;  %v137_v11 = vld [vmem:[#allocation10 + $0x30] sm:$0xff]  ;;  %v148_v12 = vld [vmem:[#allocation10 + $0x88] sm:$0xff] }
  0x50   :  { %3186 = vmatprep.subr.bf16.mxu0 %v5204_v10  ;;  %v152_v13 = vld [vmem:[#allocation10 + $0xa8] sm:$0xff]  ;;  %v142_v16 = vld [vmem:[#allocation10 + $0x58] sm:$0xff]  ;;  %v5250_v20 = vpack.c.bf16 %v143_v5, %v139_v3  ;;  %v5254_v21 = vpack.c.bf16 %v137_v11, %v133_v63  ;;  %v141_v23 = vld [vmem:[#allocation10 + $0x50] sm:$0xff] }
  0x51   :  { %3216 = vmatpush1.bf16.msra.mxu1 %v5219_v31  ;;  %v146_v19 = vld [vmem:[#allocation10 + $0x78] sm:$0xff]  ;;  %v5257_v28 = vpack.c.bf16 %v152_v13, %v148_v12  ;;  %v147_v29 = vld [vmem:[#allocation10 + $0x80] sm:$0xff]  ;;  %v145_v36 = vld [vmem:[#allocation10 + $0x70] sm:$0xff] }
  0x52   :  { %3218 = vmatprep.subr.bf16.mxu1 %v5222_v34  ;;  %v151_v32 = vld [vmem:[#allocation10 + $0xa0] sm:$0xff]  ;;  %v5260_v35 = vpack.c.bf16 %v146_v19, %v142_v16  ;;  %v156_v38 = vld [vmem:[#allocation10 + $0xc8] sm:$0xff]  ;;  %v150_v40 = vld [vmem:[#allocation10 + $0x98] sm:$0xff]  ;;  %v5267_v50 = vpack.c.bf16 %v145_v36, %v141_v23 }
  0x53   :  { %3188 = vmatpush1.bf16.msra.mxu0 %v5213_v24  ;;  %v160_v39 = vld [vmem:[#allocation10 + $0xe8] sm:$0xff]  ;;  %v154_v44 = vld [vmem:[#allocation10 + $0xb8] sm:$0xff]  ;;  %v5264_v49 = vpack.c.bf16 %v151_v32, %v147_v29  ;;  %v149_v53 = vld [vmem:[#allocation10 + $0x90] sm:$0xff] }
  0x54   :  { %3190 = vmatprep.subr.bf16.mxu0 %v5216_v27  ;;  %v5270_v54 = vpack.c.bf16 %v160_v39, %v156_v38  ;;  %v155_v56 = vld [vmem:[#allocation10 + $0xc0] sm:$0xff]  ;;  %v5273_v59 = vpack.c.bf16 %v154_v44, %v150_v40  ;;  %v153_v63 = vld [vmem:[#allocation10 + $0xb0] sm:$0xff]  ;;  %v164_v3 = vld [vmem:[#allocation10 + $0x108] sm:$0xff] }
  0x55   :  { %3220 = vmatpush1.bf16.msra.mxu1 %v5229_v43  ;;  %v159_v57 = vld [vmem:[#allocation10 + $0xe0] sm:$0xff]  ;;  %v168_v5 = vld [vmem:[#allocation10 + $0x128] sm:$0xff]  ;;  %v158_v11 = vld [vmem:[#allocation10 + $0xd8] sm:$0xff]  ;;  %v5280_v16 = vpack.c.bf16 %v153_v63, %v149_v53 }
  0x56   :  { %3222 = vmatprep.subr.bf16.mxu1 %v5234_v51  ;;  %6360 = vst [vmem:[#allocation17_spill] sm:$0xff] %v5270_v54  ;;  %v162_v12 = vld [vmem:[#allocation10 + $0xf8] sm:$0xff]  ;;  %v5277_v13 = vpack.c.bf16 %v159_v57, %v155_v56  ;;  %v5283_v19 = vpack.c.bf16 %v168_v5, %v164_v3  ;;  %v163_v23 = vld [vmem:[#allocation10 + $0x100] sm:$0xff]  ;;  %v157_v36 = vld [vmem:[#allocation10 + $0xd0] sm:$0xff] }
  0x57   :  { %3192 = vmatpush1.bf16.msra.mxu0 %v5225_v41  ;;  %6362 = vst [vmem:[#allocation19_spill] sm:$0xff] %v5280_v16  ;;  %v167_v29 = vld [vmem:[#allocation10 + $0x120] sm:$0xff]  ;;  %v5286_v32 = vpack.c.bf16 %v162_v12, %v158_v11  ;;  %v161_v38 = vld [vmem:[#allocation10 + $0xf0] sm:$0xff]  ;;  %v166_v39 = vld [vmem:[#allocation10 + $0x118] sm:$0xff] }
  0x58   :  { %3226 = vmatprep.subr.bf16.mxu0 %v5231_v47  ;;  %6361 = vst [vmem:[#allocation18_spill] sm:$0xff] %v5277_v13  ;;  %6363 = vst [vmem:[#allocation20_spill] sm:$0xff] %v5283_v19  ;;  %v170_v40 = vld [vmem:[#allocation10 + $0x138] sm:$0xff]  ;;  %v5289_v44 = vpack.c.bf16 %v167_v29, %v163_v23  ;;  %v5292_v53 = vpack.c.bf16 %v161_v38, %v157_v36  ;;  %v165_v57 = vld [vmem:[#allocation10 + $0x110] sm:$0xff] }
  0x59   :  { %3224 = vmatpush1.bf16.msra.mxu1 %v5240_v61  ;;  %6364 = vst [vmem:[#allocation21_spill] sm:$0xff] %v5286_v32  ;;  %v5296_v56 = vpack.c.bf16 %v170_v40, %v166_v39  ;;  %v169_v63 = vld [vmem:[#allocation10 + $0x130] sm:$0xff]  ;;  %v172_v5 = vld [vmem:[#allocation10 + $0x148] sm:$0xff]  ;;  %v174_v12 = vld [vmem:[#allocation10 + $0x158] sm:$0xff] }
  0x5a   :  { %351 = vmatmul.mubr.f32.vlgmr.msra.gmra.mrb[0].mxu0 %v6238_v0  ;;  %3290 = vmatprep.subr.bf16.mxu1 %v5246_v6  ;;  %6365 = vst [vmem:[#allocation22_spill] sm:$0xff] %v5289_v44  ;;  %6366 = vst [vmem:[#allocation23_spill] sm:$0xff] %v5292_v53  ;;  %v5300_v3 = vpack.c.bf16 %v169_v63, %v165_v57  ;;  %v176_v11 = vld [vmem:[#allocation10 + $0x168] sm:$0xff]  ;;  %v178_v29 = vld [vmem:[#allocation10 + $0x178] sm:$0xff] }
  0x5b   :  { %3228 = vmatpush1.bf16.msra.mxu0 %v5237_v60  ;;  %525 = vmatprep.mubr.f32.mxu0 %v6238_v0  ;;  %6367 = vst [vmem:[#allocation24_spill] sm:$0xff] %v5296_v56  ;;  %v5304_v23 = vpack.c.bf16 %v176_v11, %v172_v5  ;;  %v171_v36 = vld [vmem:[#allocation10 + $0x140] sm:$0xff]  ;;  %v5306_v39 = vpack.c.bf16 %v178_v29, %v174_v12  ;;  %v180_v63 = vld [vmem:[#allocation10 + $0x188] sm:$0xff]  ;;  %v182_v11 = vld [vmem:[#allocation10 + $0x198] sm:$0xff] }
  0x5c   :  { %3230 = vmatprep.subr.bf16.mxu0 %v5243_v2  ;;  %422 = vmatmul.mubr.f32.vlgmr.msra.gmra.mrb[0].mxu1 %v6238_v0  ;;  %6368 = vst [vmem:[#allocation25_spill] sm:$0xff] %v5300_v3  ;;  %v175_v38 = vld [vmem:[#allocation10 + $0x160] sm:$0xff]  ;;  %v184_v5 = vld [vmem:[#allocation10 + $0x1a8] sm:$0xff]  ;;  %v186_v12 = vld [vmem:[#allocation10 + $0x1b8] sm:$0xff] }
  0x5d   :  { %3292 = vmatpush1.bf16.msra.mxu1 %v5254_v21  ;;  %596 = vmatprep.mubr.f32.mxu1 %v6238_v0  ;;  %6369 = vst [vmem:[#allocation26_spill] sm:$0xff] %v5304_v23  ;;  %6370 = vst [vmem:[#allocation27_spill] sm:$0xff] %v5306_v39  ;;  %v5308_v40 = vpack.c.bf16 %v175_v38, %v171_v36  ;;  %v173_v0 = vld [vmem:[#allocation10 + $0x150] sm:$0xff]  ;;  %v179_v29 = vld [vmem:[#allocation10 + $0x180] sm:$0xff]  ;;  %v5318_v38 = vpack.c.bf16 %v186_v12, %v182_v11 }
  0x5e   :  { %3294 = vmatprep.subr.bf16.mxu1 %v5260_v35  ;;  %v183_v36 = vld [vmem:[#allocation10 + $0x1a0] sm:$0xff]  ;;  %v194_v11 = vld [vmem:[#allocation10 + $0x1f8] sm:$0xff] }
  0x5f   :  { %3232 = vmatpush1.bf16.msra.mxu0 %v5250_v20  ;;  %6371 = vst [vmem:[#allocation28_spill] sm:$0xff] %v5308_v40  ;;  %6374 = vst [vmem:[#allocation31_spill] sm:$0xff] %v5318_v38  ;;  %v187_v12 = vld [vmem:[#allocation10 + $0x1c0] sm:$0xff] }
  0x60   :  { %3234 = vmatprep.subr.bf16.mxu0 %v5257_v28 }
  0x61   :  { %3296 = vmatpush1.bf16.msra.mxu1 %v5267_v50 }
  0x62   :  { %3298 = vmatprep.subr.bf16.mxu1 %v5273_v59 }
  0x63   :  { %3236 = vmatpush1.bf16.msra.mxu0 %v5264_v49 }
  0x64   :  { %3238 = vmatprep.subr.bf16.mxu0 %v5270_v54 }
  0x65   :  { %3300 = vmatpush1.bf16.msra.mxu1 %v5280_v16 }
  0x66   :  { %3302 = vmatprep.subr.bf16.mxu1 %v5286_v32 }
  0x67   :  { %3240 = vmatpush1.bf16.msra.mxu0 %v5277_v13 }
  0x68   :  { %3242 = vmatprep.subr.bf16.mxu0 %v5283_v19  ;;  %v248_v19 = vld [vmem:[#allocation10 + $0x3a8] sm:$0xff] }
  0x69   :  { %3304 = vmatpush1.bf16.msra.mxu1 %v5292_v53  ;;  %v243_v53 = vld [vmem:[#allocation10 + $0x380] sm:$0xff] }
  0x6a   :  { %3306 = vmatprep.subr.bf16.mxu1 %v5296_v56  ;;  %v5320_v56 = vpack.c.bf16 %v183_v36, %v179_v29  ;;  %v191_v29 = vld [vmem:[#allocation10 + $0x1e0] sm:$0xff] }
  0x6b   :  { %3244 = vmatpush1.bf16.msra.mxu0 %v5289_v44  ;;  %v177_v44 = vld [vmem:[#allocation10 + $0x170] sm:$0xff] }
  0x6c   :  { %3246 = vmatprep.subr.bf16.mxu0 %v5304_v23  ;;  %v5311_v57 = vpack.c.bf16 %v177_v44, %v173_v0  ;;  %6375 = vst [vmem:[#allocation32_spill] sm:$0xff] %v5320_v56  ;;  %v181_v0 = vld [vmem:[#allocation10 + $0x190] sm:$0xff]  ;;  %v5332_v23 = vpack.c.bf16 %v191_v29, %v187_v12  ;;  %v199_v12 = vld [vmem:[#allocation10 + $0x220] sm:$0xff] }
  0x6d   :  { %3308 = vmatpush1.bf16.msra.mxu1 %v5300_v3  ;;  %v5316_v3 = vpack.c.bf16 %v184_v5, %v180_v63  ;;  %v185_v44 = vld [vmem:[#allocation10 + $0x1b0] sm:$0xff]  ;;  %v192_v63 = vld [vmem:[#allocation10 + $0x1e8] sm:$0xff]  ;;  %v190_v5 = vld [vmem:[#allocation10 + $0x1d8] sm:$0xff] }
  0x6e   :  { %6372 = vst [vmem:[#allocation29_spill] sm:$0xff] %v5311_v57  ;;  %3310 = vmatprep.subr.bf16.mxu1 %v5306_v39  ;;  %v5323_v39 = vpack.c.bf16 %v185_v44, %v181_v0  ;;  %v5330_v36 = vpack.c.bf16 %v194_v11, %v190_v5  ;;  %6379 = vst [vmem:[#allocation36_spill] sm:$0xff] %v5332_v23  ;;  %v189_v0 = vld [vmem:[#allocation10 + $0x1d0] sm:$0xff]  ;;  %v202_v5 = vld [vmem:[#allocation10 + $0x238] sm:$0xff] }
  0x6f   :  { %3248 = vmatpush1.bf16.msra.mxu0 %v5308_v40  ;;  %6373 = vst [vmem:[#allocation30_spill] sm:$0xff] %v5316_v3  ;;  %v193_v44 = vld [vmem:[#allocation10 + $0x1f0] sm:$0xff]  ;;  %v195_v11 = vld [vmem:[#allocation10 + $0x200] sm:$0xff] }
  0x70   :  { %3250 = vmatprep.subr.bf16.mxu0 %v5316_v3  ;;  %6376 = vst [vmem:[#allocation33_spill] sm:$0xff] %v5323_v39  ;;  %6378 = vst [vmem:[#allocation35_spill] sm:$0xff] %v5330_v36  ;;  %v5344_v3 = vpack.c.bf16 %v199_v12, %v195_v11  ;;  %v203_v11 = vld [vmem:[#allocation10 + $0x240] sm:$0xff] }
  0x71   :  { %3312 = vmatpush1.bf16.msra.mxu1 %v5311_v57  ;;  %v188_v57 = vld [vmem:[#allocation10 + $0x1c8] sm:$0xff]  ;;  %v207_v12 = vld [vmem:[#allocation10 + $0x260] sm:$0xff] }
  0x72   :  { %3314 = vmatprep.subr.bf16.mxu1 %v5318_v38  ;;  %v5328_v40 = vpack.c.bf16 %v192_v63, %v188_v57  ;;  %v5335_v38 = vpack.c.bf16 %v193_v44, %v189_v0  ;;  %v200_v57 = vld [vmem:[#allocation10 + $0x228] sm:$0xff]  ;;  %v198_v63 = vld [vmem:[#allocation10 + $0x218] sm:$0xff]  ;;  %6383 = vst [vmem:[#allocation40_spill] sm:$0xff] %v5344_v3  ;;  %v197_v0 = vld [vmem:[#allocation10 + $0x210] sm:$0xff] }
  0x73   :  { %3252 = vmatpush1.bf16.msra.mxu0 %v5320_v56  ;;  %v5342_v29 = vpack.c.bf16 %v202_v5, %v198_v63  ;;  %v201_v44 = vld [vmem:[#allocation10 + $0x230] sm:$0xff] }
  0x74   :  { %6377 = vst [vmem:[#allocation34_spill] sm:$0xff] %v5328_v40  ;;  %3254 = vmatprep.subr.bf16.mxu0 %v5328_v40  ;;  %6380 = vst [vmem:[#allocation37_spill] sm:$0xff] %v5335_v38  ;;  %v205_v40 = vld [vmem:[#allocation10 + $0x250] sm:$0xff] }
  0x75   :  { %3316 = vmatpush1.bf16.msra.mxu1 %v5323_v39  ;;  %v196_v39 = vld [vmem:[#allocation10 + $0x208] sm:$0xff]  ;;  %6382 = vst [vmem:[#allocation39_spill] sm:$0xff] %v5342_v29 }
  0x76   :  { %3318 = vmatprep.subr.bf16.mxu1 %v5330_v36  ;;  %v5340_v56 = vpack.c.bf16 %v200_v57, %v196_v39  ;;  %v5347_v36 = vpack.c.bf16 %v201_v44, %v197_v0  ;;  %v208_v39 = vld [vmem:[#allocation10 + $0x268] sm:$0xff]  ;;  %v206_v57 = vld [vmem:[#allocation10 + $0x258] sm:$0xff]  ;;  %v209_v0 = vld [vmem:[#allocation10 + $0x270] sm:$0xff] }
  0x77   :  { %3256 = vmatpush1.bf16.msra.mxu0 %v5332_v23  ;;  %v210_v23 = vld [vmem:[#allocation10 + $0x278] sm:$0xff]  ;;  %v5360_v44 = vpack.c.bf16 %v209_v0, %v205_v40  ;;  %v220_v0 = vld [vmem:[#allocation10 + $0x2c8] sm:$0xff] }
  0x78   :  { %6381 = vst [vmem:[#allocation38_spill] sm:$0xff] %v5340_v56  ;;  %3258 = vmatprep.subr.bf16.mxu0 %v5340_v56  ;;  %6384 = vst [vmem:[#allocation41_spill] sm:$0xff] %v5347_v36  ;;  %v5354_v5 = vpack.c.bf16 %v210_v23, %v206_v57  ;;  %v5356_v56 = vpack.c.bf16 %v207_v12, %v203_v11  ;;  %v218_v23 = vld [vmem:[#allocation10 + $0x2b8] sm:$0xff]  ;;  %v215_v57 = vld [vmem:[#allocation10 + $0x2a0] sm:$0xff] }
  0x79   :  { %3320 = vmatpush1.bf16.msra.mxu1 %v5335_v38  ;;  %v204_v38 = vld [vmem:[#allocation10 + $0x248] sm:$0xff]  ;;  %6388 = vst [vmem:[#allocation45_spill] sm:$0xff] %v5360_v44 }
  0x7a   :  { %3322 = vmatprep.subr.bf16.mxu1 %v5342_v29  ;;  %v5352_v63 = vpack.c.bf16 %v208_v39, %v204_v38  ;;  %6386 = vst [vmem:[#allocation43_spill] sm:$0xff] %v5354_v5  ;;  %6387 = vst [vmem:[#allocation44_spill] sm:$0xff] %v5356_v56  ;;  %v214_v29 = vld [vmem:[#allocation10 + $0x298] sm:$0xff]  ;;  %v211_v39 = vld [vmem:[#allocation10 + $0x280] sm:$0xff] }
  0x7b   :  { %3260 = vmatpush1.bf16.msra.mxu0 %v5344_v3  ;;  %v216_v3 = vld [vmem:[#allocation10 + $0x2a8] sm:$0xff]  ;;  %v5366_v11 = vpack.c.bf16 %v218_v23, %v214_v29  ;;  %v5368_v12 = vpack.c.bf16 %v215_v57, %v211_v39  ;;  %v219_v29 = vld [vmem:[#allocation10 + $0x2c0] sm:$0xff] }
  0x7c   :  { %6385 = vst [vmem:[#allocation42_spill] sm:$0xff] %v5352_v63  ;;  %3262 = vmatprep.subr.bf16.mxu0 %v5352_v63  ;;  %v213_v63 = vld [vmem:[#allocation10 + $0x290] sm:$0xff]  ;;  %v223_v23 = vld [vmem:[#allocation10 + $0x2e0] sm:$0xff] }
  0x7d   :  { %3324 = vmatpush1.bf16.msra.mxu1 %v5347_v36  ;;  %v212_v36 = vld [vmem:[#allocation10 + $0x288] sm:$0xff]  ;;  %6390 = vst [vmem:[#allocation47_spill] sm:$0xff] %v5366_v11  ;;  %6391 = vst [vmem:[#allocation48_spill] sm:$0xff] %v5368_v12  ;;  %v5380_v57 = vpack.c.bf16 %v223_v23, %v219_v29 }
  0x7e   :  { %3326 = vmatprep.subr.bf16.mxu1 %v5354_v5  ;;  %v5363_v38 = vpack.c.bf16 %v216_v3, %v212_v36  ;;  %v217_v5 = vld [vmem:[#allocation10 + $0x2b0] sm:$0xff]  ;;  %v224_v3 = vld [vmem:[#allocation10 + $0x2e8] sm:$0xff]  ;;  %v222_v36 = vld [vmem:[#allocation10 + $0x2d8] sm:$0xff] }
  0x7f   :  { %3264 = vmatpush1.bf16.msra.mxu0 %v5356_v56  ;;  %v5371_v40 = vpack.c.bf16 %v217_v5, %v213_v63  ;;  %v5375_v56 = vpack.c.bf16 %v224_v3, %v220_v0  ;;  %6395 = vst [vmem:[#allocation52_spill] sm:$0xff] %v5380_v57  ;;  %v221_v63 = vld [vmem:[#allocation10 + $0x2d0] sm:$0xff]  ;;  %v232_v0 = vld [vmem:[#allocation10 + $0x328] sm:$0xff]  ;;  %v230_v3 = vld [vmem:[#allocation10 + $0x318] sm:$0xff] }
  0x80   :  { %6389 = vst [vmem:[#allocation46_spill] sm:$0xff] %v5363_v38  ;;  %3266 = vmatprep.subr.bf16.mxu0 %v5363_v38  ;;  %v225_v5 = vld [vmem:[#allocation10 + $0x2f0] sm:$0xff] }
  0x81   :  { %3328 = vmatpush1.bf16.msra.mxu1 %v5360_v44  ;;  %6392 = vst [vmem:[#allocation49_spill] sm:$0xff] %v5371_v40  ;;  %6393 = vst [vmem:[#allocation50_spill] sm:$0xff] %v5375_v56  ;;  %v226_v44 = vld [vmem:[#allocation10 + $0x2f8] sm:$0xff] }
  0x82   :  { %3330 = vmatprep.subr.bf16.mxu1 %v5366_v11  ;;  %v5378_v39 = vpack.c.bf16 %v226_v44, %v222_v36  ;;  %v5383_v11 = vpack.c.bf16 %v225_v5, %v221_v63  ;;  %v227_v44 = vld [vmem:[#allocation10 + $0x300] sm:$0xff]  ;;  %v229_v63 = vld [vmem:[#allocation10 + $0x310] sm:$0xff] }
  0x83   :  { %3268 = vmatpush1.bf16.msra.mxu0 %v5368_v12  ;;  %v228_v12 = vld [vmem:[#allocation10 + $0x308] sm:$0xff]  ;;  %v231_v36 = vld [vmem:[#allocation10 + $0x320] sm:$0xff]  ;;  %v233_v5 = vld [vmem:[#allocation10 + $0x330] sm:$0xff] }
  0x84   :  { %6394 = vst [vmem:[#allocation51_spill] sm:$0xff] %v5378_v39  ;;  %3270 = vmatprep.subr.bf16.mxu0 %v5375_v56  ;;  %6396 = vst [vmem:[#allocation53_spill] sm:$0xff] %v5383_v11  ;;  %v5387_v38 = vpack.c.bf16 %v232_v0, %v228_v12  ;;  %v5392_v23 = vpack.c.bf16 %v231_v36, %v227_v44  ;;  %v240_v12 = vld [vmem:[#allocation10 + $0x368] sm:$0xff]  ;;  %v238_v0 = vld [vmem:[#allocation10 + $0x358] sm:$0xff] }
  0x85   :  { %3332 = vmatpush1.bf16.msra.mxu1 %v5371_v40  ;;  %v234_v40 = vld [vmem:[#allocation10 + $0x338] sm:$0xff] }
  0x86   :  { %3334 = vmatprep.subr.bf16.mxu1 %v5378_v39  ;;  %6397 = vst [vmem:[#allocation54_spill] sm:$0xff] %v5387_v38  ;;  %v5390_v29 = vpack.c.bf16 %v234_v40, %v230_v3  ;;  %6399 = vst [vmem:[#allocation56_spill] sm:$0xff] %v5392_v23  ;;  %v5395_v39 = vpack.c.bf16 %v233_v5, %v229_v63  ;;  %v235_v40 = vld [vmem:[#allocation10 + $0x340] sm:$0xff]  ;;  %v237_v63 = vld [vmem:[#allocation10 + $0x350] sm:$0xff] }
  0x87   :  { %3272 = vmatpush1.bf16.msra.mxu0 %v5380_v57  ;;  %v236_v57 = vld [vmem:[#allocation10 + $0x348] sm:$0xff]  ;;  %v239_v3 = vld [vmem:[#allocation10 + $0x360] sm:$0xff]  ;;  %v241_v5 = vld [vmem:[#allocation10 + $0x370] sm:$0xff] }
  0x88   :  { %6398 = vst [vmem:[#allocation55_spill] sm:$0xff] %v5390_v29  ;;  %3274 = vmatprep.subr.bf16.mxu0 %v5387_v38  ;;  %6400 = vst [vmem:[#allocation57_spill] sm:$0xff] %v5395_v39  ;;  %v5399_v56 = vpack.c.bf16 %v240_v12, %v236_v57  ;;  %v5404_v36 = vpack.c.bf16 %v239_v3, %v235_v40  ;;  %v244_v38 = vld [vmem:[#allocation10 + $0x388] sm:$0xff]  ;;  %v250_v12 = vld [vmem:[#allocation10 + $0x3b8] sm:$0xff] }
  0x89   :  { %3336 = vmatpush1.bf16.msra.mxu1 %v5383_v11  ;;  %v242_v11 = vld [vmem:[#allocation10 + $0x378] sm:$0xff]  ;;  %v5410_v57 = vpack.c.bf16 %v248_v19, %v244_v38  ;;  %v245_v40 = vld [vmem:[#allocation10 + $0x390] sm:$0xff]  ;;  %v256_v19 = vld [vmem:[#allocation10 + $0x3e8] sm:$0xff] }
  0x8a   :  { %3338 = vmatprep.subr.bf16.mxu1 %v5390_v29  ;;  %6401 = vst [vmem:[#allocation58_spill] sm:$0xff] %v5399_v56  ;;  %v5402_v44 = vpack.c.bf16 %v242_v11, %v238_v0  ;;  %6403 = vst [vmem:[#allocation60_spill] sm:$0xff] %v5404_v36  ;;  %v5407_v29 = vpack.c.bf16 %v241_v5, %v237_v63  ;;  %v249_v3 = vld [vmem:[#allocation10 + $0x3b0] sm:$0xff]  ;;  %v252_v63 = vld [vmem:[#allocation10 + $0x3c8] sm:$0xff] }
  0x8b   :  { %3276 = vmatpush1.bf16.msra.mxu0 %v5392_v23  ;;  %v246_v23 = vld [vmem:[#allocation10 + $0x398] sm:$0xff]  ;;  %6405 = vst [vmem:[#allocation62_spill] sm:$0xff] %v5410_v57  ;;  %v5419_v5 = vpack.c.bf16 %v249_v3, %v245_v40  ;;  %v282_v3 = vld [vmem:[#allocation5 + $0x8] sm:$0xff] }
  0x8c   :  { %6402 = vst [vmem:[#allocation59_spill] sm:$0xff] %v5402_v44  ;;  %3278 = vmatprep.subr.bf16.mxu0 %v5399_v56  ;;  %6404 = vst [vmem:[#allocation61_spill] sm:$0xff] %v5407_v29  ;;  %v5413_v11 = vpack.c.bf16 %v250_v12, %v246_v23  ;;  %v254_v38 = vld [vmem:[#allocation10 + $0x3d8] sm:$0xff]  ;;  %v5422_v56 = vpack.c.bf16 %v256_v19, %v252_v63  ;;  %v253_v12 = vld [vmem:[#allocation10 + $0x3d0] sm:$0xff] }
  0x8d   :  { %3340 = vmatpush1.bf16.msra.mxu1 %v5395_v39  ;;  %v247_v39 = vld [vmem:[#allocation10 + $0x3a0] sm:$0xff]  ;;  %6408 = vst [vmem:[#allocation65_spill] sm:$0xff] %v5419_v5 }
  0x8e   :  { %3342 = vmatprep.subr.bf16.mxu1 %v5402_v44  ;;  %6406 = vst [vmem:[#allocation63_spill] sm:$0xff] %v5413_v11  ;;  %v5415_v0 = vpack.c.bf16 %v247_v39, %v243_v53  ;;  %v258_v44 = vld [vmem:[#allocation10 + $0x3f8] sm:$0xff]  ;;  %6409 = vst [vmem:[#allocation66_spill] sm:$0xff] %v5422_v56  ;;  %v251_v53 = vld [vmem:[#allocation10 + $0x3c0] sm:$0xff] }
  0x8f   :  { %3280 = vmatpush1.bf16.msra.mxu0 %v5404_v36  ;;  %v5424_v23 = vpack.c.bf16 %v258_v44, %v254_v38  ;;  %v255_v39 = vld [vmem:[#allocation10 + $0x3e0] sm:$0xff]  ;;  %v257_v36 = vld [vmem:[#allocation10 + $0x3f0] sm:$0xff] }
  0x90   :  { %6407 = vst [vmem:[#allocation64_spill] sm:$0xff] %v5415_v0  ;;  %3282 = vmatprep.subr.bf16.mxu0 %v5410_v57  ;;  %v5431_v40 = vpack.c.bf16 %v257_v36, %v253_v12  ;;  %v281_v44 = vld [vmem:[#allocation5] sm:$0xff]  ;;  %v284_v36 = vld [vmem:[#allocation5 + $0x18] sm:$0xff] }
  0x91   :  { %3344 = vmatpush1.bf16.msra.mxu1 %v5407_v29  ;;  %6410 = vst [vmem:[#allocation67_spill] sm:$0xff] %v5424_v23  ;;  %v5427_v29 = vpack.c.bf16 %v255_v39, %v251_v53 }
  0x92   :  { %3346 = vmatprep.subr.bf16.mxu1 %v5413_v11  ;;  %6412 = vst [vmem:[#allocation69_spill] sm:$0xff] %v5431_v40 }
  0x93   :  { %3284 = vmatpush1.bf16.msra.mxu0 %v5415_v0  ;;  %6411 = vst [vmem:[#allocation68_spill] sm:$0xff] %v5427_v29 }
  0x94   :  { %3286 = vmatprep.subr.bf16.mxu0 %v5422_v56 }
  0x95   :  { %3348 = vmatpush1.bf16.msra.mxu1 %v5419_v5  ;;  %v283_v5 = vld [vmem:[#allocation5 + $0x10] sm:$0xff] }
  0x96   :  { %3350 = vmatprep.subr.bf16.mxu1 %v5424_v23 }
  0x97   :  { %3288 = vmatpush1.bf16.msra.mxu0 %v5427_v29 }
  0x98   :  { %3354 = vmatprep.subr.bf16.mxu0 %v5144_v4 }
  0x99   :  { %3352 = vmatpush1.bf16.msra.mxu1 %v5431_v40 }
  0x9a   :  { %3386 = vmatprep.subr.bf16.mxu1 %v5157_v22 }
 0x12d   :  { %v352_v63 = vpop.f32.mrb[0].mxu0 }
 0x12e   :  { %v428_v19 = vadd.f32 %v352_v63, %v281_v44  ;;  %v354_v38 = vpop.f32.mrb[1].mxu0 }
 0x12f   :  { %v429_v53 = vadd.f32 %v354_v38, %v282_v3  ;;  %v423_v12 = vpop.f32.mrb[0].mxu1 }
 0x130   :  { %v3113_v39 = vmul.f32 -1.442695, %v428_v19  ;;  %v425_v23 = vpop.f32.mrb[1].mxu1  ;;  %v430_v0 = vadd.f32 %v423_v12, %v283_v5  ;;  %v6420_v12 = vld [vmem:[#allocation27_spill] sm:$0xff] }
 0x131   :  { %v3114_v56 = vmul.f32 -1.442695, %v429_v53  ;;  %v431_v29 = vadd.f32 %v425_v23, %v284_v36  ;;  %v6419_v36 = vld [vmem:[#allocation26_spill] sm:$0xff] }
 0x132   :  { %4706 = vpow2.f32 %v3113_v39 }
 0x133   :  { %4708 = vpow2.f32 %v3114_v56  ;;  %v3115_v40 = vmul.f32 -1.442695, %v431_v29 }
 0x135   :  { %4710 = vpow2.f32 %v3115_v40  ;;  %v6418_v40 = vld [vmem:[#allocation25_spill] sm:$0xff] }
 0x136   :  { %4712 = vtanh.f32 %v430_v0  ;;  %v6417_v0 = vld [vmem:[#allocation22_spill] sm:$0xff] }
 0x13c   :  { %v4707_v4 = vpop.eup %4706 }
 0x13d   :  { %v4709_v22 = vpop.eup %4708  ;;  %v435_v11 = vadd.f32 1.0, %v4707_v4  ;;  %v6413_v4 = vmov 0.0  }
 0x13e   :  { %v441_v57 = vadd.f32 1.0, %v4709_v22  ;;  %v6414_v22 = vld [vmem:[#allocation23_spill] sm:$0xff] }
 0x13f   :  { %4714 = vrcp.f32 %v435_v11  ;;  %v4711_v44 = vpop.eup %4710  ;;  %v6416_v11 = vld [vmem:[#allocation24_spill] sm:$0xff] }
 0x140   :  { %4716 = vrcp.f32 %v441_v57  ;;  %v4713_v3 = vpop.eup %4712  ;;  %v448_v19 = vadd.f32 1.0, %v4711_v44  ;;  %v6415_v57 = vld [vmem:[#allocation20_spill] sm:$0xff] }
 0x141   :  { %v6421_v44 = vld [vmem:[#allocation28_spill] sm:$0xff] }
 0x142   :  { %4718 = vrcp.f32 %v448_v19  ;;  %v6424_v19 = vld [vmem:[#allocation31_spill] sm:$0xff] }
 0x149   :  { %v4715_v63 = vpop.eup %4714 }
 0x14a   :  { %v4717_v38 = vpop.eup %4716  ;;  %v453_v53 = vmul.f32 %v4715_v63, %v4713_v3  ;;  %v6422_v3 = vld [vmem:[#allocation29_spill] sm:$0xff]  ;;  %v6423_v63 = vld [vmem:[#allocation30_spill] sm:$0xff] }
 0x14b   :  { %v452_v56 = vmul.f32 0.0, %v4717_v38  ;;  %v6425_v38 = vld [vmem:[#allocation32_spill] sm:$0xff] }
 0x14c   :  { %v4719_v29 = vpop.eup %4718 }
 0x14d   :  { %v5438_v39 = vadd.f32 %v453_v53, %v452_v56  ;;  %v6426_v53 = vld [vmem:[#allocation33_spill] sm:$0xff]  ;;  %v6427_v56 = vld [vmem:[#allocation34_spill] sm:$0xff] }
 0x14f   :  { %4720 = vtanh.f32 %v5438_v39 }
 0x159   :  { %v4721_v5 = vpop.eup %4720 }
 0x15a   :  { %v456_v23 = vmul.f32 %v4721_v5, %v4719_v29  ;;  %v6428_v29 = vld [vmem:[#allocation35_spill] sm:$0xff]  ;;  %v6429_v5 = vld [vmem:[#allocation36_spill] sm:$0xff] }
 0x15c   :  { %526 = vmatmul.mubr.f32.vlgmr.msra.gmra.mrb[2].mxu0 %v456_v23  ;;  %597 = vmatmul.mubr.f32.vlgmr.msra.gmra.mrb[2].mxu1 %v456_v23 }
 0x15d   :  { %3356 = vmatpush1.bf16.msra.mxu0 %v5146_v8  ;;  %3388 = vmatpush1.bf16.msra.mxu1 %v5159_v25 }
 0x15e   :  { %3358 = vmatprep.subr.bf16.mxu0 %v5148_v9  ;;  %3390 = vmatprep.subr.bf16.mxu1 %v5169_v33 }
 0x15f   :  { %701 = vmatprep.mubr.f32.mxu0 %v6413_v4  ;;  %772 = vmatprep.mubr.f32.mxu1 %v6413_v4 }
 0x161   :  { %3360 = vmatpush1.bf16.msra.mxu0 %v5152_v14  ;;  %3392 = vmatpush1.bf16.msra.mxu1 %v5171_v37 }
 0x162   :  { %3362 = vmatprep.subr.bf16.mxu0 %v5155_v17  ;;  %3394 = vmatprep.subr.bf16.mxu1 %v5177_v45 }
 0x165   :  { %3364 = vmatpush1.bf16.msra.mxu0 %v5162_v26  ;;  %3396 = vmatpush1.bf16.msra.mxu1 %v5183_v48 }
 0x166   :  { %3366 = vmatprep.subr.bf16.mxu0 %v5166_v30  ;;  %3398 = vmatprep.subr.bf16.mxu1 %v5186_v52 }
 0x169   :  { %3368 = vmatpush1.bf16.msra.mxu0 %v5175_v42  ;;  %3400 = vmatpush1.bf16.msra.mxu1 %v5195_v62 }
 0x16a   :  { %3370 = vmatprep.subr.bf16.mxu0 %v5180_v46  ;;  %3402 = vmatprep.subr.bf16.mxu1 %v5198_v1 }
 0x16d   :  { %3372 = vmatpush1.bf16.msra.mxu0 %v5189_v55  ;;  %3404 = vmatpush1.bf16.msra.mxu1 %v5207_v15 }
 0x16e   :  { %3374 = vmatprep.subr.bf16.mxu0 %v5192_v58  ;;  %3406 = vmatprep.subr.bf16.mxu1 %v5210_v18 }
 0x171   :  { %3376 = vmatpush1.bf16.msra.mxu0 %v5201_v7  ;;  %3408 = vmatpush1.bf16.msra.mxu1 %v5219_v31 }
 0x172   :  { %3378 = vmatprep.subr.bf16.mxu0 %v5204_v10  ;;  %3410 = vmatprep.subr.bf16.mxu1 %v5222_v34 }
 0x175   :  { %3380 = vmatpush1.bf16.msra.mxu0 %v5213_v24  ;;  %3412 = vmatpush1.bf16.msra.mxu1 %v5229_v43 }
 0x176   :  { %3382 = vmatprep.subr.bf16.mxu0 %v5216_v27  ;;  %3414 = vmatprep.subr.bf16.mxu1 %v5234_v51 }
 0x179   :  { %3384 = vmatpush1.bf16.msra.mxu0 %v5225_v41  ;;  %3416 = vmatpush1.bf16.msra.mxu1 %v5240_v61 }
 0x17a   :  { %3418 = vmatprep.subr.bf16.mxu0 %v5231_v47  ;;  %3482 = vmatprep.subr.bf16.mxu1 %v5246_v6 }
 0x17c   :  { %702 = vmatmul.mubr.f32.vlgmr.msra.gmra.mrb[4].mxu0 %v456_v23  ;;  %773 = vmatmul.mubr.f32.vlgmr.msra.gmra.mrb[4].mxu1 %v456_v23  ;;  %v6430_v23 = vld [vmem:[#allocation37_spill] sm:$0xff] }
 0x17d   :  { %3420 = vmatpush1.bf16.msra.mxu0 %v5237_v60  ;;  %3484 = vmatpush1.bf16.msra.mxu1 %v5254_v21 }
 0x17e   :  { %3422 = vmatprep.subr.bf16.mxu0 %v5243_v2  ;;  %3486 = vmatprep.subr.bf16.mxu1 %v5260_v35 }
 0x181   :  { %3424 = vmatpush1.bf16.msra.mxu0 %v5250_v20  ;;  %3488 = vmatpush1.bf16.msra.mxu1 %v5267_v50 }
 0x182   :  { %3426 = vmatprep.subr.bf16.mxu0 %v5257_v28  ;;  %3490 = vmatprep.subr.bf16.mxu1 %v5273_v59 }
 0x185   :  { %3428 = vmatpush1.bf16.msra.mxu0 %v5264_v49  ;;  %3492 = vmatpush1.bf16.msra.mxu1 %v5280_v16 }
 0x186   :  { %3430 = vmatprep.subr.bf16.mxu0 %v5270_v54  ;;  %3494 = vmatprep.subr.bf16.mxu1 %v5286_v32 }
 0x189   :  { %3432 = vmatpush1.bf16.msra.mxu0 %v5277_v13  ;;  %3496 = vmatpush1.bf16.msra.mxu1 %v6414_v22 }
 0x18a   :  { %3434 = vmatprep.subr.bf16.mxu0 %v6415_v57  ;;  %3498 = vmatprep.subr.bf16.mxu1 %v6416_v11 }
 0x18d   :  { %3436 = vmatpush1.bf16.msra.mxu0 %v6417_v0  ;;  %3500 = vmatpush1.bf16.msra.mxu1 %v6418_v40 }
 0x18e   :  { %3438 = vmatprep.subr.bf16.mxu0 %v6419_v36  ;;  %3502 = vmatprep.subr.bf16.mxu1 %v6420_v12  ;;  %v6431_v12 = vld [vmem:[#allocation38_spill] sm:$0xff] }
 0x191   :  { %3440 = vmatpush1.bf16.msra.mxu0 %v6421_v44  ;;  %3504 = vmatpush1.bf16.msra.mxu1 %v6422_v3  ;;  %v6432_v44 = vld [vmem:[#allocation39_spill] sm:$0xff]  ;;  %v6433_v3 = vld [vmem:[#allocation40_spill] sm:$0xff] }
 0x192   :  { %3442 = vmatprep.subr.bf16.mxu0 %v6423_v63  ;;  %3506 = vmatprep.subr.bf16.mxu1 %v6424_v19  ;;  %v6434_v63 = vld [vmem:[#allocation41_spill] sm:$0xff]  ;;  %v6435_v19 = vld [vmem:[#allocation42_spill] sm:$0xff] }
 0x195   :  { %3444 = vmatpush1.bf16.msra.mxu0 %v6425_v38  ;;  %3508 = vmatpush1.bf16.msra.mxu1 %v6426_v53  ;;  %v6436_v38 = vld [vmem:[#allocation43_spill] sm:$0xff]  ;;  %v6437_v53 = vld [vmem:[#allocation44_spill] sm:$0xff] }
 0x196   :  { %3446 = vmatprep.subr.bf16.mxu0 %v6427_v56  ;;  %3510 = vmatprep.subr.bf16.mxu1 %v6428_v29  ;;  %v6438_v56 = vld [vmem:[#allocation45_spill] sm:$0xff]  ;;  %v6439_v29 = vld [vmem:[#allocation46_spill] sm:$0xff] }
 0x199   :  { %3448 = vmatpush1.bf16.msra.mxu0 %v6429_v5  ;;  %3512 = vmatpush1.bf16.msra.mxu1 %v6430_v23  ;;  %v6440_v5 = vld [vmem:[#allocation47_spill] sm:$0xff]  ;;  %v6441_v23 = vld [vmem:[#allocation48_spill] sm:$0xff] }
 0x19a   :  { %3450 = vmatprep.subr.bf16.mxu0 %v6431_v12  ;;  %3514 = vmatprep.subr.bf16.mxu1 %v6432_v44  ;;  %v6442_v12 = vld [vmem:[#allocation49_spill] sm:$0xff]  ;;  %v6443_v44 = vld [vmem:[#allocation50_spill] sm:$0xff] }
 0x19d   :  { %3452 = vmatpush1.bf16.msra.mxu0 %v6433_v3  ;;  %3516 = vmatpush1.bf16.msra.mxu1 %v6434_v63  ;;  %v6444_v3 = vld [vmem:[#allocation51_spill] sm:$0xff]  ;;  %v6445_v63 = vld [vmem:[#allocation52_spill] sm:$0xff] }
 0x19e   :  { %3454 = vmatprep.subr.bf16.mxu0 %v6435_v19  ;;  %3518 = vmatprep.subr.bf16.mxu1 %v6436_v38  ;;  %v6446_v19 = vld [vmem:[#allocation53_spill] sm:$0xff]  ;;  %v6447_v38 = vld [vmem:[#allocation54_spill] sm:$0xff] }
 0x1a1   :  { %3456 = vmatpush1.bf16.msra.mxu0 %v6437_v53  ;;  %3520 = vmatpush1.bf16.msra.mxu1 %v6438_v56  ;;  %v6448_v53 = vld [vmem:[#allocation55_spill] sm:$0xff]  ;;  %v6449_v56 = vld [vmem:[#allocation56_spill] sm:$0xff] }
 0x1a2   :  { %3458 = vmatprep.subr.bf16.mxu0 %v6439_v29  ;;  %3522 = vmatprep.subr.bf16.mxu1 %v6440_v5  ;;  %v6450_v29 = vld [vmem:[#allocation57_spill] sm:$0xff]  ;;  %v6451_v5 = vld [vmem:[#allocation58_spill] sm:$0xff] }
 0x1a5   :  { %3460 = vmatpush1.bf16.msra.mxu0 %v6441_v23  ;;  %3524 = vmatpush1.bf16.msra.mxu1 %v6442_v12  ;;  %v6452_v23 = vld [vmem:[#allocation59_spill] sm:$0xff]  ;;  %v6453_v12 = vld [vmem:[#allocation60_spill] sm:$0xff] }
 0x1a6   :  { %3462 = vmatprep.subr.bf16.mxu0 %v6443_v44  ;;  %3526 = vmatprep.subr.bf16.mxu1 %v6444_v3  ;;  %v6454_v44 = vld [vmem:[#allocation61_spill] sm:$0xff]  ;;  %v6455_v3 = vld [vmem:[#allocation62_spill] sm:$0xff] }
 0x1a9   :  { %3464 = vmatpush1.bf16.msra.mxu0 %v6445_v63  ;;  %3528 = vmatpush1.bf16.msra.mxu1 %v6446_v19  ;;  %v6456_v63 = vld [vmem:[#allocation63_spill] sm:$0xff]  ;;  %v6457_v19 = vld [vmem:[#allocation64_spill] sm:$0xff] }
 0x1aa   :  { %3466 = vmatprep.subr.bf16.mxu0 %v6447_v38  ;;  %3530 = vmatprep.subr.bf16.mxu1 %v6448_v53  ;;  %v6458_v38 = vld [vmem:[#allocation65_spill] sm:$0xff]  ;;  %v6459_v53 = vld [vmem:[#allocation66_spill] sm:$0xff] }
 0x1ad   :  { %3468 = vmatpush1.bf16.msra.mxu0 %v6449_v56  ;;  %3532 = vmatpush1.bf16.msra.mxu1 %v6450_v29  ;;  %v6460_v56 = vld [vmem:[#allocation67_spill] sm:$0xff]  ;;  %v6461_v29 = vld [vmem:[#allocation68_spill] sm:$0xff] }
 0x1ae   :  { %3470 = vmatprep.subr.bf16.mxu0 %v6451_v5  ;;  %3534 = vmatprep.subr.bf16.mxu1 %v6452_v23  ;;  %v6462_v5 = vld [vmem:[#allocation69_spill] sm:$0xff]  ;;  %v6463_v23 = vld [vmem:[#allocation15_spill] sm:$0xff] }
 0x1b1   :  { %3472 = vmatpush1.bf16.msra.mxu0 %v6453_v12  ;;  %3536 = vmatpush1.bf16.msra.mxu1 %v6454_v44  ;;  %v6464_v12 = vld [vmem:[#allocation16_spill] sm:$0xff]  ;;  %v261_v44 = vlaneseq }
 0x1b2   :  { %3474 = vmatprep.subr.bf16.mxu0 %v6455_v3  ;;  %3538 = vmatprep.subr.bf16.mxu1 %v6456_v63 }
 0x1b3   :  { %v262_v3 = vshrl.u32 %v261_v44, 7 }
 0x1b5   :  { %3476 = vmatpush1.bf16.msra.mxu0 %v6457_v19  ;;  %3540 = vmatpush1.bf16.msra.mxu1 %v6458_v38  ;;  %v263_v36 = vsub.s32 0, %v262_v3  ;;  %v259_v19 = vld [vmem:[%s6236_s3] sm:$0xf]  ;;  %v267_v38 = vsub.s32 1, %v262_v3  ;;  %v275_v40 = vsub.s32 3, %v262_v3  ;;  %v271_v22 = vsub.s32 2, %v262_v3 }
 0x1b6   :  { %3478 = vmatprep.subr.bf16.mxu0 %v6459_v53  ;;  %3542 = vmatprep.subr.bf16.mxu1 %v6460_v56  ;;  %s5062_s3 = smov [#allocation11]  }
 0x1b7   :  { %v5542_v63 = vrot.slane %v259_v19, %v263_v36  ;;  %v5544_v53 = vrot.slane %v259_v19, %v267_v38  ;;  %v5548_v57 = vrot.slane %v259_v19, %v275_v40  ;;  %v5551_v38 = vrot.slane %v259_v19, %v271_v22  ;;  %v632_v22 = vld [vmem:[#allocation5 + $0x20] sm:$0xff]  ;;  %v633_v19 = vld [vmem:[#allocation5 + $0x28] sm:$0xff]  ;;  %s3100_s26 = sshll.u32 %s5062_s3, 4  ;;  %s3101_s26 = int_to_ptr.vmem [resolvable:$true] %s3100_s26 }
 0x1b8   :  { %s5028_s27 = scalar_lea.vmem %s3101_s26, 1024  ;;  %p5033_p11 = scmp.lt.s32.totalorder %s3101_s26, %s3101_s26 }
 0x1b9   :  { %3480 = vmatpush1.bf16.msra.mxu0 %v6461_v29  ;;  %3544 = vmatpush1.bf16.msra.mxu1 %v6462_v5  ;;  %6465 = vst [vmem:[#allocation70_spill] sm:$0xff] %v5542_v63  ;;  %6466 = vst [vmem:[#allocation71_spill] sm:$0xff] %v5544_v53  ;;  %p5029_p10 = scmp.ne.s32.totalorder %s3101_s26, %s5028_s27  ;;  %p5034_p12 = scmp.lt.s32.totalorder %s5028_s27, %s5028_s27 }
 0x1ba   :  { %3546 = vmatprep.subr.bf16.mxu0 %v6463_v23  ;;  %3578 = vmatprep.subr.bf16.mxu1 %v6464_v12  ;;  %6467 = vst [vmem:[#allocation72_spill] sm:$0xff] %v5548_v57  ;;  %6468 = vst [vmem:[#allocation73_spill] sm:$0xff] %v5551_v38 }
 0x1bb   :  { %p5035_p13 = por %p5034_p12, %p5033_p11 }
 0x1bd   :  { %p5036_p0 = pnand %p5035_p13, %p5029_p10 }
 0x22f   :  { %v527_v56 = vpop.f32.mrb[2].mxu0  ;;  %v598_v29 = vpop.f32.mrb[2].mxu1 }
 0x230   :  { %v528_v5 = vadd.f32 %v527_v56, %v5542_v63  ;;  %v529_v23 = vpop.f32.mrb[3].mxu0  ;;  %v600_v0 = vpop.f32.mrb[3].mxu1  ;;  %v599_v32 = vadd.f32 %v598_v29, %v5551_v38 }
 0x231   :  { %v530_v12 = vadd.f32 %v529_v23, %v5544_v53  ;;  %v601_v36 = vadd.f32 %v600_v0, %v5548_v57  ;;  %v635_v57 = vld [vmem:[#allocation5 + $0x38] sm:$0xff] }
 0x232   :  { %v3116_v44 = vmul.f32 -1.442695, %v528_v5 }
 0x233   :  { %v3117_v11 = vmul.f32 -1.442695, %v530_v12  ;;  %v3118_v13 = vmul.f32 -1.442695, %v601_v36 }
 0x234   :  { %4722 = vpow2.f32 %v3116_v44 }
 0x235   :  { %4724 = vpow2.f32 %v3117_v11 }
 0x236   :  { %4726 = vpow2.f32 %v3118_v13 }
 0x237   :  { %4728 = vtanh.f32 %v599_v32 }
 0x23e   :  { %v4723_v54 = vpop.eup %4722 }
 0x23f   :  { %v4725_v56 = vpop.eup %4724  ;;  %v606_v63 = vadd.f32 1.0, %v4723_v54 }
 0x240   :  { %v612_v23 = vadd.f32 1.0, %v4725_v56  ;;  %v4727_v40 = vpop.eup %4726 }
 0x241   :  { %4730 = vrcp.f32 %v606_v63  ;;  %v4729_v12 = vpop.eup %4728  ;;  %v619_v44 = vadd.f32 1.0, %v4727_v40 }
 0x242   :  { %4732 = vrcp.f32 %v612_v23 }
 0x243   :  { %4734 = vrcp.f32 %v619_v44 }
 0x24b   :  { %v4731_v5 = vpop.eup %4730 }
 0x24c   :  { %v4733_v3 = vpop.eup %4732  ;;  %v624_v11 = vmul.f32 %v4731_v5, %v4729_v12  ;;  %v634_v12 = vld [vmem:[#allocation5 + $0x30] sm:$0xff] }
 0x24d   :  { %v623_v0 = vmul.f32 0.0, %v4733_v3  ;;  %v4735_v5 = vpop.eup %4734 }
 0x24f   :  { %v5554_v36 = vadd.f32 %v624_v11, %v623_v0  ;;  %v703_v29 = vpop.f32.mrb[4].mxu0  ;;  %v774_v38 = vpop.f32.mrb[4].mxu1 }
 0x250   :  { %v779_v54 = vadd.f32 %v703_v29, %v632_v22  ;;  %v705_v13 = vpop.f32.mrb[5].mxu0  ;;  %v776_v32 = vpop.f32.mrb[5].mxu1  ;;  %v781_v0 = vadd.f32 %v774_v38, %v634_v12  ;;  %v6471_v12 = vld [vmem:[#allocation21_spill] sm:$0xff] }
 0x251   :  { %4736 = vtanh.f32 %v5554_v36  ;;  %v780_v63 = vadd.f32 %v705_v13, %v633_v19  ;;  %v782_v40 = vadd.f32 %v776_v32, %v635_v57 }
 0x252   :  { %v3119_v56 = vmul.f32 -1.442695, %v779_v54 }
 0x253   :  { %v3120_v23 = vmul.f32 -1.442695, %v780_v63  ;;  %v3121_v11 = vmul.f32 -1.442695, %v782_v40  ;;  %v6470_v40 = vld [vmem:[#allocation17_spill] sm:$0xff] }
 0x254   :  { %4738 = vpow2.f32 %v3119_v56 }
 0x255   :  { %4740 = vpow2.f32 %v3120_v23 }
 0x256   :  { %4742 = vpow2.f32 %v3121_v11  ;;  %v6474_v11 = vld [vmem:[#allocation20_spill] sm:$0xff] }
 0x257   :  { %4744 = vtanh.f32 %v781_v0  ;;  %v6475_v0 = vld [vmem:[#allocation24_spill] sm:$0xff] }
 0x25b   :  { %v4737_v3 = vpop.eup %4736 }
 0x25c   :  { %v627_v53 = vmul.f32 %v4737_v3, %v4735_v5  ;;  %v6472_v5 = vld [vmem:[#allocation18_spill] sm:$0xff]  ;;  %v6473_v3 = vld [vmem:[#allocation23_spill] sm:$0xff] }
 0x25e   :  { %v4739_v16 = vpop.eup %4738  ;;  %630 = vst [vmem:[#allocation11] sm:$0xff] %v627_v53  ;;  %876 = vmatprep.mubr.f32.mxu0 %v627_v53  ;;  %947 = vmatprep.mubr.f32.mxu1 %v627_v53 }
 0x25f   :  { %v4741_v44 = vpop.eup %4740  ;;  %v786_v22 = vadd.f32 1.0, %v4739_v16 }
 0x260   :  { %v792_v19 = vadd.f32 1.0, %v4741_v44  ;;  %v4743_v29 = vpop.eup %4742  ;;  %v6476_v44 = vld [vmem:[#allocation22_spill] sm:$0xff] }
 0x261   :  { %4746 = vrcp.f32 %v786_v22  ;;  %v4745_v54 = vpop.eup %4744  ;;  %v799_v63 = vadd.f32 1.0, %v4743_v29  ;;  %v6477_v22 = vld [vmem:[#allocation25_spill] sm:$0xff]  ;;  %v6479_v29 = vld [vmem:[#allocation27_spill] sm:$0xff] }
 0x262   :  { %4748 = vrcp.f32 %v792_v19  ;;  %v6478_v19 = vld [vmem:[#allocation26_spill] sm:$0xff] }
 0x263   :  { %4750 = vrcp.f32 %v799_v63  ;;  %v6484_v63 = vld [vmem:[#allocation32_spill] sm:$0xff] }
 0x26b   :  { %v4747_v57 = vpop.eup %4746 }
 0x26c   :  { %v4749_v13 = vpop.eup %4748  ;;  %v804_v32 = vmul.f32 %v4747_v57, %v4745_v54  ;;  %v6480_v54 = vld [vmem:[#allocation28_spill] sm:$0xff]  ;;  %v6481_v57 = vld [vmem:[#allocation29_spill] sm:$0xff] }
 0x26d   :  { %v803_v38 = vmul.f32 %v4749_v13, %v5438_v39  ;;  %v4751_v53 = vpop.eup %4750  ;;  %v6469_v39 = vld [vmem:[#allocation19_spill] sm:$0xff]  ;;  %v6482_v13 = vld [vmem:[#allocation30_spill] sm:$0xff] }
 0x26f   :  { %v5558_v56 = vadd.f32 %v804_v32, %v803_v38  ;;  %v6483_v32 = vld [vmem:[#allocation31_spill] sm:$0xff]  ;;  %v6485_v38 = vld [vmem:[#allocation33_spill] sm:$0xff] }
 0x271   :  { %4752 = vtanh.f32 %v5558_v56 }
 0x27b   :  { %v4753_v16 = vpop.eup %4752 }
 0x27c   :  { %v807_v23 = vmul.f32 %v4753_v16, %v4751_v53  ;;  %v6486_v53 = vld [vmem:[#allocation34_spill] sm:$0xff]  ;;  %v6487_v16 = vld [vmem:[#allocation35_spill] sm:$0xff] }
 0x27e   :  { %877 = vmatmul.mubr.f32.vlgmr.msra.gmra.mrb[6].mxu0 %v807_v23  ;;  %948 = vmatmul.mubr.f32.vlgmr.msra.gmra.mrb[6].mxu1 %v807_v23 }
 0x27f   :  { %3548 = vmatpush1.bf16.msra.mxu0 %v5146_v8  ;;  %3580 = vmatpush1.bf16.msra.mxu1 %v5159_v25 }
 0x280   :  { %3550 = vmatprep.subr.bf16.mxu0 %v5148_v9  ;;  %3582 = vmatprep.subr.bf16.mxu1 %v5169_v33 }
 0x281   :  { %1053 = vmatprep.mubr.f32.mxu0 %v6413_v4  ;;  %1124 = vmatprep.mubr.f32.mxu1 %v6413_v4 }
 0x283   :  { %3552 = vmatpush1.bf16.msra.mxu0 %v5152_v14  ;;  %3584 = vmatpush1.bf16.msra.mxu1 %v5171_v37 }
 0x284   :  { %3554 = vmatprep.subr.bf16.mxu0 %v5155_v17  ;;  %3586 = vmatprep.subr.bf16.mxu1 %v5177_v45 }
 0x287   :  { %3556 = vmatpush1.bf16.msra.mxu0 %v5162_v26  ;;  %3588 = vmatpush1.bf16.msra.mxu1 %v5183_v48 }
 0x288   :  { %3558 = vmatprep.subr.bf16.mxu0 %v5166_v30  ;;  %3590 = vmatprep.subr.bf16.mxu1 %v5186_v52 }
 0x28b   :  { %3560 = vmatpush1.bf16.msra.mxu0 %v5175_v42  ;;  %3592 = vmatpush1.bf16.msra.mxu1 %v5195_v62 }
 0x28c   :  { %3562 = vmatprep.subr.bf16.mxu0 %v5180_v46  ;;  %3594 = vmatprep.subr.bf16.mxu1 %v5198_v1 }
 0x28f   :  { %3564 = vmatpush1.bf16.msra.mxu0 %v5189_v55  ;;  %3596 = vmatpush1.bf16.msra.mxu1 %v5207_v15 }
 0x290   :  { %3566 = vmatprep.subr.bf16.mxu0 %v5192_v58  ;;  %3598 = vmatprep.subr.bf16.mxu1 %v5210_v18 }
 0x293   :  { %3568 = vmatpush1.bf16.msra.mxu0 %v5201_v7  ;;  %3600 = vmatpush1.bf16.msra.mxu1 %v5219_v31 }
 0x294   :  { %3570 = vmatprep.subr.bf16.mxu0 %v5204_v10  ;;  %3602 = vmatprep.subr.bf16.mxu1 %v5222_v34 }
 0x297   :  { %3572 = vmatpush1.bf16.msra.mxu0 %v5213_v24  ;;  %3604 = vmatpush1.bf16.msra.mxu1 %v5229_v43 }
 0x298   :  { %3574 = vmatprep.subr.bf16.mxu0 %v5216_v27  ;;  %3606 = vmatprep.subr.bf16.mxu1 %v5234_v51 }
 0x29b   :  { %3576 = vmatpush1.bf16.msra.mxu0 %v5225_v41  ;;  %3608 = vmatpush1.bf16.msra.mxu1 %v5240_v61 }
 0x29c   :  { %3610 = vmatprep.subr.bf16.mxu0 %v5231_v47  ;;  %3674 = vmatprep.subr.bf16.mxu1 %v5246_v6 }
 0x29e   :  { %1054 = vmatmul.mubr.f32.vlgmr.msra.gmra.mrb[8].mxu0 %v807_v23  ;;  %1125 = vmatmul.mubr.f32.vlgmr.msra.gmra.mrb[8].mxu1 %v807_v23  ;;  %v6488_v23 = vld [vmem:[#allocation36_spill] sm:$0xff] }
 0x29f   :  { %3612 = vmatpush1.bf16.msra.mxu0 %v5237_v60  ;;  %3676 = vmatpush1.bf16.msra.mxu1 %v5254_v21 }
 0x2a0   :  { %3614 = vmatprep.subr.bf16.mxu0 %v5243_v2  ;;  %3678 = vmatprep.subr.bf16.mxu1 %v5260_v35 }
 0x2a3   :  { %3616 = vmatpush1.bf16.msra.mxu0 %v5250_v20  ;;  %3680 = vmatpush1.bf16.msra.mxu1 %v5267_v50 }
 0x2a4   :  { %3618 = vmatprep.subr.bf16.mxu0 %v5257_v28  ;;  %3682 = vmatprep.subr.bf16.mxu1 %v5273_v59 }
 0x2a7   :  { %3620 = vmatpush1.bf16.msra.mxu0 %v5264_v49  ;;  %3684 = vmatpush1.bf16.msra.mxu1 %v6469_v39 }
 0x2a8   :  { %3622 = vmatprep.subr.bf16.mxu0 %v6470_v40  ;;  %3686 = vmatprep.subr.bf16.mxu1 %v6471_v12 }
 0x2ab   :  { %3624 = vmatpush1.bf16.msra.mxu0 %v6472_v5  ;;  %3688 = vmatpush1.bf16.msra.mxu1 %v6473_v3 }
 0x2ac   :  { %3626 = vmatprep.subr.bf16.mxu0 %v6474_v11  ;;  %3690 = vmatprep.subr.bf16.mxu1 %v6475_v0  ;;  %v6525_v0 = vld [vmem:[#allocation71_spill] sm:$0xff] }
 0x2af   :  { %3628 = vmatpush1.bf16.msra.mxu0 %v6476_v44  ;;  %3692 = vmatpush1.bf16.msra.mxu1 %v6477_v22  ;;  %v6524_v22 = vld [vmem:[#allocation70_spill] sm:$0xff] }
 0x2b0   :  { %3630 = vmatprep.subr.bf16.mxu0 %v6478_v19  ;;  %3694 = vmatprep.subr.bf16.mxu1 %v6479_v29  ;;  %v6489_v19 = vld [vmem:[#allocation37_spill] sm:$0xff]  ;;  %v6490_v29 = vld [vmem:[#allocation38_spill] sm:$0xff] }
 0x2b3   :  { %3632 = vmatpush1.bf16.msra.mxu0 %v6480_v54  ;;  %3696 = vmatpush1.bf16.msra.mxu1 %v6481_v57  ;;  %v6491_v54 = vld [vmem:[#allocation39_spill] sm:$0xff]  ;;  %v6492_v57 = vld [vmem:[#allocation40_spill] sm:$0xff] }
 0x2b4   :  { %3634 = vmatprep.subr.bf16.mxu0 %v6482_v13  ;;  %3698 = vmatprep.subr.bf16.mxu1 %v6483_v32  ;;  %v6493_v13 = vld [vmem:[#allocation41_spill] sm:$0xff]  ;;  %v6494_v32 = vld [vmem:[#allocation42_spill] sm:$0xff] }
 0x2b7   :  { %3636 = vmatpush1.bf16.msra.mxu0 %v6484_v63  ;;  %3700 = vmatpush1.bf16.msra.mxu1 %v6485_v38  ;;  %v6495_v63 = vld [vmem:[#allocation43_spill] sm:$0xff]  ;;  %v6496_v38 = vld [vmem:[#allocation44_spill] sm:$0xff] }
 0x2b8   :  { %3638 = vmatprep.subr.bf16.mxu0 %v6486_v53  ;;  %3702 = vmatprep.subr.bf16.mxu1 %v6487_v16  ;;  %v6497_v53 = vld [vmem:[#allocation45_spill] sm:$0xff]  ;;  %v6498_v16 = vld [vmem:[#allocation46_spill] sm:$0xff] }
 0x2bb   :  { %3640 = vmatpush1.bf16.msra.mxu0 %v6488_v23  ;;  %3704 = vmatpush1.bf16.msra.mxu1 %v6489_v19  ;;  %v6499_v23 = vld [vmem:[#allocation47_spill] sm:$0xff]  ;;  %v6500_v19 = vld [vmem:[#allocation48_spill] sm:$0xff] }
 0x2bc   :  { %3642 = vmatprep.subr.bf16.mxu0 %v6490_v29  ;;  %3706 = vmatprep.subr.bf16.mxu1 %v6491_v54  ;;  %v6501_v29 = vld [vmem:[#allocation49_spill] sm:$0xff]  ;;  %v6502_v54 = vld [vmem:[#allocation50_spill] sm:$0xff] }
 0x2bf   :  { %3644 = vmatpush1.bf16.msra.mxu0 %v6492_v57  ;;  %3708 = vmatpush1.bf16.msra.mxu1 %v6493_v13  ;;  %v6503_v57 = vld [vmem:[#allocation51_spill] sm:$0xff]  ;;  %v6504_v13 = vld [vmem:[#allocation52_spill] sm:$0xff] }
 0x2c0   :  { %3646 = vmatprep.subr.bf16.mxu0 %v6494_v32  ;;  %3710 = vmatprep.subr.bf16.mxu1 %v6495_v63  ;;  %v6505_v32 = vld [vmem:[#allocation53_spill] sm:$0xff]  ;;  %v6506_v63 = vld [vmem:[#allocation54_spill] sm:$0xff] }
 0x2c3   :  { %3648 = vmatpush1.bf16.msra.mxu0 %v6496_v38  ;;  %3712 = vmatpush1.bf16.msra.mxu1 %v6497_v53  ;;  %v6507_v38 = vld [vmem:[#allocation55_spill] sm:$0xff]  ;;  %v6508_v53 = vld [vmem:[#allocation56_spill] sm:$0xff] }
 0x2c4   :  { %3650 = vmatprep.subr.bf16.mxu0 %v6498_v16  ;;  %3714 = vmatprep.subr.bf16.mxu1 %v6499_v23  ;;  %v6509_v16 = vld [vmem:[#allocation57_spill] sm:$0xff]  ;;  %v6510_v23 = vld [vmem:[#allocation58_spill] sm:$0xff] }
 0x2c7   :  { %3652 = vmatpush1.bf16.msra.mxu0 %v6500_v19  ;;  %3716 = vmatpush1.bf16.msra.mxu1 %v6501_v29  ;;  %v6511_v19 = vld [vmem:[#allocation59_spill] sm:$0xff]  ;;  %v6512_v29 = vld [vmem:[#allocation60_spill] sm:$0xff] }
 0x2c8   :  { %3654 = vmatprep.subr.bf16.mxu0 %v6502_v54  ;;  %3718 = vmatprep.subr.bf16.mxu1 %v6503_v57  ;;  %v6513_v54 = vld [vmem:[#allocation61_spill] sm:$0xff]  ;;  %v6514_v57 = vld [vmem:[#allocation62_spill] sm:$0xff] }
 0x2cb   :  { %3656 = vmatpush1.bf16.msra.mxu0 %v6504_v13  ;;  %3720 = vmatpush1.bf16.msra.mxu1 %v6505_v32  ;;  %v6515_v13 = vld [vmem:[#allocation63_spill] sm:$0xff]  ;;  %v6516_v32 = vld [vmem:[#allocation64_spill] sm:$0xff] }
 0x2cc   :  { %3658 = vmatprep.subr.bf16.mxu0 %v6506_v63  ;;  %3722 = vmatprep.subr.bf16.mxu1 %v6507_v38  ;;  %v6517_v63 = vld [vmem:[#allocation65_spill] sm:$0xff]  ;;  %v6518_v38 = vld [vmem:[#allocation66_spill] sm:$0xff] }
 0x2cf   :  { %3660 = vmatpush1.bf16.msra.mxu0 %v6508_v53  ;;  %3724 = vmatpush1.bf16.msra.mxu1 %v6509_v16  ;;  %v6519_v53 = vld [vmem:[#allocation67_spill] sm:$0xff]  ;;  %v6520_v16 = vld [vmem:[#allocation68_spill] sm:$0xff] }
 0x2d0   :  { %3662 = vmatprep.subr.bf16.mxu0 %v6510_v23  ;;  %3726 = vmatprep.subr.bf16.mxu1 %v6511_v19  ;;  %v6521_v23 = vld [vmem:[#allocation69_spill] sm:$0xff]  ;;  %v6522_v19 = vld [vmem:[#allocation15_spill] sm:$0xff] }
 0x2d3   :  { %3664 = vmatpush1.bf16.msra.mxu0 %v6512_v29  ;;  %3728 = vmatpush1.bf16.msra.mxu1 %v6513_v54  ;;  %v6523_v29 = vld [vmem:[#allocation16_spill] sm:$0xff] }
 0x2d4   :  { %3666 = vmatprep.subr.bf16.mxu0 %v6514_v57  ;;  %3730 = vmatprep.subr.bf16.mxu1 %v6515_v13 }
 0x2d7   :  { %3668 = vmatpush1.bf16.msra.mxu0 %v6516_v32  ;;  %3732 = vmatpush1.bf16.msra.mxu1 %v6517_v63 }
 0x2d8   :  { %3670 = vmatprep.subr.bf16.mxu0 %v6518_v38  ;;  %3734 = vmatprep.subr.bf16.mxu1 %v6519_v53  ;;  %v6526_v53 = vld [vmem:[#allocation72_spill] sm:$0xff] }
 0x2db   :  { %3672 = vmatpush1.bf16.msra.mxu0 %v6520_v16  ;;  %3736 = vmatpush1.bf16.msra.mxu1 %v6521_v23  ;;  %v6527_v23 = vld [vmem:[#allocation73_spill] sm:$0xff] }
 0x2dc   :  { %3738 = vmatprep.subr.bf16.mxu0 %v6522_v19  ;;  %3770 = vmatprep.subr.bf16.mxu1 %v6523_v29 }
 0x351   :  { %v878_v54 = vpop.f32.mrb[6].mxu0  ;;  %v949_v57 = vpop.f32.mrb[6].mxu1 }
 0x352   :  { %v879_v13 = vadd.f32 %v878_v54, %v6524_v22  ;;  %v880_v44 = vpop.f32.mrb[7].mxu0  ;;  %v951_v32 = vpop.f32.mrb[7].mxu1  ;;  %v950_v5 = vadd.f32 %v949_v57, %v6527_v23 }
 0x353   :  { %v881_v63 = vadd.f32 %v880_v44, %v6525_v0  ;;  %v952_v16 = vadd.f32 %v951_v32, %v6526_v53  ;;  %v984_v32 = vld [vmem:[#allocation5 + $0x40] sm:$0xff] }
 0x354   :  { %v3122_v11 = vmul.f32 -1.442695, %v879_v13 }
 0x355   :  { %v3123_v38 = vmul.f32 -1.442695, %v881_v63  ;;  %v3124_v3 = vmul.f32 -1.442695, %v952_v16  ;;  %v985_v16 = vld [vmem:[#allocation5 + $0x48] sm:$0xff] }
 0x356   :  { %4754 = vpow2.f32 %v3122_v11 }
 0x357   :  { %4756 = vpow2.f32 %v3123_v38 }
 0x358   :  { %4758 = vpow2.f32 %v3124_v3 }
 0x359   :  { %4760 = vtanh.f32 %v950_v5 }
 0x360   :  { %v4755_v19 = vpop.eup %4754 }
 0x361   :  { %v4757_v12 = vpop.eup %4756  ;;  %v957_v29 = vadd.f32 1.0, %v4755_v19 }
 0x362   :  { %v963_v40 = vadd.f32 1.0, %v4757_v12  ;;  %v4759_v54 = vpop.eup %4758 }
 0x363   :  { %4762 = vrcp.f32 %v957_v29  ;;  %v4761_v22 = vpop.eup %4760  ;;  %v970_v11 = vadd.f32 1.0, %v4759_v54 }
 0x364   :  { %4764 = vrcp.f32 %v963_v40 }
 0x365   :  { %4766 = vrcp.f32 %v970_v11 }
 0x36d   :  { %v4763_v44 = vpop.eup %4762 }
 0x36e   :  { %v4765_v13 = vpop.eup %4764  ;;  %v975_v63 = vmul.f32 %v4763_v44, %v4761_v22  ;;  %v987_v22 = vld [vmem:[#allocation5 + $0x58] sm:$0xff] }
 0x36f   :  { %v974_v38 = vmul.f32 %v4765_v13, %v5554_v36  ;;  %v986_v36 = vld [vmem:[#allocation5 + $0x50] sm:$0xff]  ;;  %v4767_v44 = vpop.eup %4766 }
 0x371   :  { %v1055_v53 = vpop.f32.mrb[8].mxu0  ;;  %v1126_v57 = vpop.f32.mrb[8].mxu1  ;;  %v5664_v23 = vadd.f32 %v975_v63, %v974_v38 }
 0x372   :  { %v1131_v3 = vadd.f32 %v1055_v53, %v984_v32  ;;  %v1057_v5 = vpop.f32.mrb[9].mxu0  ;;  %v1128_v12 = vpop.f32.mrb[9].mxu1  ;;  %v1133_v39 = vadd.f32 %v1126_v57, %v986_v36  ;;  %v6530_v36 = vld [vmem:[#allocation21_spill] sm:$0xff] }
 0x373   :  { %v1132_v19 = vadd.f32 %v1057_v5, %v985_v16  ;;  %4768 = vtanh.f32 %v5664_v23  ;;  %v1134_v54 = vadd.f32 %v1128_v12, %v987_v22 }
 0x374   :  { %v3125_v40 = vmul.f32 -1.442695, %v1131_v3 }
 0x375   :  { %v3126_v29 = vmul.f32 -1.442695, %v1132_v19  ;;  %v3127_v0 = vmul.f32 -1.442695, %v1134_v54 }
 0x376   :  { %4770 = vpow2.f32 %v3125_v40 }
 0x377   :  { %4772 = vpow2.f32 %v3126_v29 }
 0x378   :  { %4774 = vpow2.f32 %v3127_v0 }
 0x379   :  { %4776 = vtanh.f32 %v1133_v39  ;;  %v6529_v39 = vld [vmem:[#allocation17_spill] sm:$0xff] }
 0x37d   :  { %v4769_v13 = vpop.eup %4768 }
 0x37e   :  { %v978_v63 = vmul.f32 %v4769_v13, %v4767_v44  ;;  %v6531_v44 = vld [vmem:[#allocation18_spill] sm:$0xff]  ;;  %v6532_v13 = vld [vmem:[#allocation23_spill] sm:$0xff] }
 0x380   :  { %v4771_v38 = vpop.eup %4770  ;;  %982 = vst [vmem:[#allocation11 + $0x8] sm:$0xff] %v978_v63  ;;  %1228 = vmatprep.mubr.f32.mxu0 %v978_v63  ;;  %1299 = vmatprep.mubr.f32.mxu1 %v978_v63  ;;  %v6533_v63 = vld [vmem:[#allocation20_spill] sm:$0xff] }
 0x381   :  { %v4773_v53 = vpop.eup %4772  ;;  %v1138_v11 = vadd.f32 1.0, %v4771_v38  ;;  %v6534_v38 = vld [vmem:[#allocation24_spill] sm:$0xff] }
 0x382   :  { %v1144_v32 = vadd.f32 1.0, %v4773_v53  ;;  %v4775_v16 = vpop.eup %4774  ;;  %v6535_v53 = vld [vmem:[#allocation22_spill] sm:$0xff] }
 0x383   :  { %4778 = vrcp.f32 %v1138_v11  ;;  %v4777_v3 = vpop.eup %4776  ;;  %v1151_v40 = vadd.f32 1.0, %v4775_v16  ;;  %v6536_v11 = vld [vmem:[#allocation25_spill] sm:$0xff]  ;;  %v6538_v16 = vld [vmem:[#allocation27_spill] sm:$0xff] }
 0x384   :  { %4780 = vrcp.f32 %v1144_v32  ;;  %v6537_v32 = vld [vmem:[#allocation26_spill] sm:$0xff] }
 0x385   :  { %4782 = vrcp.f32 %v1151_v40  ;;  %v6543_v40 = vld [vmem:[#allocation32_spill] sm:$0xff] }
 0x38d   :  { %v4779_v5 = vpop.eup %4778 }
 0x38e   :  { %v4781_v12 = vpop.eup %4780  ;;  %v1156_v19 = vmul.f32 %v4779_v5, %v4777_v3  ;;  %v6539_v3 = vld [vmem:[#allocation28_spill] sm:$0xff]  ;;  %v6540_v5 = vld [vmem:[#allocation29_spill] sm:$0xff] }
 0x38f   :  { %v1155_v57 = vmul.f32 %v4781_v12, %v5558_v56  ;;  %v4783_v22 = vpop.eup %4782  ;;  %v6528_v56 = vld [vmem:[#allocation19_spill] sm:$0xff]  ;;  %v6541_v12 = vld [vmem:[#allocation30_spill] sm:$0xff] }
 0x391   :  { %v5668_v29 = vadd.f32 %v1156_v19, %v1155_v57  ;;  %v6542_v19 = vld [vmem:[#allocation31_spill] sm:$0xff]  ;;  %v6544_v57 = vld [vmem:[#allocation33_spill] sm:$0xff] }
 0x393   :  { %4784 = vtanh.f32 %v5668_v29 }
 0x39d   :  { %v4785_v54 = vpop.eup %4784 }
 0x39e   :  { %v1159_v0 = vmul.f32 %v4785_v54, %v4783_v22  ;;  %v6545_v22 = vld [vmem:[#allocation34_spill] sm:$0xff]  ;;  %v6546_v54 = vld [vmem:[#allocation35_spill] sm:$0xff] }
 0x3a0   :  { %1229 = vmatmul.mubr.f32.vlgmr.msra.gmra.mrb[10].mxu0 %v1159_v0  ;;  %1300 = vmatmul.mubr.f32.vlgmr.msra.gmra.mrb[10].mxu1 %v1159_v0 }
 0x3a1   :  { %3740 = vmatpush1.bf16.msra.mxu0 %v5146_v8  ;;  %3772 = vmatpush1.bf16.msra.mxu1 %v5159_v25 }
 0x3a2   :  { %3742 = vmatprep.subr.bf16.mxu0 %v5148_v9  ;;  %3774 = vmatprep.subr.bf16.mxu1 %v5169_v33 }
 0x3a3   :  { %1405 = vmatprep.mubr.f32.mxu0 %v6413_v4  ;;  %1476 = vmatprep.mubr.f32.mxu1 %v6413_v4 }
 0x3a5   :  { %3744 = vmatpush1.bf16.msra.mxu0 %v5152_v14  ;;  %3776 = vmatpush1.bf16.msra.mxu1 %v5171_v37 }
 0x3a6   :  { %3746 = vmatprep.subr.bf16.mxu0 %v5155_v17  ;;  %3778 = vmatprep.subr.bf16.mxu1 %v5177_v45 }
 0x3a9   :  { %3748 = vmatpush1.bf16.msra.mxu0 %v5162_v26  ;;  %3780 = vmatpush1.bf16.msra.mxu1 %v5183_v48 }
 0x3aa   :  { %3750 = vmatprep.subr.bf16.mxu0 %v5166_v30  ;;  %3782 = vmatprep.subr.bf16.mxu1 %v5186_v52 }
 0x3ad   :  { %3752 = vmatpush1.bf16.msra.mxu0 %v5175_v42  ;;  %3784 = vmatpush1.bf16.msra.mxu1 %v5195_v62 }
 0x3ae   :  { %3754 = vmatprep.subr.bf16.mxu0 %v5180_v46  ;;  %3786 = vmatprep.subr.bf16.mxu1 %v5198_v1 }
 0x3b1   :  { %3756 = vmatpush1.bf16.msra.mxu0 %v5189_v55  ;;  %3788 = vmatpush1.bf16.msra.mxu1 %v5207_v15 }
 0x3b2   :  { %3758 = vmatprep.subr.bf16.mxu0 %v5192_v58  ;;  %3790 = vmatprep.subr.bf16.mxu1 %v5210_v18 }
 0x3b5   :  { %3760 = vmatpush1.bf16.msra.mxu0 %v5201_v7  ;;  %3792 = vmatpush1.bf16.msra.mxu1 %v5219_v31 }
 0x3b6   :  { %3762 = vmatprep.subr.bf16.mxu0 %v5204_v10  ;;  %3794 = vmatprep.subr.bf16.mxu1 %v5222_v34 }
 0x3b9   :  { %3764 = vmatpush1.bf16.msra.mxu0 %v5213_v24  ;;  %3796 = vmatpush1.bf16.msra.mxu1 %v5229_v43 }
 0x3ba   :  { %3766 = vmatprep.subr.bf16.mxu0 %v5216_v27  ;;  %3798 = vmatprep.subr.bf16.mxu1 %v5234_v51 }
 0x3bd   :  { %3768 = vmatpush1.bf16.msra.mxu0 %v5225_v41  ;;  %3800 = vmatpush1.bf16.msra.mxu1 %v5240_v61 }
 0x3be   :  { %3802 = vmatprep.subr.bf16.mxu0 %v5231_v47  ;;  %3866 = vmatprep.subr.bf16.mxu1 %v5246_v6 }
 0x3c0   :  { %1406 = vmatmul.mubr.f32.vlgmr.msra.gmra.mrb[12].mxu0 %v1159_v0  ;;  %1477 = vmatmul.mubr.f32.vlgmr.msra.gmra.mrb[12].mxu1 %v1159_v0  ;;  %v6547_v0 = vld [vmem:[#allocation36_spill] sm:$0xff] }
 0x3c1   :  { %3804 = vmatpush1.bf16.msra.mxu0 %v5237_v60  ;;  %3868 = vmatpush1.bf16.msra.mxu1 %v5254_v21 }
 0x3c2   :  { %3806 = vmatprep.subr.bf16.mxu0 %v5243_v2  ;;  %3870 = vmatprep.subr.bf16.mxu1 %v5260_v35 }
 0x3c5   :  { %3808 = vmatpush1.bf16.msra.mxu0 %v5250_v20  ;;  %3872 = vmatpush1.bf16.msra.mxu1 %v5267_v50 }
 0x3c6   :  { %3810 = vmatprep.subr.bf16.mxu0 %v5257_v28  ;;  %3874 = vmatprep.subr.bf16.mxu1 %v5273_v59 }
 0x3c9   :  { %3812 = vmatpush1.bf16.msra.mxu0 %v5264_v49  ;;  %3876 = vmatpush1.bf16.msra.mxu1 %v6528_v56 }
 0x3ca   :  { %3814 = vmatprep.subr.bf16.mxu0 %v6529_v39  ;;  %3878 = vmatprep.subr.bf16.mxu1 %v6530_v36 }
 0x3cd   :  { %3816 = vmatpush1.bf16.msra.mxu0 %v6531_v44  ;;  %3880 = vmatpush1.bf16.msra.mxu1 %v6532_v13 }
 0x3ce   :  { %3818 = vmatprep.subr.bf16.mxu0 %v6533_v63  ;;  %3882 = vmatprep.subr.bf16.mxu1 %v6534_v38  ;;  %v6584_v38 = vld [vmem:[#allocation71_spill] sm:$0xff] }
 0x3d1   :  { %3820 = vmatpush1.bf16.msra.mxu0 %v6535_v53  ;;  %3884 = vmatpush1.bf16.msra.mxu1 %v6536_v11  ;;  %v6583_v11 = vld [vmem:[#allocation70_spill] sm:$0xff] }
 0x3d2   :  { %3822 = vmatprep.subr.bf16.mxu0 %v6537_v32  ;;  %3886 = vmatprep.subr.bf16.mxu1 %v6538_v16  ;;  %v6548_v32 = vld [vmem:[#allocation37_spill] sm:$0xff]  ;;  %v6549_v16 = vld [vmem:[#allocation38_spill] sm:$0xff] }
 0x3d5   :  { %3824 = vmatpush1.bf16.msra.mxu0 %v6539_v3  ;;  %3888 = vmatpush1.bf16.msra.mxu1 %v6540_v5  ;;  %v6550_v3 = vld [vmem:[#allocation39_spill] sm:$0xff]  ;;  %v6551_v5 = vld [vmem:[#allocation40_spill] sm:$0xff] }
 0x3d6   :  { %3826 = vmatprep.subr.bf16.mxu0 %v6541_v12  ;;  %3890 = vmatprep.subr.bf16.mxu1 %v6542_v19  ;;  %v6552_v12 = vld [vmem:[#allocation41_spill] sm:$0xff]  ;;  %v6553_v19 = vld [vmem:[#allocation42_spill] sm:$0xff] }
 0x3d9   :  { %3828 = vmatpush1.bf16.msra.mxu0 %v6543_v40  ;;  %3892 = vmatpush1.bf16.msra.mxu1 %v6544_v57  ;;  %v6554_v40 = vld [vmem:[#allocation43_spill] sm:$0xff]  ;;  %v6555_v57 = vld [vmem:[#allocation44_spill] sm:$0xff] }
 0x3da   :  { %3830 = vmatprep.subr.bf16.mxu0 %v6545_v22  ;;  %3894 = vmatprep.subr.bf16.mxu1 %v6546_v54  ;;  %v6556_v22 = vld [vmem:[#allocation45_spill] sm:$0xff]  ;;  %v6557_v54 = vld [vmem:[#allocation46_spill] sm:$0xff] }
 0x3dd   :  { %3832 = vmatpush1.bf16.msra.mxu0 %v6547_v0  ;;  %3896 = vmatpush1.bf16.msra.mxu1 %v6548_v32  ;;  %v6558_v0 = vld [vmem:[#allocation47_spill] sm:$0xff]  ;;  %v6559_v32 = vld [vmem:[#allocation48_spill] sm:$0xff] }
 0x3de   :  { %3834 = vmatprep.subr.bf16.mxu0 %v6549_v16  ;;  %3898 = vmatprep.subr.bf16.mxu1 %v6550_v3  ;;  %v6560_v16 = vld [vmem:[#allocation49_spill] sm:$0xff]  ;;  %v6561_v3 = vld [vmem:[#allocation50_spill] sm:$0xff] }
 0x3e1   :  { %3836 = vmatpush1.bf16.msra.mxu0 %v6551_v5  ;;  %3900 = vmatpush1.bf16.msra.mxu1 %v6552_v12  ;;  %v6562_v5 = vld [vmem:[#allocation51_spill] sm:$0xff]  ;;  %v6563_v12 = vld [vmem:[#allocation52_spill] sm:$0xff] }
 0x3e2   :  { %3838 = vmatprep.subr.bf16.mxu0 %v6553_v19  ;;  %3902 = vmatprep.subr.bf16.mxu1 %v6554_v40  ;;  %v6564_v19 = vld [vmem:[#allocation53_spill] sm:$0xff]  ;;  %v6565_v40 = vld [vmem:[#allocation54_spill] sm:$0xff] }
 0x3e5   :  { %3840 = vmatpush1.bf16.msra.mxu0 %v6555_v57  ;;  %3904 = vmatpush1.bf16.msra.mxu1 %v6556_v22  ;;  %v6566_v57 = vld [vmem:[#allocation55_spill] sm:$0xff]  ;;  %v6567_v22 = vld [vmem:[#allocation56_spill] sm:$0xff] }
 0x3e6   :  { %3842 = vmatprep.subr.bf16.mxu0 %v6557_v54  ;;  %3906 = vmatprep.subr.bf16.mxu1 %v6558_v0  ;;  %v6568_v54 = vld [vmem:[#allocation57_spill] sm:$0xff]  ;;  %v6569_v0 = vld [vmem:[#allocation58_spill] sm:$0xff] }
 0x3e9   :  { %3844 = vmatpush1.bf16.msra.mxu0 %v6559_v32  ;;  %3908 = vmatpush1.bf16.msra.mxu1 %v6560_v16  ;;  %v6570_v32 = vld [vmem:[#allocation59_spill] sm:$0xff]  ;;  %v6571_v16 = vld [vmem:[#allocation60_spill] sm:$0xff] }
 0x3ea   :  { %3846 = vmatprep.subr.bf16.mxu0 %v6561_v3  ;;  %3910 = vmatprep.subr.bf16.mxu1 %v6562_v5  ;;  %v6572_v3 = vld [vmem:[#allocation61_spill] sm:$0xff]  ;;  %v6573_v5 = vld [vmem:[#allocation62_spill] sm:$0xff] }
 0x3ed   :  { %3848 = vmatpush1.bf16.msra.mxu0 %v6563_v12  ;;  %3912 = vmatpush1.bf16.msra.mxu1 %v6564_v19  ;;  %v6574_v12 = vld [vmem:[#allocation63_spill] sm:$0xff]  ;;  %v6575_v19 = vld [vmem:[#allocation64_spill] sm:$0xff] }
 0x3ee   :  { %3850 = vmatprep.subr.bf16.mxu0 %v6565_v40  ;;  %3914 = vmatprep.subr.bf16.mxu1 %v6566_v57  ;;  %v6576_v40 = vld [vmem:[#allocation65_spill] sm:$0xff]  ;;  %v6577_v57 = vld [vmem:[#allocation66_spill] sm:$0xff] }
 0x3f1   :  { %3852 = vmatpush1.bf16.msra.mxu0 %v6567_v22  ;;  %3916 = vmatpush1.bf16.msra.mxu1 %v6568_v54  ;;  %v6578_v22 = vld [vmem:[#allocation67_spill] sm:$0xff]  ;;  %v6579_v54 = vld [vmem:[#allocation68_spill] sm:$0xff] }
 0x3f2   :  { %3854 = vmatprep.subr.bf16.mxu0 %v6569_v0  ;;  %3918 = vmatprep.subr.bf16.mxu1 %v6570_v32  ;;  %v6580_v0 = vld [vmem:[#allocation69_spill] sm:$0xff]  ;;  %v6581_v32 = vld [vmem:[#allocation15_spill] sm:$0xff] }
 0x3f5   :  { %3856 = vmatpush1.bf16.msra.mxu0 %v6571_v16  ;;  %3920 = vmatpush1.bf16.msra.mxu1 %v6572_v3  ;;  %v6582_v16 = vld [vmem:[#allocation16_spill] sm:$0xff] }
 0x3f6   :  { %3858 = vmatprep.subr.bf16.mxu0 %v6573_v5  ;;  %3922 = vmatprep.subr.bf16.mxu1 %v6574_v12 }
 0x3f9   :  { %3860 = vmatpush1.bf16.msra.mxu0 %v6575_v19  ;;  %3924 = vmatpush1.bf16.msra.mxu1 %v6576_v40 }
 0x3fa   :  { %3862 = vmatprep.subr.bf16.mxu0 %v6577_v57  ;;  %3926 = vmatprep.subr.bf16.mxu1 %v6578_v22  ;;  %v6585_v22 = vld [vmem:[#allocation72_spill] sm:$0xff] }
 0x3fd   :  { %3864 = vmatpush1.bf16.msra.mxu0 %v6579_v54  ;;  %3928 = vmatpush1.bf16.msra.mxu1 %v6580_v0  ;;  %v6586_v0 = vld [vmem:[#allocation73_spill] sm:$0xff] }
 0x3fe   :  { %3930 = vmatprep.subr.bf16.mxu0 %v6581_v32  ;;  %3962 = vmatprep.subr.bf16.mxu1 %v6582_v16 }
 0x473   :  { %v1230_v3 = vpop.f32.mrb[10].mxu0  ;;  %v1301_v5 = vpop.f32.mrb[10].mxu1 }
 0x474   :  { %v1231_v12 = vadd.f32 %v1230_v3, %v6583_v11  ;;  %v1232_v53 = vpop.f32.mrb[11].mxu0  ;;  %v1303_v19 = vpop.f32.mrb[11].mxu1  ;;  %v1302_v44 = vadd.f32 %v1301_v5, %v6586_v0 }
 0x475   :  { %v1233_v40 = vadd.f32 %v1232_v53, %v6584_v38  ;;  %v1304_v54 = vadd.f32 %v1303_v19, %v6585_v22  ;;  %v1336_v19 = vld [vmem:[#allocation5 + $0x60] sm:$0xff] }
 0x476   :  { %v3128_v63 = vmul.f32 -1.442695, %v1231_v12 }
 0x477   :  { %v3129_v57 = vmul.f32 -1.442695, %v1233_v40  ;;  %v3130_v13 = vmul.f32 -1.442695, %v1304_v54  ;;  %v1337_v54 = vld [vmem:[#allocation5 + $0x68] sm:$0xff] }
 0x478   :  { %4786 = vpow2.f32 %v3128_v63 }
 0x479   :  { %4788 = vpow2.f32 %v3129_v57 }
 0x47a   :  { %4790 = vpow2.f32 %v3130_v13 }
 0x47b   :  { %4792 = vtanh.f32 %v1302_v44 }
 0x482   :  { %v4787_v32 = vpop.eup %4786 }
 0x483   :  { %v4789_v36 = vpop.eup %4788  ;;  %v1309_v16 = vadd.f32 1.0, %v4787_v32 }
 0x484   :  { %v1315_v39 = vadd.f32 1.0, %v4789_v36  ;;  %v4791_v3 = vpop.eup %4790 }
 0x485   :  { %4794 = vrcp.f32 %v1309_v16  ;;  %v4793_v11 = vpop.eup %4792  ;;  %v1322_v63 = vadd.f32 1.0, %v4791_v3 }
 0x486   :  { %4796 = vrcp.f32 %v1315_v39 }
 0x487   :  { %4798 = vrcp.f32 %v1322_v63 }
 0x48f   :  { %v4795_v53 = vpop.eup %4794 }
 0x490   :  { %v4797_v12 = vpop.eup %4796  ;;  %v1327_v40 = vmul.f32 %v4795_v53, %v4793_v11  ;;  %v1339_v11 = vld [vmem:[#allocation5 + $0x78] sm:$0xff] }
 0x491   :  { %v1326_v57 = vmul.f32 %v4797_v12, %v5664_v23  ;;  %v1338_v23 = vld [vmem:[#allocation5 + $0x70] sm:$0xff]  ;;  %v4799_v53 = vpop.eup %4798 }
 0x493   :  { %v1407_v22 = vpop.f32.mrb[12].mxu0  ;;  %v1478_v5 = vpop.f32.mrb[12].mxu1  ;;  %v5774_v0 = vadd.f32 %v1327_v40, %v1326_v57 }
 0x494   :  { %v1483_v13 = vadd.f32 %v1407_v22, %v1336_v19  ;;  %v1409_v44 = vpop.f32.mrb[13].mxu0  ;;  %v1480_v36 = vpop.f32.mrb[13].mxu1  ;;  %v1485_v56 = vadd.f32 %v1478_v5, %v1338_v23  ;;  %v6589_v23 = vld [vmem:[#allocation21_spill] sm:$0xff] }
 0x495   :  { %v1484_v32 = vadd.f32 %v1409_v44, %v1337_v54  ;;  %4800 = vtanh.f32 %v5774_v0  ;;  %v1486_v3 = vadd.f32 %v1480_v36, %v1339_v11 }
 0x496   :  { %v3131_v39 = vmul.f32 -1.442695, %v1483_v13 }
 0x497   :  { %v3132_v16 = vmul.f32 -1.442695, %v1484_v32  ;;  %v3133_v38 = vmul.f32 -1.442695, %v1486_v3 }
 0x498   :  { %4802 = vpow2.f32 %v3131_v39 }
 0x499   :  { %4804 = vpow2.f32 %v3132_v16 }
 0x49a   :  { %4806 = vpow2.f32 %v3133_v38 }
 0x49b   :  { %4808 = vtanh.f32 %v1485_v56  ;;  %v6588_v56 = vld [vmem:[#allocation17_spill] sm:$0xff] }
 0x49f   :  { %v4801_v12 = vpop.eup %4800 }
 0x4a0   :  { %v1330_v40 = vmul.f32 %v4801_v12, %v4799_v53  ;;  %v6590_v53 = vld [vmem:[#allocation18_spill] sm:$0xff]  ;;  %v6591_v12 = vld [vmem:[#allocation23_spill] sm:$0xff] }
 0x4a2   :  { %v4803_v57 = vpop.eup %4802  ;;  %1334 = vst [vmem:[#allocation11 + $0x10] sm:$0xff] %v1330_v40  ;;  %1580 = vmatprep.mubr.f32.mxu0 %v1330_v40  ;;  %1651 = vmatprep.mubr.f32.mxu1 %v1330_v40  ;;  %v6592_v40 = vld [vmem:[#allocation20_spill] sm:$0xff] }
 0x4a3   :  { %v4805_v22 = vpop.eup %4804  ;;  %v1490_v63 = vadd.f32 1.0, %v4803_v57  ;;  %v6593_v57 = vld [vmem:[#allocation24_spill] sm:$0xff] }
 0x4a4   :  { %v1496_v19 = vadd.f32 1.0, %v4805_v22  ;;  %v4807_v54 = vpop.eup %4806  ;;  %v6594_v22 = vld [vmem:[#allocation22_spill] sm:$0xff] }
 0x4a5   :  { %4810 = vrcp.f32 %v1490_v63  ;;  %v4809_v13 = vpop.eup %4808  ;;  %v1503_v39 = vadd.f32 1.0, %v4807_v54  ;;  %v6595_v63 = vld [vmem:[#allocation25_spill] sm:$0xff]  ;;  %v6597_v54 = vld [vmem:[#allocation27_spill] sm:$0xff] }
 0x4a6   :  { %4812 = vrcp.f32 %v1496_v19  ;;  %v6596_v19 = vld [vmem:[#allocation26_spill] sm:$0xff] }
 0x4a7   :  { %4814 = vrcp.f32 %v1503_v39  ;;  %v6602_v39 = vld [vmem:[#allocation32_spill] sm:$0xff] }
 0x4af   :  { %v4811_v44 = vpop.eup %4810 }
 0x4b0   :  { %v4813_v36 = vpop.eup %4812  ;;  %v1508_v32 = vmul.f32 %v4811_v44, %v4809_v13  ;;  %v6598_v13 = vld [vmem:[#allocation28_spill] sm:$0xff]  ;;  %v6599_v44 = vld [vmem:[#allocation29_spill] sm:$0xff] }
 0x4b1   :  { %v1507_v5 = vmul.f32 %v4813_v36, %v5668_v29  ;;  %v4815_v11 = vpop.eup %4814  ;;  %v6587_v29 = vld [vmem:[#allocation19_spill] sm:$0xff]  ;;  %v6600_v36 = vld [vmem:[#allocation30_spill] sm:$0xff] }
 0x4b3   :  { %v5778_v16 = vadd.f32 %v1508_v32, %v1507_v5  ;;  %v6601_v32 = vld [vmem:[#allocation31_spill] sm:$0xff]  ;;  %v6603_v5 = vld [vmem:[#allocation33_spill] sm:$0xff] }
 0x4b5   :  { %4816 = vtanh.f32 %v5778_v16 }
 0x4bf   :  { %v4817_v3 = vpop.eup %4816 }
 0x4c0   :  { %v1511_v38 = vmul.f32 %v4817_v3, %v4815_v11  ;;  %v6604_v11 = vld [vmem:[#allocation34_spill] sm:$0xff]  ;;  %v6605_v3 = vld [vmem:[#allocation35_spill] sm:$0xff] }
 0x4c2   :  { %1581 = vmatmul.mubr.f32.vlgmr.msra.gmra.mrb[14].mxu0 %v1511_v38  ;;  %1652 = vmatmul.mubr.f32.vlgmr.msra.gmra.mrb[14].mxu1 %v1511_v38 }
 0x4c3   :  { %3932 = vmatpush1.bf16.msra.mxu0 %v5146_v8  ;;  %3964 = vmatpush1.bf16.msra.mxu1 %v5159_v25 }
 0x4c4   :  { %3934 = vmatprep.subr.bf16.mxu0 %v5148_v9  ;;  %3966 = vmatprep.subr.bf16.mxu1 %v5169_v33 }
 0x4c5   :  { %1757 = vmatprep.mubr.f32.mxu0 %v6413_v4  ;;  %1828 = vmatprep.mubr.f32.mxu1 %v6413_v4 }
 0x4c7   :  { %3936 = vmatpush1.bf16.msra.mxu0 %v5152_v14  ;;  %3968 = vmatpush1.bf16.msra.mxu1 %v5171_v37 }
 0x4c8   :  { %3938 = vmatprep.subr.bf16.mxu0 %v5155_v17  ;;  %3970 = vmatprep.subr.bf16.mxu1 %v5177_v45 }
 0x4cb   :  { %3940 = vmatpush1.bf16.msra.mxu0 %v5162_v26  ;;  %3972 = vmatpush1.bf16.msra.mxu1 %v5183_v48 }
 0x4cc   :  { %3942 = vmatprep.subr.bf16.mxu0 %v5166_v30  ;;  %3974 = vmatprep.subr.bf16.mxu1 %v5186_v52 }
 0x4cf   :  { %3944 = vmatpush1.bf16.msra.mxu0 %v5175_v42  ;;  %3976 = vmatpush1.bf16.msra.mxu1 %v5195_v62 }
 0x4d0   :  { %3946 = vmatprep.subr.bf16.mxu0 %v5180_v46  ;;  %3978 = vmatprep.subr.bf16.mxu1 %v5198_v1 }
 0x4d3   :  { %3948 = vmatpush1.bf16.msra.mxu0 %v5189_v55  ;;  %3980 = vmatpush1.bf16.msra.mxu1 %v5207_v15 }
 0x4d4   :  { %3950 = vmatprep.subr.bf16.mxu0 %v5192_v58  ;;  %3982 = vmatprep.subr.bf16.mxu1 %v5210_v18 }
 0x4d7   :  { %3952 = vmatpush1.bf16.msra.mxu0 %v5201_v7  ;;  %3984 = vmatpush1.bf16.msra.mxu1 %v5219_v31 }
 0x4d8   :  { %3954 = vmatprep.subr.bf16.mxu0 %v5204_v10  ;;  %3986 = vmatprep.subr.bf16.mxu1 %v5222_v34 }
 0x4db   :  { %3956 = vmatpush1.bf16.msra.mxu0 %v5213_v24  ;;  %3988 = vmatpush1.bf16.msra.mxu1 %v5229_v43 }
 0x4dc   :  { %3958 = vmatprep.subr.bf16.mxu0 %v5216_v27  ;;  %3990 = vmatprep.subr.bf16.mxu1 %v5234_v51 }
 0x4df   :  { %3960 = vmatpush1.bf16.msra.mxu0 %v5225_v41  ;;  %3992 = vmatpush1.bf16.msra.mxu1 %v5240_v61 }
 0x4e0   :  { %3994 = vmatprep.subr.bf16.mxu0 %v5231_v47  ;;  %4058 = vmatprep.subr.bf16.mxu1 %v5246_v6 }
 0x4e2   :  { %1758 = vmatmul.mubr.f32.vlgmr.msra.gmra.mrb[16].mxu0 %v1511_v38  ;;  %1829 = vmatmul.mubr.f32.vlgmr.msra.gmra.mrb[16].mxu1 %v1511_v38  ;;  %v6606_v38 = vld [vmem:[#allocation36_spill] sm:$0xff] }
 0x4e3   :  { %3996 = vmatpush1.bf16.msra.mxu0 %v5237_v60  ;;  %4060 = vmatpush1.bf16.msra.mxu1 %v5254_v21 }
 0x4e4   :  { %3998 = vmatprep.subr.bf16.mxu0 %v5243_v2  ;;  %4062 = vmatprep.subr.bf16.mxu1 %v5260_v35 }
 0x4e7   :  { %4000 = vmatpush1.bf16.msra.mxu0 %v5250_v20  ;;  %4064 = vmatpush1.bf16.msra.mxu1 %v5267_v50 }
 0x4e8   :  { %4002 = vmatprep.subr.bf16.mxu0 %v5257_v28  ;;  %4066 = vmatprep.subr.bf16.mxu1 %v5273_v59 }
 0x4eb   :  { %4004 = vmatpush1.bf16.msra.mxu0 %v5264_v49  ;;  %4068 = vmatpush1.bf16.msra.mxu1 %v6587_v29 }
 0x4ec   :  { %4006 = vmatprep.subr.bf16.mxu0 %v6588_v56  ;;  %4070 = vmatprep.subr.bf16.mxu1 %v6589_v23 }
 0x4ef   :  { %4008 = vmatpush1.bf16.msra.mxu0 %v6590_v53  ;;  %4072 = vmatpush1.bf16.msra.mxu1 %v6591_v12 }
 0x4f0   :  { %4010 = vmatprep.subr.bf16.mxu0 %v6592_v40  ;;  %4074 = vmatprep.subr.bf16.mxu1 %v6593_v57  ;;  %v6643_v57 = vld [vmem:[#allocation71_spill] sm:$0xff] }
 0x4f3   :  { %4012 = vmatpush1.bf16.msra.mxu0 %v6594_v22  ;;  %4076 = vmatpush1.bf16.msra.mxu1 %v6595_v63  ;;  %v6642_v63 = vld [vmem:[#allocation70_spill] sm:$0xff] }
 0x4f4   :  { %4014 = vmatprep.subr.bf16.mxu0 %v6596_v19  ;;  %4078 = vmatprep.subr.bf16.mxu1 %v6597_v54  ;;  %v6607_v19 = vld [vmem:[#allocation37_spill] sm:$0xff]  ;;  %v6608_v54 = vld [vmem:[#allocation38_spill] sm:$0xff] }
 0x4f7   :  { %4016 = vmatpush1.bf16.msra.mxu0 %v6598_v13  ;;  %4080 = vmatpush1.bf16.msra.mxu1 %v6599_v44  ;;  %v6609_v13 = vld [vmem:[#allocation39_spill] sm:$0xff]  ;;  %v6610_v44 = vld [vmem:[#allocation40_spill] sm:$0xff] }
 0x4f8   :  { %4018 = vmatprep.subr.bf16.mxu0 %v6600_v36  ;;  %4082 = vmatprep.subr.bf16.mxu1 %v6601_v32  ;;  %v6611_v36 = vld [vmem:[#allocation41_spill] sm:$0xff]  ;;  %v6612_v32 = vld [vmem:[#allocation42_spill] sm:$0xff] }
 0x4fb   :  { %4020 = vmatpush1.bf16.msra.mxu0 %v6602_v39  ;;  %4084 = vmatpush1.bf16.msra.mxu1 %v6603_v5  ;;  %v6613_v39 = vld [vmem:[#allocation43_spill] sm:$0xff]  ;;  %v6614_v5 = vld [vmem:[#allocation44_spill] sm:$0xff] }
 0x4fc   :  { %4022 = vmatprep.subr.bf16.mxu0 %v6604_v11  ;;  %4086 = vmatprep.subr.bf16.mxu1 %v6605_v3  ;;  %v6615_v11 = vld [vmem:[#allocation45_spill] sm:$0xff]  ;;  %v6616_v3 = vld [vmem:[#allocation46_spill] sm:$0xff] }
 0x4ff   :  { %4024 = vmatpush1.bf16.msra.mxu0 %v6606_v38  ;;  %4088 = vmatpush1.bf16.msra.mxu1 %v6607_v19  ;;  %v6617_v38 = vld [vmem:[#allocation47_spill] sm:$0xff]  ;;  %v6618_v19 = vld [vmem:[#allocation48_spill] sm:$0xff] }
 0x500   :  { %4026 = vmatprep.subr.bf16.mxu0 %v6608_v54  ;;  %4090 = vmatprep.subr.bf16.mxu1 %v6609_v13  ;;  %v6619_v54 = vld [vmem:[#allocation49_spill] sm:$0xff]  ;;  %v6620_v13 = vld [vmem:[#allocation50_spill] sm:$0xff] }
 0x503   :  { %4028 = vmatpush1.bf16.msra.mxu0 %v6610_v44  ;;  %4092 = vmatpush1.bf16.msra.mxu1 %v6611_v36  ;;  %v6621_v44 = vld [vmem:[#allocation51_spill] sm:$0xff]  ;;  %v6622_v36 = vld [vmem:[#allocation52_spill] sm:$0xff] }
 0x504   :  { %4030 = vmatprep.subr.bf16.mxu0 %v6612_v32  ;;  %4094 = vmatprep.subr.bf16.mxu1 %v6613_v39  ;;  %v6623_v32 = vld [vmem:[#allocation53_spill] sm:$0xff]  ;;  %v6624_v39 = vld [vmem:[#allocation54_spill] sm:$0xff] }
 0x507   :  { %4032 = vmatpush1.bf16.msra.mxu0 %v6614_v5  ;;  %4096 = vmatpush1.bf16.msra.mxu1 %v6615_v11  ;;  %v6625_v5 = vld [vmem:[#allocation55_spill] sm:$0xff]  ;;  %v6626_v11 = vld [vmem:[#allocation56_spill] sm:$0xff] }
 0x508   :  { %4034 = vmatprep.subr.bf16.mxu0 %v6616_v3  ;;  %4098 = vmatprep.subr.bf16.mxu1 %v6617_v38  ;;  %v6627_v3 = vld [vmem:[#allocation57_spill] sm:$0xff]  ;;  %v6628_v38 = vld [vmem:[#allocation58_spill] sm:$0xff] }
 0x50b   :  { %4036 = vmatpush1.bf16.msra.mxu0 %v6618_v19  ;;  %4100 = vmatpush1.bf16.msra.mxu1 %v6619_v54  ;;  %v6629_v19 = vld [vmem:[#allocation59_spill] sm:$0xff]  ;;  %v6630_v54 = vld [vmem:[#allocation60_spill] sm:$0xff] }
 0x50c   :  { %4038 = vmatprep.subr.bf16.mxu0 %v6620_v13  ;;  %4102 = vmatprep.subr.bf16.mxu1 %v6621_v44  ;;  %v6631_v13 = vld [vmem:[#allocation61_spill] sm:$0xff]  ;;  %v6632_v44 = vld [vmem:[#allocation62_spill] sm:$0xff] }
 0x50f   :  { %4040 = vmatpush1.bf16.msra.mxu0 %v6622_v36  ;;  %4104 = vmatpush1.bf16.msra.mxu1 %v6623_v32  ;;  %v6633_v36 = vld [vmem:[#allocation63_spill] sm:$0xff]  ;;  %v6634_v32 = vld [vmem:[#allocation64_spill] sm:$0xff] }
 0x510   :  { %4042 = vmatprep.subr.bf16.mxu0 %v6624_v39  ;;  %4106 = vmatprep.subr.bf16.mxu1 %v6625_v5  ;;  %v6635_v39 = vld [vmem:[#allocation65_spill] sm:$0xff]  ;;  %v6636_v5 = vld [vmem:[#allocation66_spill] sm:$0xff] }
 0x513   :  { %4044 = vmatpush1.bf16.msra.mxu0 %v6626_v11  ;;  %4108 = vmatpush1.bf16.msra.mxu1 %v6627_v3  ;;  %v6637_v11 = vld [vmem:[#allocation67_spill] sm:$0xff]  ;;  %v6638_v3 = vld [vmem:[#allocation68_spill] sm:$0xff] }
 0x514   :  { %4046 = vmatprep.subr.bf16.mxu0 %v6628_v38  ;;  %4110 = vmatprep.subr.bf16.mxu1 %v6629_v19  ;;  %v6639_v38 = vld [vmem:[#allocation69_spill] sm:$0xff]  ;;  %v6640_v19 = vld [vmem:[#allocation15_spill] sm:$0xff] }
 0x517   :  { %4048 = vmatpush1.bf16.msra.mxu0 %v6630_v54  ;;  %4112 = vmatpush1.bf16.msra.mxu1 %v6631_v13  ;;  %v6641_v54 = vld [vmem:[#allocation16_spill] sm:$0xff] }
 0x518   :  { %4050 = vmatprep.subr.bf16.mxu0 %v6632_v44  ;;  %4114 = vmatprep.subr.bf16.mxu1 %v6633_v36 }
 0x51b   :  { %4052 = vmatpush1.bf16.msra.mxu0 %v6634_v32  ;;  %4116 = vmatpush1.bf16.msra.mxu1 %v6635_v39 }
 0x51c   :  { %4054 = vmatprep.subr.bf16.mxu0 %v6636_v5  ;;  %4118 = vmatprep.subr.bf16.mxu1 %v6637_v11  ;;  %v6644_v11 = vld [vmem:[#allocation72_spill] sm:$0xff] }
 0x51f   :  { %4056 = vmatpush1.bf16.msra.mxu0 %v6638_v3  ;;  %4120 = vmatpush1.bf16.msra.mxu1 %v6639_v38  ;;  %v6645_v38 = vld [vmem:[#allocation73_spill] sm:$0xff] }
 0x520   :  { %4122 = vmatprep.subr.bf16.mxu0 %v6640_v19  ;;  %4154 = vmatprep.subr.bf16.mxu1 %v6641_v54 }
 0x595   :  { %v1582_v13 = vpop.f32.mrb[14].mxu0  ;;  %v1653_v44 = vpop.f32.mrb[14].mxu1 }
 0x596   :  { %v1583_v36 = vadd.f32 %v1582_v13, %v6642_v63  ;;  %v1584_v22 = vpop.f32.mrb[15].mxu0  ;;  %v1655_v32 = vpop.f32.mrb[15].mxu1  ;;  %v1654_v53 = vadd.f32 %v1653_v44, %v6645_v38 }
 0x597   :  { %v1585_v39 = vadd.f32 %v1584_v22, %v6643_v57  ;;  %v1656_v3 = vadd.f32 %v1655_v32, %v6644_v11  ;;  %v1688_v32 = vld [vmem:[#allocation5 + $0x80] sm:$0xff] }
 0x598   :  { %v3134_v40 = vmul.f32 -1.442695, %v1583_v36 }
 0x599   :  { %v3135_v5 = vmul.f32 -1.442695, %v1585_v39  ;;  %v3136_v12 = vmul.f32 -1.442695, %v1656_v3  ;;  %v1689_v3 = vld [vmem:[#allocation5 + $0x88] sm:$0xff] }
 0x59a   :  { %4818 = vpow2.f32 %v3134_v40 }
 0x59b   :  { %4820 = vpow2.f32 %v3135_v5 }
 0x59c   :  { %4822 = vpow2.f32 %v3136_v12 }
 0x59d   :  { %4824 = vtanh.f32 %v1654_v53 }
 0x5a4   :  { %v4819_v19 = vpop.eup %4818 }
 0x5a5   :  { %v4821_v23 = vpop.eup %4820  ;;  %v1661_v54 = vadd.f32 1.0, %v4819_v19 }
 0x5a6   :  { %v1667_v56 = vadd.f32 1.0, %v4821_v23  ;;  %v4823_v13 = vpop.eup %4822 }
 0x5a7   :  { %4826 = vrcp.f32 %v1661_v54  ;;  %v4825_v63 = vpop.eup %4824  ;;  %v1674_v40 = vadd.f32 1.0, %v4823_v13 }
 0x5a8   :  { %4828 = vrcp.f32 %v1667_v56 }
 0x5a9   :  { %4830 = vrcp.f32 %v1674_v40 }
 0x5b1   :  { %v4827_v22 = vpop.eup %4826 }
 0x5b2   :  { %v4829_v36 = vpop.eup %4828  ;;  %v1679_v39 = vmul.f32 %v4827_v22, %v4825_v63  ;;  %v1691_v63 = vld [vmem:[#allocation5 + $0x98] sm:$0xff] }
 0x5b3   :  { %v1678_v5 = vmul.f32 %v4829_v36, %v5774_v0  ;;  %v1690_v0 = vld [vmem:[#allocation5 + $0x90] sm:$0xff]  ;;  %v4831_v22 = vpop.eup %4830 }
 0x5b5   :  { %v1759_v11 = vpop.f32.mrb[16].mxu0  ;;  %v1830_v44 = vpop.f32.mrb[16].mxu1  ;;  %v5884_v38 = vadd.f32 %v1679_v39, %v1678_v5 }
 0x5b6   :  { %v1835_v12 = vadd.f32 %v1759_v11, %v1688_v32  ;;  %v1761_v53 = vpop.f32.mrb[17].mxu0  ;;  %v1832_v23 = vpop.f32.mrb[17].mxu1  ;;  %v1837_v29 = vadd.f32 %v1830_v44, %v1690_v0  ;;  %v6648_v0 = vld [vmem:[#allocation21_spill] sm:$0xff] }
 0x5b7   :  { %v1836_v19 = vadd.f32 %v1761_v53, %v1689_v3  ;;  %4832 = vtanh.f32 %v5884_v38  ;;  %v1838_v13 = vadd.f32 %v1832_v23, %v1691_v63 }
 0x5b8   :  { %v3137_v56 = vmul.f32 -1.442695, %v1835_v12 }
 0x5b9   :  { %v3138_v54 = vmul.f32 -1.442695, %v1836_v19  ;;  %v3139_v57 = vmul.f32 -1.442695, %v1838_v13 }
 0x5ba   :  { %4834 = vpow2.f32 %v3137_v56 }
 0x5bb   :  { %4836 = vpow2.f32 %v3138_v54 }
 0x5bc   :  { %4838 = vpow2.f32 %v3139_v57 }
 0x5bd   :  { %4840 = vtanh.f32 %v1837_v29  ;;  %v6647_v29 = vld [vmem:[#allocation17_spill] sm:$0xff] }
 0x5c1   :  { %v4833_v36 = vpop.eup %4832 }
 0x5c2   :  { %v1682_v39 = vmul.f32 %v4833_v36, %v4831_v22  ;;  %v6649_v22 = vld [vmem:[#allocation18_spill] sm:$0xff]  ;;  %v6650_v36 = vld [vmem:[#allocation23_spill] sm:$0xff] }
 0x5c4   :  { %v4835_v5 = vpop.eup %4834  ;;  %1686 = vst [vmem:[#allocation11 + $0x18] sm:$0xff] %v1682_v39  ;;  %1932 = vmatprep.mubr.f32.mxu0 %v1682_v39  ;;  %2003 = vmatprep.mubr.f32.mxu1 %v1682_v39  ;;  %v6651_v39 = vld [vmem:[#allocation20_spill] sm:$0xff] }
 0x5c5   :  { %v4837_v11 = vpop.eup %4836  ;;  %v1842_v40 = vadd.f32 1.0, %v4835_v5  ;;  %v6652_v5 = vld [vmem:[#allocation24_spill] sm:$0xff] }
 0x5c6   :  { %v1848_v32 = vadd.f32 1.0, %v4837_v11  ;;  %v4839_v3 = vpop.eup %4838  ;;  %v6653_v11 = vld [vmem:[#allocation22_spill] sm:$0xff] }
 0x5c7   :  { %4842 = vrcp.f32 %v1842_v40  ;;  %v4841_v12 = vpop.eup %4840  ;;  %v1855_v56 = vadd.f32 1.0, %v4839_v3  ;;  %v6654_v40 = vld [vmem:[#allocation25_spill] sm:$0xff]  ;;  %v6656_v3 = vld [vmem:[#allocation27_spill] sm:$0xff] }
 0x5c8   :  { %4844 = vrcp.f32 %v1848_v32  ;;  %v6655_v32 = vld [vmem:[#allocation26_spill] sm:$0xff] }
 0x5c9   :  { %4846 = vrcp.f32 %v1855_v56  ;;  %v6661_v56 = vld [vmem:[#allocation32_spill] sm:$0xff] }
 0x5d1   :  { %v4843_v53 = vpop.eup %4842 }
 0x5d2   :  { %v4845_v23 = vpop.eup %4844  ;;  %v1860_v19 = vmul.f32 %v4843_v53, %v4841_v12  ;;  %v6657_v12 = vld [vmem:[#allocation28_spill] sm:$0xff]  ;;  %v6658_v53 = vld [vmem:[#allocation29_spill] sm:$0xff] }
 0x5d3   :  { %v1859_v44 = vmul.f32 %v4845_v23, %v5778_v16  ;;  %v4847_v63 = vpop.eup %4846  ;;  %v6646_v16 = vld [vmem:[#allocation19_spill] sm:$0xff]  ;;  %v6659_v23 = vld [vmem:[#allocation30_spill] sm:$0xff] }
 0x5d5   :  { %v5888_v54 = vadd.f32 %v1860_v19, %v1859_v44  ;;  %v6660_v19 = vld [vmem:[#allocation31_spill] sm:$0xff]  ;;  %v6662_v44 = vld [vmem:[#allocation33_spill] sm:$0xff] }
 0x5d7   :  { %4848 = vtanh.f32 %v5888_v54 }
 0x5e1   :  { %v4849_v13 = vpop.eup %4848 }
 0x5e2   :  { %v1863_v57 = vmul.f32 %v4849_v13, %v4847_v63  ;;  %v6663_v63 = vld [vmem:[#allocation34_spill] sm:$0xff]  ;;  %v6664_v13 = vld [vmem:[#allocation35_spill] sm:$0xff] }
 0x5e4   :  { %1933 = vmatmul.mubr.f32.vlgmr.msra.gmra.mrb[18].mxu0 %v1863_v57  ;;  %2004 = vmatmul.mubr.f32.vlgmr.msra.gmra.mrb[18].mxu1 %v1863_v57 }
 0x5e5   :  { %4124 = vmatpush1.bf16.msra.mxu0 %v5146_v8  ;;  %4156 = vmatpush1.bf16.msra.mxu1 %v5159_v25 }
 0x5e6   :  { %4126 = vmatprep.subr.bf16.mxu0 %v5148_v9  ;;  %4158 = vmatprep.subr.bf16.mxu1 %v5169_v33 }
 0x5e7   :  { %2109 = vmatprep.mubr.f32.mxu0 %v6413_v4  ;;  %2180 = vmatprep.mubr.f32.mxu1 %v6413_v4 }
 0x5e9   :  { %4128 = vmatpush1.bf16.msra.mxu0 %v5152_v14  ;;  %4160 = vmatpush1.bf16.msra.mxu1 %v5171_v37 }
 0x5ea   :  { %4130 = vmatprep.subr.bf16.mxu0 %v5155_v17  ;;  %4162 = vmatprep.subr.bf16.mxu1 %v5177_v45 }
 0x5ed   :  { %4132 = vmatpush1.bf16.msra.mxu0 %v5162_v26  ;;  %4164 = vmatpush1.bf16.msra.mxu1 %v5183_v48 }
 0x5ee   :  { %4134 = vmatprep.subr.bf16.mxu0 %v5166_v30  ;;  %4166 = vmatprep.subr.bf16.mxu1 %v5186_v52 }
 0x5f1   :  { %4136 = vmatpush1.bf16.msra.mxu0 %v5175_v42  ;;  %4168 = vmatpush1.bf16.msra.mxu1 %v5195_v62 }
 0x5f2   :  { %4138 = vmatprep.subr.bf16.mxu0 %v5180_v46  ;;  %4170 = vmatprep.subr.bf16.mxu1 %v5198_v1 }
 0x5f5   :  { %4140 = vmatpush1.bf16.msra.mxu0 %v5189_v55  ;;  %4172 = vmatpush1.bf16.msra.mxu1 %v5207_v15 }
 0x5f6   :  { %4142 = vmatprep.subr.bf16.mxu0 %v5192_v58  ;;  %4174 = vmatprep.subr.bf16.mxu1 %v5210_v18 }
 0x5f9   :  { %4144 = vmatpush1.bf16.msra.mxu0 %v5201_v7  ;;  %4176 = vmatpush1.bf16.msra.mxu1 %v5219_v31 }
 0x5fa   :  { %4146 = vmatprep.subr.bf16.mxu0 %v5204_v10  ;;  %4178 = vmatprep.subr.bf16.mxu1 %v5222_v34 }
 0x5fd   :  { %4148 = vmatpush1.bf16.msra.mxu0 %v5213_v24  ;;  %4180 = vmatpush1.bf16.msra.mxu1 %v5229_v43 }
 0x5fe   :  { %4150 = vmatprep.subr.bf16.mxu0 %v5216_v27  ;;  %4182 = vmatprep.subr.bf16.mxu1 %v5234_v51 }
 0x601   :  { %4152 = vmatpush1.bf16.msra.mxu0 %v5225_v41  ;;  %4184 = vmatpush1.bf16.msra.mxu1 %v5240_v61 }
 0x602   :  { %4186 = vmatprep.subr.bf16.mxu0 %v5231_v47  ;;  %4250 = vmatprep.subr.bf16.mxu1 %v5246_v6 }
 0x604   :  { %2110 = vmatmul.mubr.f32.vlgmr.msra.gmra.mrb[20].mxu0 %v1863_v57  ;;  %2181 = vmatmul.mubr.f32.vlgmr.msra.gmra.mrb[20].mxu1 %v1863_v57  ;;  %v6665_v57 = vld [vmem:[#allocation36_spill] sm:$0xff] }
 0x605   :  { %4188 = vmatpush1.bf16.msra.mxu0 %v5237_v60  ;;  %4252 = vmatpush1.bf16.msra.mxu1 %v5254_v21 }
 0x606   :  { %4190 = vmatprep.subr.bf16.mxu0 %v5243_v2  ;;  %4254 = vmatprep.subr.bf16.mxu1 %v5260_v35 }
 0x609   :  { %4192 = vmatpush1.bf16.msra.mxu0 %v5250_v20  ;;  %4256 = vmatpush1.bf16.msra.mxu1 %v5267_v50 }
 0x60a   :  { %4194 = vmatprep.subr.bf16.mxu0 %v5257_v28  ;;  %4258 = vmatprep.subr.bf16.mxu1 %v5273_v59 }
 0x60d   :  { %4196 = vmatpush1.bf16.msra.mxu0 %v5264_v49  ;;  %4260 = vmatpush1.bf16.msra.mxu1 %v6646_v16 }
 0x60e   :  { %4198 = vmatprep.subr.bf16.mxu0 %v6647_v29  ;;  %4262 = vmatprep.subr.bf16.mxu1 %v6648_v0 }
 0x611   :  { %4200 = vmatpush1.bf16.msra.mxu0 %v6649_v22  ;;  %4264 = vmatpush1.bf16.msra.mxu1 %v6650_v36 }
 0x612   :  { %4202 = vmatprep.subr.bf16.mxu0 %v6651_v39  ;;  %4266 = vmatprep.subr.bf16.mxu1 %v6652_v5  ;;  %v6702_v5 = vld [vmem:[#allocation71_spill] sm:$0xff] }
 0x615   :  { %4204 = vmatpush1.bf16.msra.mxu0 %v6653_v11  ;;  %4268 = vmatpush1.bf16.msra.mxu1 %v6654_v40  ;;  %v6701_v40 = vld [vmem:[#allocation70_spill] sm:$0xff] }
 0x616   :  { %4206 = vmatprep.subr.bf16.mxu0 %v6655_v32  ;;  %4270 = vmatprep.subr.bf16.mxu1 %v6656_v3  ;;  %v6666_v32 = vld [vmem:[#allocation37_spill] sm:$0xff]  ;;  %v6667_v3 = vld [vmem:[#allocation38_spill] sm:$0xff] }
 0x619   :  { %4208 = vmatpush1.bf16.msra.mxu0 %v6657_v12  ;;  %4272 = vmatpush1.bf16.msra.mxu1 %v6658_v53  ;;  %v6668_v12 = vld [vmem:[#allocation39_spill] sm:$0xff]  ;;  %v6669_v53 = vld [vmem:[#allocation40_spill] sm:$0xff] }
 0x61a   :  { %4210 = vmatprep.subr.bf16.mxu0 %v6659_v23  ;;  %4274 = vmatprep.subr.bf16.mxu1 %v6660_v19  ;;  %v6670_v23 = vld [vmem:[#allocation41_spill] sm:$0xff]  ;;  %v6671_v19 = vld [vmem:[#allocation42_spill] sm:$0xff] }
 0x61d   :  { %4212 = vmatpush1.bf16.msra.mxu0 %v6661_v56  ;;  %4276 = vmatpush1.bf16.msra.mxu1 %v6662_v44  ;;  %v6672_v56 = vld [vmem:[#allocation43_spill] sm:$0xff]  ;;  %v6673_v44 = vld [vmem:[#allocation44_spill] sm:$0xff] }
 0x61e   :  { %4214 = vmatprep.subr.bf16.mxu0 %v6663_v63  ;;  %4278 = vmatprep.subr.bf16.mxu1 %v6664_v13  ;;  %v6674_v63 = vld [vmem:[#allocation45_spill] sm:$0xff]  ;;  %v6675_v13 = vld [vmem:[#allocation46_spill] sm:$0xff] }
 0x621   :  { %4216 = vmatpush1.bf16.msra.mxu0 %v6665_v57  ;;  %4280 = vmatpush1.bf16.msra.mxu1 %v6666_v32  ;;  %v6676_v57 = vld [vmem:[#allocation47_spill] sm:$0xff]  ;;  %v6677_v32 = vld [vmem:[#allocation48_spill] sm:$0xff] }
 0x622   :  { %4218 = vmatprep.subr.bf16.mxu0 %v6667_v3  ;;  %4282 = vmatprep.subr.bf16.mxu1 %v6668_v12  ;;  %v6678_v3 = vld [vmem:[#allocation49_spill] sm:$0xff]  ;;  %v6679_v12 = vld [vmem:[#allocation50_spill] sm:$0xff] }
 0x625   :  { %4220 = vmatpush1.bf16.msra.mxu0 %v6669_v53  ;;  %4284 = vmatpush1.bf16.msra.mxu1 %v6670_v23  ;;  %v6680_v53 = vld [vmem:[#allocation51_spill] sm:$0xff]  ;;  %v6681_v23 = vld [vmem:[#allocation52_spill] sm:$0xff] }
 0x626   :  { %4222 = vmatprep.subr.bf16.mxu0 %v6671_v19  ;;  %4286 = vmatprep.subr.bf16.mxu1 %v6672_v56  ;;  %v6682_v19 = vld [vmem:[#allocation53_spill] sm:$0xff]  ;;  %v6683_v56 = vld [vmem:[#allocation54_spill] sm:$0xff] }
 0x629   :  { %4224 = vmatpush1.bf16.msra.mxu0 %v6673_v44  ;;  %4288 = vmatpush1.bf16.msra.mxu1 %v6674_v63  ;;  %v6684_v44 = vld [vmem:[#allocation55_spill] sm:$0xff]  ;;  %v6685_v63 = vld [vmem:[#allocation56_spill] sm:$0xff] }
 0x62a   :  { %4226 = vmatprep.subr.bf16.mxu0 %v6675_v13  ;;  %4290 = vmatprep.subr.bf16.mxu1 %v6676_v57  ;;  %v6686_v13 = vld [vmem:[#allocation57_spill] sm:$0xff]  ;;  %v6687_v57 = vld [vmem:[#allocation58_spill] sm:$0xff] }
 0x62d   :  { %4228 = vmatpush1.bf16.msra.mxu0 %v6677_v32  ;;  %4292 = vmatpush1.bf16.msra.mxu1 %v6678_v3  ;;  %v6688_v32 = vld [vmem:[#allocation59_spill] sm:$0xff]  ;;  %v6689_v3 = vld [vmem:[#allocation60_spill] sm:$0xff] }
 0x62e   :  { %4230 = vmatprep.subr.bf16.mxu0 %v6679_v12  ;;  %4294 = vmatprep.subr.bf16.mxu1 %v6680_v53  ;;  %v6690_v12 = vld [vmem:[#allocation61_spill] sm:$0xff]  ;;  %v6691_v53 = vld [vmem:[#allocation62_spill] sm:$0xff] }
 0x631   :  { %4232 = vmatpush1.bf16.msra.mxu0 %v6681_v23  ;;  %4296 = vmatpush1.bf16.msra.mxu1 %v6682_v19  ;;  %v6692_v23 = vld [vmem:[#allocation63_spill] sm:$0xff]  ;;  %v6693_v19 = vld [vmem:[#allocation64_spill] sm:$0xff] }
 0x632   :  { %4234 = vmatprep.subr.bf16.mxu0 %v6683_v56  ;;  %4298 = vmatprep.subr.bf16.mxu1 %v6684_v44  ;;  %v6694_v56 = vld [vmem:[#allocation65_spill] sm:$0xff]  ;;  %v6695_v44 = vld [vmem:[#allocation66_spill] sm:$0xff] }
 0x635   :  { %4236 = vmatpush1.bf16.msra.mxu0 %v6685_v63  ;;  %4300 = vmatpush1.bf16.msra.mxu1 %v6686_v13  ;;  %v6696_v63 = vld [vmem:[#allocation67_spill] sm:$0xff]  ;;  %v6697_v13 = vld [vmem:[#allocation68_spill] sm:$0xff] }
 0x636   :  { %4238 = vmatprep.subr.bf16.mxu0 %v6687_v57  ;;  %4302 = vmatprep.subr.bf16.mxu1 %v6688_v32  ;;  %v6698_v57 = vld [vmem:[#allocation69_spill] sm:$0xff]  ;;  %v6699_v32 = vld [vmem:[#allocation15_spill] sm:$0xff] }
 0x639   :  { %4240 = vmatpush1.bf16.msra.mxu0 %v6689_v3  ;;  %4304 = vmatpush1.bf16.msra.mxu1 %v6690_v12  ;;  %v6700_v3 = vld [vmem:[#allocation16_spill] sm:$0xff] }
 0x63a   :  { %4242 = vmatprep.subr.bf16.mxu0 %v6691_v53  ;;  %4306 = vmatprep.subr.bf16.mxu1 %v6692_v23 }
 0x63d   :  { %4244 = vmatpush1.bf16.msra.mxu0 %v6693_v19  ;;  %4308 = vmatpush1.bf16.msra.mxu1 %v6694_v56 }
 0x63e   :  { %4246 = vmatprep.subr.bf16.mxu0 %v6695_v44  ;;  %4310 = vmatprep.subr.bf16.mxu1 %v6696_v63  ;;  %v6703_v63 = vld [vmem:[#allocation72_spill] sm:$0xff] }
 0x641   :  { %4248 = vmatpush1.bf16.msra.mxu0 %v6697_v13  ;;  %4312 = vmatpush1.bf16.msra.mxu1 %v6698_v57  ;;  %v6704_v57 = vld [vmem:[#allocation73_spill] sm:$0xff] }
 0x642   :  { %4314 = vmatprep.subr.bf16.mxu0 %v6699_v32  ;;  %4346 = vmatprep.subr.bf16.mxu1 %v6700_v3 }
 0x6b7   :  { %v1934_v12 = vpop.f32.mrb[18].mxu0  ;;  %v2005_v53 = vpop.f32.mrb[18].mxu1 }
 0x6b8   :  { %v1935_v23 = vadd.f32 %v1934_v12, %v6701_v40  ;;  %v1936_v11 = vpop.f32.mrb[19].mxu0  ;;  %v2007_v19 = vpop.f32.mrb[19].mxu1  ;;  %v2006_v22 = vadd.f32 %v2005_v53, %v6704_v57 }
 0x6b9   :  { %v1937_v56 = vadd.f32 %v1936_v11, %v6702_v5  ;;  %v2008_v13 = vadd.f32 %v2007_v19, %v6703_v63  ;;  %v2040_v19 = vld [vmem:[#allocation5 + $0xa0] sm:$0xff] }
 0x6ba   :  { %v3140_v39 = vmul.f32 -1.442695, %v1935_v23 }
 0x6bb   :  { %v3141_v44 = vmul.f32 -1.442695, %v1937_v56  ;;  %v3142_v36 = vmul.f32 -1.442695, %v2008_v13  ;;  %v2041_v13 = vld [vmem:[#allocation5 + $0xa8] sm:$0xff] }
 0x6bc   :  { %4850 = vpow2.f32 %v3140_v39 }
 0x6bd   :  { %4852 = vpow2.f32 %v3141_v44 }
 0x6be   :  { %4854 = vpow2.f32 %v3142_v36 }
 0x6bf   :  { %4856 = vtanh.f32 %v2006_v22 }
 0x6c6   :  { %v4851_v32 = vpop.eup %4850 }
 0x6c7   :  { %v4853_v0 = vpop.eup %4852  ;;  %v2013_v3 = vadd.f32 1.0, %v4851_v32 }
 0x6c8   :  { %v2019_v29 = vadd.f32 1.0, %v4853_v0  ;;  %v4855_v12 = vpop.eup %4854 }
 0x6c9   :  { %4858 = vrcp.f32 %v2013_v3  ;;  %v4857_v40 = vpop.eup %4856  ;;  %v2026_v39 = vadd.f32 1.0, %v4855_v12 }
 0x6ca   :  { %4860 = vrcp.f32 %v2019_v29 }
 0x6cb   :  { %4862 = vrcp.f32 %v2026_v39 }
 0x6d3   :  { %v4859_v11 = vpop.eup %4858 }
 0x6d4   :  { %v4861_v23 = vpop.eup %4860  ;;  %v2031_v56 = vmul.f32 %v4859_v11, %v4857_v40  ;;  %v2043_v40 = vld [vmem:[#allocation5 + $0xb8] sm:$0xff] }
 0x6d5   :  { %v2030_v44 = vmul.f32 %v4861_v23, %v5884_v38  ;;  %v2042_v38 = vld [vmem:[#allocation5 + $0xb0] sm:$0xff]  ;;  %v4863_v11 = vpop.eup %4862 }
 0x6d7   :  { %v2111_v63 = vpop.f32.mrb[20].mxu0  ;;  %v2182_v53 = vpop.f32.mrb[20].mxu1  ;;  %v5994_v57 = vadd.f32 %v2031_v56, %v2030_v44 }
 0x6d8   :  { %v2187_v36 = vadd.f32 %v2111_v63, %v2040_v19  ;;  %v2113_v22 = vpop.f32.mrb[21].mxu0  ;;  %v2184_v0 = vpop.f32.mrb[21].mxu1  ;;  %v2189_v16 = vadd.f32 %v2182_v53, %v2042_v38  ;;  %v6707_v38 = vld [vmem:[#allocation21_spill] sm:$0xff] }
 0x6d9   :  { %v2188_v32 = vadd.f32 %v2113_v22, %v2041_v13  ;;  %4864 = vtanh.f32 %v5994_v57  ;;  %v2190_v12 = vadd.f32 %v2184_v0, %v2043_v40 }
 0x6da   :  { %v3143_v29 = vmul.f32 -1.442695, %v2187_v36 }
 0x6db   :  { %v3144_v3 = vmul.f32 -1.442695, %v2188_v32  ;;  %v3145_v5 = vmul.f32 -1.442695, %v2190_v12 }
 0x6dc   :  { %4866 = vpow2.f32 %v3143_v29 }
 0x6dd   :  { %4868 = vpow2.f32 %v3144_v3 }
 0x6de   :  { %4870 = vpow2.f32 %v3145_v5 }
 0x6df   :  { %4872 = vtanh.f32 %v2189_v16  ;;  %v6706_v16 = vld [vmem:[#allocation17_spill] sm:$0xff] }
 0x6e3   :  { %v4865_v23 = vpop.eup %4864 }
 0x6e4   :  { %v2034_v56 = vmul.f32 %v4865_v23, %v4863_v11  ;;  %v6708_v11 = vld [vmem:[#allocation18_spill] sm:$0xff]  ;;  %v6709_v23 = vld [vmem:[#allocation23_spill] sm:$0xff] }
 0x6e6   :  { %v4867_v44 = vpop.eup %4866  ;;  %2038 = vst [vmem:[#allocation11 + $0x20] sm:$0xff] %v2034_v56  ;;  %2284 = vmatprep.mubr.f32.mxu0 %v2034_v56  ;;  %2355 = vmatprep.mubr.f32.mxu1 %v2034_v56  ;;  %v6710_v56 = vld [vmem:[#allocation20_spill] sm:$0xff] }
 0x6e7   :  { %v4869_v63 = vpop.eup %4868  ;;  %v2194_v39 = vadd.f32 1.0, %v4867_v44  ;;  %v6711_v44 = vld [vmem:[#allocation24_spill] sm:$0xff] }
 0x6e8   :  { %v2200_v19 = vadd.f32 1.0, %v4869_v63  ;;  %v4871_v13 = vpop.eup %4870  ;;  %v6712_v63 = vld [vmem:[#allocation22_spill] sm:$0xff] }
 0x6e9   :  { %4874 = vrcp.f32 %v2194_v39  ;;  %v4873_v36 = vpop.eup %4872  ;;  %v2207_v29 = vadd.f32 1.0, %v4871_v13  ;;  %v6713_v39 = vld [vmem:[#allocation25_spill] sm:$0xff]  ;;  %v6715_v13 = vld [vmem:[#allocation27_spill] sm:$0xff] }
 0x6ea   :  { %4876 = vrcp.f32 %v2200_v19  ;;  %v6714_v19 = vld [vmem:[#allocation26_spill] sm:$0xff] }
 0x6eb   :  { %4878 = vrcp.f32 %v2207_v29  ;;  %v6720_v29 = vld [vmem:[#allocation32_spill] sm:$0xff] }
 0x6f3   :  { %v4875_v22 = vpop.eup %4874 }
 0x6f4   :  { %v4877_v0 = vpop.eup %4876  ;;  %v2212_v32 = vmul.f32 %v4875_v22, %v4873_v36  ;;  %v6716_v36 = vld [vmem:[#allocation28_spill] sm:$0xff]  ;;  %v6717_v22 = vld [vmem:[#allocation29_spill] sm:$0xff] }
 0x6f5   :  { %v2211_v53 = vmul.f32 %v4877_v0, %v5888_v54  ;;  %v4879_v40 = vpop.eup %4878  ;;  %v6705_v54 = vld [vmem:[#allocation19_spill] sm:$0xff]  ;;  %v6718_v0 = vld [vmem:[#allocation30_spill] sm:$0xff] }
 0x6f7   :  { %v5998_v3 = vadd.f32 %v2212_v32, %v2211_v53  ;;  %v6719_v32 = vld [vmem:[#allocation31_spill] sm:$0xff]  ;;  %v6721_v53 = vld [vmem:[#allocation33_spill] sm:$0xff] }
 0x6f9   :  { %4880 = vtanh.f32 %v5998_v3 }
 0x703   :  { %v4881_v12 = vpop.eup %4880 }
 0x704   :  { %v2215_v5 = vmul.f32 %v4881_v12, %v4879_v40  ;;  %v6722_v40 = vld [vmem:[#allocation34_spill] sm:$0xff]  ;;  %v6723_v12 = vld [vmem:[#allocation35_spill] sm:$0xff] }
 0x706   :  { %2285 = vmatmul.mubr.f32.vlgmr.msra.gmra.mrb[22].mxu0 %v2215_v5  ;;  %2356 = vmatmul.mubr.f32.vlgmr.msra.gmra.mrb[22].mxu1 %v2215_v5 }
 0x707   :  { %4316 = vmatpush1.bf16.msra.mxu0 %v5146_v8  ;;  %4348 = vmatpush1.bf16.msra.mxu1 %v5159_v25 }
 0x708   :  { %4318 = vmatprep.subr.bf16.mxu0 %v5148_v9  ;;  %4350 = vmatprep.subr.bf16.mxu1 %v5169_v33 }
 0x709   :  { %2461 = vmatprep.mubr.f32.mxu0 %v6413_v4  ;;  %2532 = vmatprep.mubr.f32.mxu1 %v6413_v4 }
 0x70b   :  { %4320 = vmatpush1.bf16.msra.mxu0 %v5152_v14  ;;  %4352 = vmatpush1.bf16.msra.mxu1 %v5171_v37 }
 0x70c   :  { %4322 = vmatprep.subr.bf16.mxu0 %v5155_v17  ;;  %4354 = vmatprep.subr.bf16.mxu1 %v5177_v45 }
 0x70f   :  { %4324 = vmatpush1.bf16.msra.mxu0 %v5162_v26  ;;  %4356 = vmatpush1.bf16.msra.mxu1 %v5183_v48 }
 0x710   :  { %4326 = vmatprep.subr.bf16.mxu0 %v5166_v30  ;;  %4358 = vmatprep.subr.bf16.mxu1 %v5186_v52 }
 0x713   :  { %4328 = vmatpush1.bf16.msra.mxu0 %v5175_v42  ;;  %4360 = vmatpush1.bf16.msra.mxu1 %v5195_v62 }
 0x714   :  { %4330 = vmatprep.subr.bf16.mxu0 %v5180_v46  ;;  %4362 = vmatprep.subr.bf16.mxu1 %v5198_v1 }
 0x717   :  { %4332 = vmatpush1.bf16.msra.mxu0 %v5189_v55  ;;  %4364 = vmatpush1.bf16.msra.mxu1 %v5207_v15 }
 0x718   :  { %4334 = vmatprep.subr.bf16.mxu0 %v5192_v58  ;;  %4366 = vmatprep.subr.bf16.mxu1 %v5210_v18 }
 0x71b   :  { %4336 = vmatpush1.bf16.msra.mxu0 %v5201_v7  ;;  %4368 = vmatpush1.bf16.msra.mxu1 %v5219_v31 }
 0x71c   :  { %4338 = vmatprep.subr.bf16.mxu0 %v5204_v10  ;;  %4370 = vmatprep.subr.bf16.mxu1 %v5222_v34 }
 0x71f   :  { %4340 = vmatpush1.bf16.msra.mxu0 %v5213_v24  ;;  %4372 = vmatpush1.bf16.msra.mxu1 %v5229_v43 }
 0x720   :  { %4342 = vmatprep.subr.bf16.mxu0 %v5216_v27  ;;  %4374 = vmatprep.subr.bf16.mxu1 %v5234_v51 }
 0x723   :  { %4344 = vmatpush1.bf16.msra.mxu0 %v5225_v41  ;;  %4376 = vmatpush1.bf16.msra.mxu1 %v5240_v61 }
 0x724   :  { %4378 = vmatprep.subr.bf16.mxu0 %v5231_v47  ;;  %4442 = vmatprep.subr.bf16.mxu1 %v5246_v6 }
 0x726   :  { %2462 = vmatmul.mubr.f32.vlgmr.msra.gmra.mrb[24].mxu0 %v2215_v5  ;;  %2533 = vmatmul.mubr.f32.vlgmr.msra.gmra.mrb[24].mxu1 %v2215_v5  ;;  %v6724_v5 = vld [vmem:[#allocation36_spill] sm:$0xff] }
 0x727   :  { %4380 = vmatpush1.bf16.msra.mxu0 %v5237_v60  ;;  %4444 = vmatpush1.bf16.msra.mxu1 %v5254_v21 }
 0x728   :  { %4382 = vmatprep.subr.bf16.mxu0 %v5243_v2  ;;  %4446 = vmatprep.subr.bf16.mxu1 %v5260_v35 }
 0x72b   :  { %4384 = vmatpush1.bf16.msra.mxu0 %v5250_v20  ;;  %4448 = vmatpush1.bf16.msra.mxu1 %v5267_v50 }
 0x72c   :  { %4386 = vmatprep.subr.bf16.mxu0 %v5257_v28  ;;  %4450 = vmatprep.subr.bf16.mxu1 %v5273_v59 }
 0x72f   :  { %4388 = vmatpush1.bf16.msra.mxu0 %v5264_v49  ;;  %4452 = vmatpush1.bf16.msra.mxu1 %v6705_v54 }
 0x730   :  { %4390 = vmatprep.subr.bf16.mxu0 %v6706_v16  ;;  %4454 = vmatprep.subr.bf16.mxu1 %v6707_v38 }
 0x733   :  { %4392 = vmatpush1.bf16.msra.mxu0 %v6708_v11  ;;  %4456 = vmatpush1.bf16.msra.mxu1 %v6709_v23 }
 0x734   :  { %4394 = vmatprep.subr.bf16.mxu0 %v6710_v56  ;;  %4458 = vmatprep.subr.bf16.mxu1 %v6711_v44  ;;  %v6761_v44 = vld [vmem:[#allocation71_spill] sm:$0xff] }
 0x737   :  { %4396 = vmatpush1.bf16.msra.mxu0 %v6712_v63  ;;  %4460 = vmatpush1.bf16.msra.mxu1 %v6713_v39  ;;  %v6760_v39 = vld [vmem:[#allocation70_spill] sm:$0xff] }
 0x738   :  { %4398 = vmatprep.subr.bf16.mxu0 %v6714_v19  ;;  %4462 = vmatprep.subr.bf16.mxu1 %v6715_v13  ;;  %v6725_v19 = vld [vmem:[#allocation37_spill] sm:$0xff]  ;;  %v6726_v13 = vld [vmem:[#allocation38_spill] sm:$0xff] }
 0x73b   :  { %4400 = vmatpush1.bf16.msra.mxu0 %v6716_v36  ;;  %4464 = vmatpush1.bf16.msra.mxu1 %v6717_v22  ;;  %v6727_v36 = vld [vmem:[#allocation39_spill] sm:$0xff]  ;;  %v6728_v22 = vld [vmem:[#allocation40_spill] sm:$0xff] }
 0x73c   :  { %4402 = vmatprep.subr.bf16.mxu0 %v6718_v0  ;;  %4466 = vmatprep.subr.bf16.mxu1 %v6719_v32  ;;  %v6729_v0 = vld [vmem:[#allocation41_spill] sm:$0xff]  ;;  %v6730_v32 = vld [vmem:[#allocation42_spill] sm:$0xff] }
 0x73f   :  { %4404 = vmatpush1.bf16.msra.mxu0 %v6720_v29  ;;  %4468 = vmatpush1.bf16.msra.mxu1 %v6721_v53  ;;  %v6731_v29 = vld [vmem:[#allocation43_spill] sm:$0xff]  ;;  %v6732_v53 = vld [vmem:[#allocation44_spill] sm:$0xff] }
 0x740   :  { %4406 = vmatprep.subr.bf16.mxu0 %v6722_v40  ;;  %4470 = vmatprep.subr.bf16.mxu1 %v6723_v12  ;;  %v6733_v40 = vld [vmem:[#allocation45_spill] sm:$0xff]  ;;  %v6734_v12 = vld [vmem:[#allocation46_spill] sm:$0xff] }
 0x743   :  { %4408 = vmatpush1.bf16.msra.mxu0 %v6724_v5  ;;  %4472 = vmatpush1.bf16.msra.mxu1 %v6725_v19  ;;  %v6735_v5 = vld [vmem:[#allocation47_spill] sm:$0xff]  ;;  %v6736_v19 = vld [vmem:[#allocation48_spill] sm:$0xff] }
 0x744   :  { %4410 = vmatprep.subr.bf16.mxu0 %v6726_v13  ;;  %4474 = vmatprep.subr.bf16.mxu1 %v6727_v36  ;;  %v6737_v13 = vld [vmem:[#allocation49_spill] sm:$0xff]  ;;  %v6738_v36 = vld [vmem:[#allocation50_spill] sm:$0xff] }
 0x747   :  { %4412 = vmatpush1.bf16.msra.mxu0 %v6728_v22  ;;  %4476 = vmatpush1.bf16.msra.mxu1 %v6729_v0  ;;  %v6739_v22 = vld [vmem:[#allocation51_spill] sm:$0xff]  ;;  %v6740_v0 = vld [vmem:[#allocation52_spill] sm:$0xff] }
 0x748   :  { %4414 = vmatprep.subr.bf16.mxu0 %v6730_v32  ;;  %4478 = vmatprep.subr.bf16.mxu1 %v6731_v29  ;;  %v6741_v32 = vld [vmem:[#allocation53_spill] sm:$0xff]  ;;  %v6742_v29 = vld [vmem:[#allocation54_spill] sm:$0xff] }
 0x74b   :  { %4416 = vmatpush1.bf16.msra.mxu0 %v6732_v53  ;;  %4480 = vmatpush1.bf16.msra.mxu1 %v6733_v40  ;;  %v6743_v53 = vld [vmem:[#allocation55_spill] sm:$0xff]  ;;  %v6744_v40 = vld [vmem:[#allocation56_spill] sm:$0xff] }
 0x74c   :  { %4418 = vmatprep.subr.bf16.mxu0 %v6734_v12  ;;  %4482 = vmatprep.subr.bf16.mxu1 %v6735_v5  ;;  %v6745_v12 = vld [vmem:[#allocation57_spill] sm:$0xff]  ;;  %v6746_v5 = vld [vmem:[#allocation58_spill] sm:$0xff] }
 0x74f   :  { %4420 = vmatpush1.bf16.msra.mxu0 %v6736_v19  ;;  %4484 = vmatpush1.bf16.msra.mxu1 %v6737_v13  ;;  %v6747_v19 = vld [vmem:[#allocation59_spill] sm:$0xff]  ;;  %v6748_v13 = vld [vmem:[#allocation60_spill] sm:$0xff] }
 0x750   :  { %4422 = vmatprep.subr.bf16.mxu0 %v6738_v36  ;;  %4486 = vmatprep.subr.bf16.mxu1 %v6739_v22  ;;  %v6749_v36 = vld [vmem:[#allocation61_spill] sm:$0xff]  ;;  %v6750_v22 = vld [vmem:[#allocation62_spill] sm:$0xff] }
 0x753   :  { %4424 = vmatpush1.bf16.msra.mxu0 %v6740_v0  ;;  %4488 = vmatpush1.bf16.msra.mxu1 %v6741_v32  ;;  %v6751_v0 = vld [vmem:[#allocation63_spill] sm:$0xff]  ;;  %v6752_v32 = vld [vmem:[#allocation64_spill] sm:$0xff] }
 0x754   :  { %4426 = vmatprep.subr.bf16.mxu0 %v6742_v29  ;;  %4490 = vmatprep.subr.bf16.mxu1 %v6743_v53  ;;  %v6753_v29 = vld [vmem:[#allocation65_spill] sm:$0xff]  ;;  %v6754_v53 = vld [vmem:[#allocation66_spill] sm:$0xff] }
 0x757   :  { %4428 = vmatpush1.bf16.msra.mxu0 %v6744_v40  ;;  %4492 = vmatpush1.bf16.msra.mxu1 %v6745_v12  ;;  %v6755_v40 = vld [vmem:[#allocation67_spill] sm:$0xff]  ;;  %v6756_v12 = vld [vmem:[#allocation68_spill] sm:$0xff] }
 0x758   :  { %4430 = vmatprep.subr.bf16.mxu0 %v6746_v5  ;;  %4494 = vmatprep.subr.bf16.mxu1 %v6747_v19  ;;  %v6757_v5 = vld [vmem:[#allocation69_spill] sm:$0xff]  ;;  %v6758_v19 = vld [vmem:[#allocation15_spill] sm:$0xff] }
 0x75b   :  { %4432 = vmatpush1.bf16.msra.mxu0 %v6748_v13  ;;  %4496 = vmatpush1.bf16.msra.mxu1 %v6749_v36  ;;  %v6759_v13 = vld [vmem:[#allocation16_spill] sm:$0xff] }
 0x75c   :  { %4434 = vmatprep.subr.bf16.mxu0 %v6750_v22  ;;  %4498 = vmatprep.subr.bf16.mxu1 %v6751_v0 }
 0x75f   :  { %4436 = vmatpush1.bf16.msra.mxu0 %v6752_v32  ;;  %4500 = vmatpush1.bf16.msra.mxu1 %v6753_v29 }
 0x760   :  { %4438 = vmatprep.subr.bf16.mxu0 %v6754_v53  ;;  %4502 = vmatprep.subr.bf16.mxu1 %v6755_v40  ;;  %v6762_v40 = vld [vmem:[#allocation72_spill] sm:$0xff] }
 0x763   :  { %4440 = vmatpush1.bf16.msra.mxu0 %v6756_v12  ;;  %4504 = vmatpush1.bf16.msra.mxu1 %v6757_v5  ;;  %v6763_v5 = vld [vmem:[#allocation73_spill] sm:$0xff] }
 0x764   :  { %4506 = vmatprep.subr.bf16.mxu0 %v6758_v19  ;;  %4538 = vmatprep.subr.bf16.mxu1 %v6759_v13 }
 0x7d9   :  { %v2286_v36 = vpop.f32.mrb[22].mxu0  ;;  %v2357_v22 = vpop.f32.mrb[22].mxu1 }
 0x7da   :  { %v2287_v0 = vadd.f32 %v2286_v36, %v6760_v39  ;;  %v2288_v63 = vpop.f32.mrb[23].mxu0  ;;  %v2359_v32 = vpop.f32.mrb[23].mxu1  ;;  %v2358_v11 = vadd.f32 %v2357_v22, %v6763_v5 }
 0x7db   :  { %v2289_v29 = vadd.f32 %v2288_v63, %v6761_v44  ;;  %v2360_v12 = vadd.f32 %v2359_v32, %v6762_v40  ;;  %v2392_v32 = vld [vmem:[#allocation5 + $0xc0] sm:$0xff] }
 0x7dc   :  { %v3146_v56 = vmul.f32 -1.442695, %v2287_v0 }
 0x7dd   :  { %v3147_v53 = vmul.f32 -1.442695, %v2289_v29  ;;  %v3148_v23 = vmul.f32 -1.442695, %v2360_v12  ;;  %v2393_v12 = vld [vmem:[#allocation5 + $0xc8] sm:$0xff] }
 0x7de   :  { %4882 = vpow2.f32 %v3146_v56 }
 0x7df   :  { %4884 = vpow2.f32 %v3147_v53 }
 0x7e0   :  { %4886 = vpow2.f32 %v3148_v23 }
 0x7e1   :  { %4888 = vtanh.f32 %v2358_v11 }
 0x7e8   :  { %v4883_v19 = vpop.eup %4882 }
 0x7e9   :  { %v4885_v38 = vpop.eup %4884  ;;  %v2365_v13 = vadd.f32 1.0, %v4883_v19 }
 0x7ea   :  { %v2371_v16 = vadd.f32 1.0, %v4885_v38  ;;  %v4887_v36 = vpop.eup %4886 }
 0x7eb   :  { %4890 = vrcp.f32 %v2365_v13  ;;  %v4889_v39 = vpop.eup %4888  ;;  %v2378_v56 = vadd.f32 1.0, %v4887_v36 }
 0x7ec   :  { %4892 = vrcp.f32 %v2371_v16 }
 0x7ed   :  { %4894 = vrcp.f32 %v2378_v56 }
 0x7f5   :  { %v4891_v63 = vpop.eup %4890 }
 0x7f6   :  { %v4893_v0 = vpop.eup %4892  ;;  %v2383_v29 = vmul.f32 %v4891_v63, %v4889_v39  ;;  %v2395_v39 = vld [vmem:[#allocation5 + $0xd8] sm:$0xff] }
 0x7f7   :  { %v2382_v53 = vmul.f32 %v4893_v0, %v5994_v57  ;;  %v2394_v57 = vld [vmem:[#allocation5 + $0xd0] sm:$0xff]  ;;  %v4895_v63 = vpop.eup %4894 }
 0x7f9   :  { %v2463_v40 = vpop.f32.mrb[24].mxu0  ;;  %v2534_v22 = vpop.f32.mrb[24].mxu1  ;;  %v6104_v5 = vadd.f32 %v2383_v29, %v2382_v53 }
 0x7fa   :  { %v2539_v23 = vadd.f32 %v2463_v40, %v2392_v32  ;;  %v2465_v11 = vpop.f32.mrb[25].mxu0  ;;  %v2536_v38 = vpop.f32.mrb[25].mxu1  ;;  %v2541_v54 = vadd.f32 %v2534_v22, %v2394_v57  ;;  %v6808_v57 = vld [vmem:[#allocation61_spill] sm:$0xff] }
 0x7fb   :  { %v2540_v19 = vadd.f32 %v2465_v11, %v2393_v12  ;;  %4896 = vtanh.f32 %v6104_v5  ;;  %v2542_v36 = vadd.f32 %v2536_v38, %v2395_v39 }
 0x7fc   :  { %v3149_v16 = vmul.f32 -1.442695, %v2539_v23 }
 0x7fd   :  { %v3150_v13 = vmul.f32 -1.442695, %v2540_v19  ;;  %v3151_v44 = vmul.f32 -1.442695, %v2542_v36 }
 0x7fe   :  { %4898 = vpow2.f32 %v3149_v16 }
 0x7ff   :  { %4900 = vpow2.f32 %v3150_v13 }
 0x800   :  { %4902 = vpow2.f32 %v3151_v44 }
 0x801   :  { %4904 = vtanh.f32 %v2541_v54  ;;  %v6807_v54 = vld [vmem:[#allocation60_spill] sm:$0xff] }
 0x805   :  { %v4897_v0 = vpop.eup %4896 }
 0x806   :  { %v2386_v29 = vmul.f32 %v4897_v0, %v4895_v63  ;;  %v6809_v63 = vld [vmem:[#allocation62_spill] sm:$0xff]  ;;  %v6810_v0 = vld [vmem:[#allocation63_spill] sm:$0xff] }
 0x808   :  { %v4899_v53 = vpop.eup %4898  ;;  %2390 = vst [vmem:[#allocation11 + $0x28] sm:$0xff] %v2386_v29  ;;  %2636 = vmatprep.mubr.f32.mxu0 %v2386_v29  ;;  %2707 = vmatprep.mubr.f32.mxu1 %v2386_v29  ;;  %v6811_v29 = vld [vmem:[#allocation64_spill] sm:$0xff] }
 0x809   :  { %v4901_v40 = vpop.eup %4900  ;;  %v2546_v56 = vadd.f32 1.0, %v4899_v53  ;;  %v6812_v53 = vld [vmem:[#allocation65_spill] sm:$0xff] }
 0x80a   :  { %v2552_v32 = vadd.f32 1.0, %v4901_v40  ;;  %v4903_v12 = vpop.eup %4902  ;;  %v6813_v40 = vld [vmem:[#allocation66_spill] sm:$0xff] }
 0x80b   :  { %4906 = vrcp.f32 %v2546_v56  ;;  %v4905_v23 = vpop.eup %4904  ;;  %v2559_v16 = vadd.f32 1.0, %v4903_v12  ;;  %v6814_v56 = vld [vmem:[#allocation67_spill] sm:$0xff]  ;;  %v6816_v12 = vld [vmem:[#allocation69_spill] sm:$0xff] }
 0x80c   :  { %4908 = vrcp.f32 %v2552_v32  ;;  %v6815_v32 = vld [vmem:[#allocation68_spill] sm:$0xff] }
 0x80d   :  { %4910 = vrcp.f32 %v2559_v16 }
 0x815   :  { %v4907_v11 = vpop.eup %4906 }
 0x816   :  { %v4909_v38 = vpop.eup %4908  ;;  %v2564_v19 = vmul.f32 %v4907_v11, %v4905_v23 }
 0x817   :  { %v2563_v22 = vmul.f32 %v4909_v38, %v5998_v3  ;;  %v4911_v39 = vpop.eup %4910  ;;  %v6806_v3 = vld [vmem:[#allocation59_spill] sm:$0xff]  ;;  %v6817_v38 = vld [vmem:[#allocation70_spill] sm:$0xff] }
 0x819   :  { %v6108_v13 = vadd.f32 %v2564_v19, %v2563_v22 }
 0x81b   :  { %4912 = vtanh.f32 %v6108_v13 }
 0x825   :  { %v4913_v36 = vpop.eup %4912 }
 0x826   :  { %v2567_v44 = vmul.f32 %v4913_v36, %v4911_v39  ;;  %v6818_v39 = vld [vmem:[#allocation71_spill] sm:$0xff] }
 0x828   :  { %2637 = vmatmul.mubr.f32.vlgmr.msra.gmra.mrb[26].mxu0 %v2567_v44  ;;  %2708 = vmatmul.mubr.f32.vlgmr.msra.gmra.mrb[26].mxu1 %v2567_v44 }
 0x829   :  { %4508 = vmatpush1.bf16.msra.mxu0 %v5146_v8  ;;  %4540 = vmatpush1.bf16.msra.mxu1 %v5159_v25  ;;  %v6764_v8 = vld [vmem:[#allocation19_spill] sm:$0xff] }
 0x82a   :  { %4510 = vmatprep.subr.bf16.mxu0 %v5148_v9  ;;  %4542 = vmatprep.subr.bf16.mxu1 %v5169_v33  ;;  %v6765_v9 = vld [vmem:[#allocation17_spill] sm:$0xff]  ;;  %v6768_v25 = vld [vmem:[#allocation23_spill] sm:$0xff]  ;;  %v6771_v33 = vld [vmem:[#allocation22_spill] sm:$0xff] }
 0x82b   :  { %2813 = vmatprep.mubr.f32.mxu0 %v6413_v4  ;;  %2884 = vmatprep.mubr.f32.mxu1 %v6413_v4  ;;  %v6805_v4 = vld [vmem:[#allocation58_spill] sm:$0xff] }
 0x82d   :  { %4512 = vmatpush1.bf16.msra.mxu0 %v5152_v14  ;;  %4544 = vmatpush1.bf16.msra.mxu1 %v5171_v37  ;;  %v6766_v14 = vld [vmem:[#allocation21_spill] sm:$0xff] }
 0x82e   :  { %4514 = vmatprep.subr.bf16.mxu0 %v5155_v17  ;;  %4546 = vmatprep.subr.bf16.mxu1 %v5177_v45  ;;  %v6767_v17 = vld [vmem:[#allocation18_spill] sm:$0xff]  ;;  %v6772_v37 = vld [vmem:[#allocation25_spill] sm:$0xff]  ;;  %v6774_v45 = vld [vmem:[#allocation27_spill] sm:$0xff] }
 0x831   :  { %4516 = vmatpush1.bf16.msra.mxu0 %v5162_v26  ;;  %4548 = vmatpush1.bf16.msra.mxu1 %v5183_v48  ;;  %v6769_v26 = vld [vmem:[#allocation20_spill] sm:$0xff]  ;;  %v6776_v48 = vld [vmem:[#allocation29_spill] sm:$0xff] }
 0x832   :  { %4518 = vmatprep.subr.bf16.mxu0 %v5166_v30  ;;  %4550 = vmatprep.subr.bf16.mxu1 %v5186_v52  ;;  %v6770_v30 = vld [vmem:[#allocation24_spill] sm:$0xff]  ;;  %v6777_v52 = vld [vmem:[#allocation30_spill] sm:$0xff] }
 0x835   :  { %4520 = vmatpush1.bf16.msra.mxu0 %v5175_v42  ;;  %4552 = vmatpush1.bf16.msra.mxu1 %v5195_v62  ;;  %v6773_v42 = vld [vmem:[#allocation26_spill] sm:$0xff]  ;;  %v6780_v62 = vld [vmem:[#allocation33_spill] sm:$0xff] }
 0x836   :  { %4522 = vmatprep.subr.bf16.mxu0 %v5180_v46  ;;  %4554 = vmatprep.subr.bf16.mxu1 %v5198_v1  ;;  %v6775_v46 = vld [vmem:[#allocation28_spill] sm:$0xff]  ;;  %v6781_v1 = vld [vmem:[#allocation34_spill] sm:$0xff] }
 0x839   :  { %4524 = vmatpush1.bf16.msra.mxu0 %v5189_v55  ;;  %4556 = vmatpush1.bf16.msra.mxu1 %v5207_v15  ;;  %v6778_v55 = vld [vmem:[#allocation31_spill] sm:$0xff]  ;;  %v6784_v15 = vld [vmem:[#allocation37_spill] sm:$0xff] }
 0x83a   :  { %4526 = vmatprep.subr.bf16.mxu0 %v5192_v58  ;;  %4558 = vmatprep.subr.bf16.mxu1 %v5210_v18  ;;  %v6779_v58 = vld [vmem:[#allocation32_spill] sm:$0xff]  ;;  %v6785_v18 = vld [vmem:[#allocation38_spill] sm:$0xff] }
 0x83d   :  { %4528 = vmatpush1.bf16.msra.mxu0 %v5201_v7  ;;  %4560 = vmatpush1.bf16.msra.mxu1 %v5219_v31  ;;  %v6782_v7 = vld [vmem:[#allocation35_spill] sm:$0xff]  ;;  %v6788_v31 = vld [vmem:[#allocation41_spill] sm:$0xff] }
 0x83e   :  { %4530 = vmatprep.subr.bf16.mxu0 %v5204_v10  ;;  %4562 = vmatprep.subr.bf16.mxu1 %v5222_v34  ;;  %v6783_v10 = vld [vmem:[#allocation36_spill] sm:$0xff]  ;;  %v6789_v34 = vld [vmem:[#allocation42_spill] sm:$0xff] }
 0x841   :  { %4532 = vmatpush1.bf16.msra.mxu0 %v5213_v24  ;;  %4564 = vmatpush1.bf16.msra.mxu1 %v5229_v43  ;;  %v6786_v24 = vld [vmem:[#allocation39_spill] sm:$0xff]  ;;  %v6791_v43 = vld [vmem:[#allocation44_spill] sm:$0xff] }
 0x842   :  { %4534 = vmatprep.subr.bf16.mxu0 %v5216_v27  ;;  %4566 = vmatprep.subr.bf16.mxu1 %v5234_v51  ;;  %v6787_v27 = vld [vmem:[#allocation40_spill] sm:$0xff]  ;;  %v6793_v51 = vld [vmem:[#allocation46_spill] sm:$0xff] }
 0x845   :  { %4536 = vmatpush1.bf16.msra.mxu0 %v5225_v41  ;;  %4568 = vmatpush1.bf16.msra.mxu1 %v5240_v61  ;;  %v6790_v41 = vld [vmem:[#allocation43_spill] sm:$0xff]  ;;  %v6795_v61 = vld [vmem:[#allocation48_spill] sm:$0xff] }
 0x846   :  { %4570 = vmatprep.subr.bf16.mxu0 %v5231_v47  ;;  %4634 = vmatprep.subr.bf16.mxu1 %v5246_v6  ;;  %v6792_v47 = vld [vmem:[#allocation45_spill] sm:$0xff]  ;;  %v6797_v6 = vld [vmem:[#allocation50_spill] sm:$0xff] }
 0x848   :  { %2814 = vmatmul.mubr.f32.vlgmr.msra.gmra.mrb[28].mxu0 %v2567_v44  ;;  %2885 = vmatmul.mubr.f32.vlgmr.msra.gmra.mrb[28].mxu1 %v2567_v44 }
 0x849   :  { %4572 = vmatpush1.bf16.msra.mxu0 %v5237_v60  ;;  %4636 = vmatpush1.bf16.msra.mxu1 %v5254_v21  ;;  %v6794_v60 = vld [vmem:[#allocation47_spill] sm:$0xff]  ;;  %v6799_v21 = vld [vmem:[#allocation52_spill] sm:$0xff] }
 0x84a   :  { %4574 = vmatprep.subr.bf16.mxu0 %v5243_v2  ;;  %4638 = vmatprep.subr.bf16.mxu1 %v5260_v35  ;;  %v6796_v2 = vld [vmem:[#allocation49_spill] sm:$0xff]  ;;  %v6801_v35 = vld [vmem:[#allocation54_spill] sm:$0xff] }
 0x84d   :  { %4576 = vmatpush1.bf16.msra.mxu0 %v5250_v20  ;;  %4640 = vmatpush1.bf16.msra.mxu1 %v5267_v50  ;;  %v6798_v20 = vld [vmem:[#allocation51_spill] sm:$0xff]  ;;  %v6803_v50 = vld [vmem:[#allocation56_spill] sm:$0xff] }
 0x84e   :  { %4578 = vmatprep.subr.bf16.mxu0 %v5257_v28  ;;  %4642 = vmatprep.subr.bf16.mxu1 %v5273_v59  ;;  %v6800_v28 = vld [vmem:[#allocation53_spill] sm:$0xff] }
 0x84f   :  { %v6804_v59 = vld [vmem:[#allocation57_spill] sm:$0xff] }
 0x851   :  { %4580 = vmatpush1.bf16.msra.mxu0 %v5264_v49  ;;  %4644 = vmatpush1.bf16.msra.mxu1 %v6764_v8  ;;  %v6802_v49 = vld [vmem:[#allocation55_spill] sm:$0xff] }
 0x852   :  { %4582 = vmatprep.subr.bf16.mxu0 %v6765_v9  ;;  %4646 = vmatprep.subr.bf16.mxu1 %v6766_v14  ;;  %v6819_v9 = vld [vmem:[#allocation72_spill] sm:$0xff] }
 0x855   :  { %4584 = vmatpush1.bf16.msra.mxu0 %v6767_v17  ;;  %4648 = vmatpush1.bf16.msra.mxu1 %v6768_v25  ;;  %v6820_v25 = vld [vmem:[#allocation73_spill] sm:$0xff] }
 0x856   :  { %4586 = vmatprep.subr.bf16.mxu0 %v6769_v26  ;;  %4650 = vmatprep.subr.bf16.mxu1 %v6770_v30 }
 0x859   :  { %4588 = vmatpush1.bf16.msra.mxu0 %v6771_v33  ;;  %4652 = vmatpush1.bf16.msra.mxu1 %v6772_v37 }
 0x85a   :  { %4590 = vmatprep.subr.bf16.mxu0 %v6773_v42  ;;  %4654 = vmatprep.subr.bf16.mxu1 %v6774_v45 }
 0x85d   :  { %4592 = vmatpush1.bf16.msra.mxu0 %v6775_v46  ;;  %4656 = vmatpush1.bf16.msra.mxu1 %v6776_v48 }
 0x85e   :  { %4594 = vmatprep.subr.bf16.mxu0 %v6777_v52  ;;  %4658 = vmatprep.subr.bf16.mxu1 %v6778_v55 }
 0x861   :  { %4596 = vmatpush1.bf16.msra.mxu0 %v6779_v58  ;;  %4660 = vmatpush1.bf16.msra.mxu1 %v6780_v62 }
 0x862   :  { %4598 = vmatprep.subr.bf16.mxu0 %v6781_v1  ;;  %4662 = vmatprep.subr.bf16.mxu1 %v6782_v7  ;;  %v2744_v1 = vld [vmem:[#allocation5 + $0xe0] sm:$0xff]  ;;  %v2745_v7 = vld [vmem:[#allocation5 + $0xe8] sm:$0xff] }
 0x865   :  { %4600 = vmatpush1.bf16.msra.mxu0 %v6783_v10  ;;  %4664 = vmatpush1.bf16.msra.mxu1 %v6784_v15 }
 0x866   :  { %4602 = vmatprep.subr.bf16.mxu0 %v6785_v18  ;;  %4666 = vmatprep.subr.bf16.mxu1 %v6786_v24 }
 0x869   :  { %4604 = vmatpush1.bf16.msra.mxu0 %v6787_v27  ;;  %4668 = vmatpush1.bf16.msra.mxu1 %v6788_v31 }
 0x86a   :  { %4606 = vmatprep.subr.bf16.mxu0 %v6789_v34  ;;  %4670 = vmatprep.subr.bf16.mxu1 %v6790_v41 }
 0x86d   :  { %4608 = vmatpush1.bf16.msra.mxu0 %v6791_v43  ;;  %4672 = vmatpush1.bf16.msra.mxu1 %v6792_v47  ;;  %v2747_v47 = vld [vmem:[#allocation5 + $0xf8] sm:$0xff] }
 0x86e   :  { %4610 = vmatprep.subr.bf16.mxu0 %v6793_v51  ;;  %4674 = vmatprep.subr.bf16.mxu1 %v6794_v60 }
 0x871   :  { %4612 = vmatpush1.bf16.msra.mxu0 %v6795_v61  ;;  %4676 = vmatpush1.bf16.msra.mxu1 %v6796_v2 }
 0x872   :  { %4614 = vmatprep.subr.bf16.mxu0 %v6797_v6  ;;  %4678 = vmatprep.subr.bf16.mxu1 %v6798_v20 }
 0x875   :  { %4616 = vmatpush1.bf16.msra.mxu0 %v6799_v21  ;;  %4680 = vmatpush1.bf16.msra.mxu1 %v6800_v28 }
 0x876   :  { %4618 = vmatprep.subr.bf16.mxu0 %v6801_v35  ;;  %4682 = vmatprep.subr.bf16.mxu1 %v6802_v49 }
 0x879   :  { %4620 = vmatpush1.bf16.msra.mxu0 %v6803_v50  ;;  %4684 = vmatpush1.bf16.msra.mxu1 %v6804_v59 }
 0x87a   :  { %4622 = vmatprep.subr.bf16.mxu0 %v6805_v4  ;;  %4686 = vmatprep.subr.bf16.mxu1 %v6806_v3 }
 0x87d   :  { %4624 = vmatpush1.bf16.msra.mxu0 %v6807_v54  ;;  %4688 = vmatpush1.bf16.msra.mxu1 %v6808_v57 }
 0x87e   :  { %4626 = vmatprep.subr.bf16.mxu0 %v6809_v63  ;;  %4690 = vmatprep.subr.bf16.mxu1 %v6810_v0 }
 0x881   :  { %4628 = vmatpush1.bf16.msra.mxu0 %v6811_v29  ;;  %4692 = vmatpush1.bf16.msra.mxu1 %v6812_v53 }
 0x882   :  { %4630 = vmatprep.subr.bf16.mxu0 %v6813_v40  ;;  %4694 = vmatprep.subr.bf16.mxu1 %v6814_v56 }
 0x885   :  { %4632 = vmatpush1.bf16.msra.mxu0 %v6815_v32  ;;  %4696 = vmatpush1.bf16.msra.mxu1 %v6816_v12 }
 0x8fb   :  { %v2638_v23 = vpop.f32.mrb[26].mxu0  ;;  %v2709_v11 = vpop.f32.mrb[26].mxu1 }
 0x8fc   :  { %v2639_v19 = vadd.f32 %v2638_v23, %v6817_v38  ;;  %v2640_v16 = vpop.f32.mrb[27].mxu0  ;;  %v2711_v22 = vpop.f32.mrb[27].mxu1  ;;  %v2710_v26 = vadd.f32 %v2709_v11, %v6820_v25 }
 0x8fd   :  { %v2641_v36 = vadd.f32 %v2640_v16, %v6818_v39  ;;  %v2712_v14 = vadd.f32 %v2711_v22, %v6819_v9 }
 0x8fe   :  { %v3152_v44 = vmul.f32 -1.442695, %v2639_v19 }
 0x8ff   :  { %v3153_v8 = vmul.f32 -1.442695, %v2641_v36  ;;  %v3154_v17 = vmul.f32 -1.442695, %v2712_v14 }
 0x900   :  { %4914 = vpow2.f32 %v3152_v44 }
 0x901   :  { %4916 = vpow2.f32 %v3153_v8 }
 0x902   :  { %4918 = vpow2.f32 %v3154_v17 }
 0x903   :  { %4920 = vtanh.f32 %v2710_v26 }
 0x90a   :  { %v4915_v30 = vpop.eup %4914 }
 0x90b   :  { %v4917_v33 = vpop.eup %4916  ;;  %v2717_v37 = vadd.f32 1.0, %v4915_v30 }
 0x90c   :  { %v2723_v42 = vadd.f32 1.0, %v4917_v33  ;;  %v4919_v45 = vpop.eup %4918 }
 0x90d   :  { %4922 = vrcp.f32 %v2717_v37  ;;  %v4921_v46 = vpop.eup %4920  ;;  %v2730_v58 = vadd.f32 1.0, %v4919_v45 }
 0x90e   :  { %4924 = vrcp.f32 %v2723_v42 }
 0x90f   :  { %4926 = vrcp.f32 %v2730_v58 }
 0x917   :  { %v4923_v48 = vpop.eup %4922 }
 0x918   :  { %v4925_v52 = vpop.eup %4924  ;;  %v2735_v55 = vmul.f32 %v4923_v48, %v4921_v46 }
 0x919   :  { %v2734_v62 = vmul.f32 %v4925_v52, %v6104_v5  ;;  %v2746_v5 = vld [vmem:[#allocation5 + $0xf0] sm:$0xff]  ;;  %v4927_v60 = vpop.eup %4926 }
 0x91b   :  { %v2815_v10 = vpop.f32.mrb[28].mxu0  ;;  %v2886_v15 = vpop.f32.mrb[28].mxu1  ;;  %v6212_v18 = vadd.f32 %v2735_v55, %v2734_v62 }
 0x91c   :  { %v2891_v24 = vadd.f32 %v2815_v10, %v2744_v1  ;;  %v2817_v27 = vpop.f32.mrb[29].mxu0  ;;  %v2888_v31 = vpop.f32.mrb[29].mxu1  ;;  %v2893_v6 = vadd.f32 %v2886_v15, %v2746_v5 }
 0x91d   :  { %v2892_v34 = vadd.f32 %v2817_v27, %v2745_v7  ;;  %4928 = vtanh.f32 %v6212_v18  ;;  %v2894_v51 = vadd.f32 %v2888_v31, %v2747_v47 }
 0x91e   :  { %v3155_v41 = vmul.f32 -1.442695, %v2891_v24 }
 0x91f   :  { %v3156_v43 = vmul.f32 -1.442695, %v2892_v34  ;;  %v3157_v2 = vmul.f32 -1.442695, %v2894_v51 }
 0x920   :  { %4930 = vpow2.f32 %v3155_v41 }
 0x921   :  { %4932 = vpow2.f32 %v3156_v43 }
 0x922   :  { %4934 = vpow2.f32 %v3157_v2 }
 0x923   :  { %4936 = vtanh.f32 %v2893_v6 }
 0x927   :  { %v4929_v61 = vpop.eup %4928 }
 0x928   :  { %v2738_v20 = vmul.f32 %v4929_v61, %v4927_v60 }
 0x92a   :  { %v4931_v21 = vpop.eup %4930  ;;  %2742 = vst [vmem:[#allocation11 + $0x30] sm:$0xff] %v2738_v20  ;;  %2988 = vmatprep.mubr.f32.mxu0 %v2738_v20  ;;  %3059 = vmatprep.mubr.f32.mxu1 %v2738_v20 }
 0x92b   :  { %v4933_v28 = vpop.eup %4932  ;;  %v2898_v35 = vadd.f32 1.0, %v4931_v21 }
 0x92c   :  { %v2904_v49 = vadd.f32 1.0, %v4933_v28  ;;  %v4935_v50 = vpop.eup %4934 }
 0x92d   :  { %4938 = vrcp.f32 %v2898_v35  ;;  %v4937_v59 = vpop.eup %4936  ;;  %v2911_v57 = vadd.f32 1.0, %v4935_v50 }
 0x92e   :  { %4940 = vrcp.f32 %v2904_v49 }
 0x92f   :  { %4942 = vrcp.f32 %v2911_v57 }
 0x937   :  { %v4939_v4 = vpop.eup %4938 }
 0x938   :  { %v4941_v3 = vpop.eup %4940  ;;  %v2916_v54 = vmul.f32 %v4939_v4, %v4937_v59 }
 0x939   :  { %v2915_v63 = vmul.f32 %v4941_v3, %v6108_v13  ;;  %v4943_v29 = vpop.eup %4942 }
 0x93b   :  { %v2917_v0 = vadd.f32 %v2916_v54, %v2915_v63 }
 0x93d   :  { %4944 = vtanh.f32 %v2917_v0 }
 0x947   :  { %v4945_v53 = vpop.eup %4944 }
 0x948   :  { %v2919_v40 = vmul.f32 %v4945_v53, %v4943_v29 }
 0x94a   :  { %2989 = vmatmul.mubr.f32.vlgmr.msra.gmra.mrb[30].mxu0 %v2919_v40  ;;  %3060 = vmatmul.mubr.f32.vlgmr.msra.gmra.mrb[30].mxu1 %v2919_v40 }
 0xa1d   :  { %v2990_v56 = vpop.f32.mrb[30].mxu0  ;;  %v3061_v32 = vpop.f32.mrb[30].mxu1 }
 0xa1e   :  { %v2991_v12 = vadd.f32 %v2990_v56, %v6817_v38  ;;  %v2992_v23 = vpop.f32.mrb[31].mxu0  ;;  %v3063_v11 = vpop.f32.mrb[31].mxu1  ;;  %v3062_v44 = vadd.f32 %v3061_v32, %v6820_v25 }
 0xa1f   :  { %v2993_v19 = vadd.f32 %v2992_v23, %v6818_v39  ;;  %v3064_v13 = vadd.f32 %v3063_v11, %v6819_v9 }
 0xa20   :  { %v3158_v16 = vmul.f32 -1.442695, %v2991_v12 }
 0xa21   :  { %v3159_v22 = vmul.f32 -1.442695, %v2993_v19  ;;  %v3160_v36 = vmul.f32 -1.442695, %v3064_v13 }
 0xa22   :  { %4946 = vpow2.f32 %v3158_v16 }
 0xa23   :  { %4948 = vpow2.f32 %v3159_v22 }
 0xa24   :  { %4950 = vpow2.f32 %v3160_v36 }
 0xa25   :  { %4952 = vtanh.f32 %v3062_v44 }
 0xa2c   :  { %v4947_v8 = vpop.eup %4946 }
 0xa2d   :  { %v4949_v14 = vpop.eup %4948  ;;  %v3069_v17 = vadd.f32 1.0, %v4947_v8 }
 0xa2e   :  { %v3075_v26 = vadd.f32 1.0, %v4949_v14  ;;  %v4951_v38 = vpop.eup %4950 }
 0xa2f   :  { %4954 = vrcp.f32 %v3069_v17  ;;  %v4953_v30 = vpop.eup %4952  ;;  %v3082_v42 = vadd.f32 1.0, %v4951_v38 }
 0xa30   :  { %4956 = vrcp.f32 %v3075_v26 }
 0xa31   :  { %4958 = vrcp.f32 %v3082_v42 }
 0xa39   :  { %v4955_v39 = vpop.eup %4954 }
 0xa3a   :  { %v4957_v33 = vpop.eup %4956  ;;  %v3087_v37 = vmul.f32 %v4955_v39, %v4953_v30 }
 0xa3b   :  { %v3086_v45 = vmul.f32 %v4957_v33, %v6212_v18  ;;  %v4959_v25 = vpop.eup %4958 }
 0xa3d   :  { %v3088_v9 = vadd.f32 %v3087_v37, %v3086_v45 }
 0xa3f   :  { %4960 = vtanh.f32 %v3088_v9 }
 0xa49   :  { %v4961_v46 = vpop.eup %4960 }
 0xa4a   :  { %v3090_v48 = vmul.f32 %v4961_v46, %v4959_v25 }
 0xa4c   :  { %3094 = vst [vmem:[#allocation11 + $0x38] sm:$0xff] %v3090_v48 }
 0xa4d   :  { %5039 = shalt.err (!%p5036_p0)
}
 0xa4e   :  { %s5040_s30 = scalar_lea.hbm %s6237_s4, 1024 }
 0xa4f   :  { %p5041_p1 = scmp.ne.s32.totalorder %s6237_s4, %s5040_s30  ;;  %p5044_p2 = scmp.lt.u32.totalorder %s5040_s30, %s6237_s4 }
 0xa51   :  { %p5046_p3 = pnand %p5044_p2, %p5041_p1 }
 0xa53   :  { %5049 = shalt.err (!%p5046_p3)
}
 0xa54   :  { %s5063_s9 = smov 128   ;;  %s5064_s10 = smov 8  }
 0xa55   :  { %3106 = dma.vmem_to_hbm [thread:$0]  %s3101_s26, 1024, %s6237_s4, [#allocation7], %s5063_s9, %s5063_s9, %s5064_s10  }
 0xa56   :  { %5054 = dma.done.wait [#allocation7], 1024  }
 0xa57   :  { %5055 = vsyncadd [#allocation7], 4294966272 }
 0xa58   :  { %3110 = vsyncpa [#allocation6], 1 }
 0xa59   :  { %3111 = vsyncpa [#allocation9], 1 }
 0xa5a   :  { %3112 = vsyncpa [#allocation7], 1 }

</bundles_post_ra>
